<compile_context>
chip_gen: v7x
topology: tpu7x:2x2x1
jax: 0.10.0
libtpu: 0.0.40
codegen_flags: <defaults>
</compile_context>

<pallas_src>
import functools

import jax
import jax.numpy as jnp
from jax.experimental import pallas as pl
from jax.experimental.pallas import tpu as pltpu


# ---------------------------------------------------------------------------
# Fused kernel: dual MLP (stacked natural+permuted rows) -> normalize -> loss
# ---------------------------------------------------------------------------
def contrast_kernel(z1_ref, z1p_ref, z2_ref, z2p_ref,            # bf16 row tiles
                    w11_ref, b11_ref, w12_ref, b12_ref,          # mlp1 (resident)
                    w21_ref, b21_ref, w22_ref, b22_ref,          # mlp2 (resident)
                    o_ref,                                       # (1, 128) partial sum
                    *, tau, n_rows, tile_n):
    i = pl.program_id(0)
    base = i * tile_n

    def mlp(x_bf16, w1_ref, b1_ref, w2_ref, b2_ref):
        # Linear(+bias) -> ReLU -> Linear(+bias); weights pre-transposed (in, out), bf16.
        h = jnp.dot(x_bf16, w1_ref[...], preferred_element_type=jnp.float32) + b1_ref[...]
        h = jnp.maximum(h, 0.0).astype(jnp.bfloat16)
        return jnp.dot(h, w2_ref[...], preferred_element_type=jnp.float32) + b2_ref[...]

    def normalize(h):
        # F.normalize: x / max(||x||, 1e-12)  ==  x * rsqrt(max(||x||^2, 1e-24))
        ss = jnp.sum(h * h, axis=1, keepdims=True)
        return h * jax.lax.rsqrt(jnp.maximum(ss, 1e-24))

    # Stack natural + permuted rows -> one (2*tile_n, H) matmul per layer/branch.
    x1 = jnp.concatenate([z1_ref[...], z1p_ref[...]], axis=0)
    x2 = jnp.concatenate([z2_ref[...], z2p_ref[...]], axis=0)

    h1 = normalize(mlp(x1, w11_ref, b11_ref, w12_ref, b12_ref))   # (2*tile_n, H) f32
    h2 = normalize(mlp(x2, w21_ref, b21_ref, w22_ref, b22_ref))

    n1, n1p = h1[:tile_n], h1[tile_n:]
    n2, n2p = h2[:tile_n], h2[tile_n:]

    # Row-wise cosine similarities (vectors are unit-norm).
    s_pos = jnp.sum(n1 * n2, axis=1, keepdims=True)               # (tile_n, 1)
    s_n1 = jnp.sum(n1 * n2p, axis=1, keepdims=True)
    s_n2 = jnp.sum(n2 * n1p, axis=1, keepdims=True)

    inv_tau = 1.0 / tau
    # -log(between / (2*between + neg))
    #   == log(2 + exp((s_n1 - s_pos)/tau) + exp((s_n2 - s_pos)/tau))
    per_row = jnp.log(2.0
                      + jnp.exp((s_n1 - s_pos) * inv_tau)
                      + jnp.exp((s_n2 - s_pos) * inv_tau))

    # Mask tail-padding rows (zero-padded in the wrapper, masked again here).
    row_ids = base + jax.lax.broadcasted_iota(jnp.int32, (tile_n, 1), 0)
    per_row = jnp.where(row_ids < n_rows, per_row, 0.0)

    # Lane-dense per-tile partial sum; grid axis is "parallel" (no carried state).
    psum = jnp.sum(per_row, axis=0, keepdims=True)                # (1, 1)
    o_ref[...] = jnp.broadcast_to(psum, (1, 128))


# ---------------------------------------------------------------------------
# Wrapper
# ---------------------------------------------------------------------------
def contrast_forward(params, z1, z2, perm, tau=0.7, tile_n=512):
    """params: ((w11t,b11,w12t,b12), (w21t,b21,w22t,b22)); w*t are (in,out) bf16."""
    (w11, b11, w12, b12), (w21, b21, w22, b22) = params
    n, h = z1.shape

    def round_up(x, m):
        return (x + m - 1) // m * m

    # bf16 rows pack 16 per sublane-tile -> keep tile_n a multiple of 16.
    tile_n = round_up(min(tile_n, round_up(n, 16)), 16)
    num_tiles = pl.cdiv(n, tile_n)
    padded = num_tiles * tile_n

    # Pre-cast to bf16 (halves HBM bytes; matmul already runs in bf16).
    z1b = z1.astype(jnp.bfloat16)
    z2b = z2.astype(jnp.bfloat16)
    perm_i32 = jnp.asarray(perm, jnp.int32)

    # Permutation-partner rows gathered once here (XLA gather), streamed as
    # ordinary BlockSpec inputs -- no per-row DMAs inside the kernel.
    z1p = jnp.take(z1b, perm_i32, axis=0)
    z2p = jnp.take(z2b, perm_i32, axis=0)

    if padded != n:
        pad = ((0, padded - n), (0, 0))
        z1b = jnp.pad(z1b, pad)
        z2b = jnp.pad(z2b, pad)
        z1p = jnp.pad(z1p, pad)
        z2p = jnp.pad(z2p, pad)

    row_tile = pl.BlockSpec((tile_n, h), lambda i: (i, 0))
    w_spec = pl.BlockSpec((h, h), lambda i: (0, 0))   # VMEM-resident across tiles
    b_spec = pl.BlockSpec((1, h), lambda i: (0, 0))

    grid_spec = pltpu.PrefetchScalarGridSpec(
        num_scalar_prefetch=0,
        grid=(num_tiles,),
        in_specs=[row_tile, row_tile, row_tile, row_tile,
                  w_spec, b_spec, w_spec, b_spec,
                  w_spec, b_spec, w_spec, b_spec],
        out_specs=pl.BlockSpec((1, 128), lambda i: (i, 0)),
    )

    kernel = functools.partial(contrast_kernel, tau=float(tau),
                               n_rows=n, tile_n=tile_n)
    partials = pl.pallas_call(
        kernel,
        out_shape=jax.ShapeDtypeStruct((num_tiles, 128), jnp.float32),
        grid_spec=grid_spec,
        compiler_params=pltpu.CompilerParams(
            # No cross-iteration state -> safe to shard across v7x's 2 TCs.
            dimension_semantics=("parallel",)),
    )(z1b, z1p, z2b, z2p,
      w11, b11, w12, b12, w21, b21, w22, b22)

    return jnp.sum(partials[:, 0]) * (1.0 / n)


def init_linear(key, in_f, out_f):
    """PyTorch default Linear init U(-k, k), k = 1/sqrt(in_features).
    Weight is returned PRE-TRANSPOSED to (in, out) and cast to bf16 for the MXU."""
    kw, kb = jax.random.split(key)
    k = 1.0 / jnp.sqrt(jnp.float32(in_f))
    wt = jax.random.uniform(kw, (in_f, out_f), jnp.float32, -k, k).astype(jnp.bfloat16)
    b = jax.random.uniform(kb, (1, out_f), jnp.float32, -k, k)
    return wt, b


# ---------------------------------------------------------------------------
# Pure-JAX reference (same bf16 matmul precision) for a sanity check
# ---------------------------------------------------------------------------
def reference_loss(params, z1, z2, perm, tau):
    (w11, b11, w12, b12), (w21, b21, w22, b22) = params

    def mlp(x, w1, b1, w2, b2):
        h = jnp.dot(x.astype(jnp.bfloat16), w1, preferred_element_type=jnp.float32) + b1
        h = jnp.maximum(h, 0.0)
        return jnp.dot(h.astype(jnp.bfloat16), w2, preferred_element_type=jnp.float32) + b2

    def norm(x):
        nrm = jnp.sqrt(jnp.sum(x * x, axis=1, keepdims=True))
        return x / jnp.maximum(nrm, 1e-12)

    h1 = norm(mlp(z1, w11, b11, w12, b12))
    h2 = norm(mlp(z2, w21, b21, w22, b22))
    s_pos = jnp.sum(h1 * h2, axis=1)
    s_n1 = jnp.sum(h1 * h2[perm], axis=1)
    s_n2 = jnp.sum(h2 * h1[perm], axis=1)
    between = jnp.exp(s_pos / tau)
    neg = jnp.exp(s_n1 / tau) + jnp.exp(s_n2 / tau)
    return jnp.mean(-jnp.log(between / (between + between + neg)))


if __name__ == "__main__":
    N, H = 300, 128          # num nodes (exercises tail masking), num_hidden
    TAU = 0.7

    key = jax.random.PRNGKey(0)
    k_z1, k_z2, k_perm, k1, k2, k3, k4 = jax.random.split(key, 7)

    z1 = jax.random.normal(k_z1, (N, H), jnp.float32)
    z2 = jax.random.normal(k_z2, (N, H), jnp.float32)
    # TODO(synk): torch.randperm draws a fresh permutation each forward; here a
    # deterministic jax.random.permutation is passed in explicitly.
    perm = jax.random.permutation(k_perm, N)

    mlp1 = (*init_linear(k1, H, H), *init_linear(k2, H, H))
    mlp2 = (*init_linear(k3, H, H), *init_linear(k4, H, H))
    params = (mlp1, mlp2)

    loss = jax.block_until_ready(contrast_forward(params, z1, z2, perm, tau=TAU))
    ref = jax.block_until_ready(reference_loss(params, z1, z2, perm, TAU))

    assert loss.shape == () and bool(jnp.isfinite(loss))
    assert bool(jnp.abs(loss - ref) < 5e-2), (float(loss), float(ref))
    print("KERNEL_OK")
</pallas_src>

<mosaic_0001>
module attributes {stable_mosaic.version = 11 : i64} {
  func.func @contrast_kernel(%arg0: i32, %arg1: memref<304x128xbf16, #tpu.memory_space<vmem>>, %arg2: memref<304x128xbf16, #tpu.memory_space<vmem>>, %arg3: memref<304x128xbf16, #tpu.memory_space<vmem>>, %arg4: memref<304x128xbf16, #tpu.memory_space<vmem>>, %arg5: memref<128x128xbf16, #tpu.memory_space<vmem>>, %arg6: memref<1x128xf32, #tpu.memory_space<vmem>>, %arg7: memref<128x128xbf16, #tpu.memory_space<vmem>>, %arg8: memref<1x128xf32, #tpu.memory_space<vmem>>, %arg9: memref<128x128xbf16, #tpu.memory_space<vmem>>, %arg10: memref<1x128xf32, #tpu.memory_space<vmem>>, %arg11: memref<128x128xbf16, #tpu.memory_space<vmem>>, %arg12: memref<1x128xf32, #tpu.memory_space<vmem>>, %arg13: memref<1x128xf32, #tpu.memory_space<vmem>>) attributes {dimension_semantics = [#tpu.dimension_semantics<parallel>], iteration_bounds = array<i64: 1>, scalar_prefetch = 0 : i64, scratch_operands = 0 : i64, tpu.core_type = #tpu.core_type<tc>, window_params = [{transform_indices = @transform_0, window_bounds = array<i64: 304, 128>}, {transform_indices = @transform_1, window_bounds = array<i64: 304, 128>}, {transform_indices = @transform_2, window_bounds = array<i64: 304, 128>}, {transform_indices = @transform_3, window_bounds = array<i64: 304, 128>}, {pipeline_mode = #tpu.pipeline_mode<synchronous>, transform_indices = @transform_4, window_bounds = array<i64: 128, 128>}, {pipeline_mode = #tpu.pipeline_mode<synchronous>, transform_indices = @transform_5, window_bounds = array<i64: 1, 128>}, {pipeline_mode = #tpu.pipeline_mode<synchronous>, transform_indices = @transform_6, window_bounds = array<i64: 128, 128>}, {pipeline_mode = #tpu.pipeline_mode<synchronous>, transform_indices = @transform_7, window_bounds = array<i64: 1, 128>}, {pipeline_mode = #tpu.pipeline_mode<synchronous>, transform_indices = @transform_8, window_bounds = array<i64: 128, 128>}, {pipeline_mode = #tpu.pipeline_mode<synchronous>, transform_indices = @transform_9, window_bounds = array<i64: 1, 128>}, {pipeline_mode = #tpu.pipeline_mode<synchronous>, transform_indices = @transform_10, window_bounds = array<i64: 128, 128>}, {pipeline_mode = #tpu.pipeline_mode<synchronous>, transform_indices = @transform_11, window_bounds = array<i64: 1, 128>}, {transform_indices = @transform_12, window_bounds = array<i64: 1, 128>}]} {
    %c304_i32 = arith.constant 304 : i32
    %0 = arith.muli %arg0, %c304_i32 : i32
    %c0 = arith.constant 0 : index
    %c0_0 = arith.constant 0 : index
    %1 = vector.load %arg1[%c0, %c0_0] : memref<304x128xbf16, #tpu.memory_space<vmem>>, vector<304x128xbf16>
    %c0_1 = arith.constant 0 : index
    %c0_2 = arith.constant 0 : index
    %2 = vector.load %arg2[%c0_1, %c0_2] : memref<304x128xbf16, #tpu.memory_space<vmem>>, vector<304x128xbf16>
    %3 = tpu.concatenate %1, %2 in 0 : vector<304x128xbf16>, vector<304x128xbf16> -> vector<608x128xbf16>
    %c0_3 = arith.constant 0 : index
    %c0_4 = arith.constant 0 : index
    %4 = vector.load %arg3[%c0_3, %c0_4] : memref<304x128xbf16, #tpu.memory_space<vmem>>, vector<304x128xbf16>
    %c0_5 = arith.constant 0 : index
    %c0_6 = arith.constant 0 : index
    %5 = vector.load %arg4[%c0_5, %c0_6] : memref<304x128xbf16, #tpu.memory_space<vmem>>, vector<304x128xbf16>
    %6 = tpu.concatenate %4, %5 in 0 : vector<304x128xbf16>, vector<304x128xbf16> -> vector<608x128xbf16>
    %c0_7 = arith.constant 0 : index
    %c0_8 = arith.constant 0 : index
    %7 = vector.load %arg5[%c0_7, %c0_8] : memref<128x128xbf16, #tpu.memory_space<vmem>>, vector<128x128xbf16>
    %cst = arith.constant dense<0.000000e+00> : vector<608x128xf32>
    %8 = tpu.matmul %3, %7, %cst {dimension_numbers = #tpu.dot_dimension_numbers<[1], [0], [0], [1], [0, 0, 1, 1], [], []>} : vector<608x128xbf16>, vector<128x128xbf16>, vector<608x128xf32> -> vector<608x128xf32>
    %c0_9 = arith.constant 0 : index
    %c0_10 = arith.constant 0 : index
    %9 = vector.load %arg6[%c0_9, %c0_10] : memref<1x128xf32, #tpu.memory_space<vmem>>, vector<1x128xf32>
    %10 = vector.broadcast %9 : vector<1x128xf32> to vector<608x128xf32>
    %11 = arith.addf %8, %10 : vector<608x128xf32>
    %cst_11 = arith.constant 0.000000e+00 : f32
    %12 = vector.broadcast %cst_11 : f32 to vector<608x128xf32>
    %13 = arith.maximumf %11, %12 : vector<608x128xf32>
    %14 = arith.truncf %13 : vector<608x128xf32> to vector<608x128xbf16>
    %c0_12 = arith.constant 0 : index
    %c0_13 = arith.constant 0 : index
    %15 = vector.load %arg7[%c0_12, %c0_13] : memref<128x128xbf16, #tpu.memory_space<vmem>>, vector<128x128xbf16>
    %cst_14 = arith.constant dense<0.000000e+00> : vector<608x128xf32>
    %16 = tpu.matmul %14, %15, %cst_14 {dimension_numbers = #tpu.dot_dimension_numbers<[1], [0], [0], [1], [0, 0, 1, 1], [], []>} : vector<608x128xbf16>, vector<128x128xbf16>, vector<608x128xf32> -> vector<608x128xf32>
    %c0_15 = arith.constant 0 : index
    %c0_16 = arith.constant 0 : index
    %17 = vector.load %arg8[%c0_15, %c0_16] : memref<1x128xf32, #tpu.memory_space<vmem>>, vector<1x128xf32>
    %18 = vector.broadcast %17 : vector<1x128xf32> to vector<608x128xf32>
    %19 = arith.addf %16, %18 : vector<608x128xf32>
    %20 = arith.mulf %19, %19 : vector<608x128xf32>
    %cst_17 = arith.constant dense<0.000000e+00> : vector<608xf32>
    %21 = vector.multi_reduction <add>, %20, %cst_17 [1] : vector<608x128xf32> to vector<608xf32>
    %22 = vector.shape_cast %21 : vector<608xf32> to vector<608x1xf32>
    %cst_18 = arith.constant 1.000000e-24 : f32
    %23 = vector.broadcast %cst_18 : f32 to vector<608x1xf32>
    %24 = arith.maximumf %22, %23 : vector<608x1xf32>
    %25 = math.rsqrt %24 : vector<608x1xf32>
    %26 = vector.broadcast %25 : vector<608x1xf32> to vector<608x128xf32>
    %27 = arith.mulf %19, %26 : vector<608x128xf32>
    %c0_19 = arith.constant 0 : index
    %c0_20 = arith.constant 0 : index
    %28 = vector.load %arg9[%c0_19, %c0_20] : memref<128x128xbf16, #tpu.memory_space<vmem>>, vector<128x128xbf16>
    %cst_21 = arith.constant dense<0.000000e+00> : vector<608x128xf32>
    %29 = tpu.matmul %6, %28, %cst_21 {dimension_numbers = #tpu.dot_dimension_numbers<[1], [0], [0], [1], [0, 0, 1, 1], [], []>} : vector<608x128xbf16>, vector<128x128xbf16>, vector<608x128xf32> -> vector<608x128xf32>
    %c0_22 = arith.constant 0 : index
    %c0_23 = arith.constant 0 : index
    %30 = vector.load %arg10[%c0_22, %c0_23] : memref<1x128xf32, #tpu.memory_space<vmem>>, vector<1x128xf32>
    %31 = vector.broadcast %30 : vector<1x128xf32> to vector<608x128xf32>
    %32 = arith.addf %29, %31 : vector<608x128xf32>
    %cst_24 = arith.constant 0.000000e+00 : f32
    %33 = vector.broadcast %cst_24 : f32 to vector<608x128xf32>
    %34 = arith.maximumf %32, %33 : vector<608x128xf32>
    %35 = arith.truncf %34 : vector<608x128xf32> to vector<608x128xbf16>
    %c0_25 = arith.constant 0 : index
    %c0_26 = arith.constant 0 : index
    %36 = vector.load %arg11[%c0_25, %c0_26] : memref<128x128xbf16, #tpu.memory_space<vmem>>, vector<128x128xbf16>
    %cst_27 = arith.constant dense<0.000000e+00> : vector<608x128xf32>
    %37 = tpu.matmul %35, %36, %cst_27 {dimension_numbers = #tpu.dot_dimension_numbers<[1], [0], [0], [1], [0, 0, 1, 1], [], []>} : vector<608x128xbf16>, vector<128x128xbf16>, vector<608x128xf32> -> vector<608x128xf32>
    %c0_28 = arith.constant 0 : index
    %c0_29 = arith.constant 0 : index
    %38 = vector.load %arg12[%c0_28, %c0_29] : memref<1x128xf32, #tpu.memory_space<vmem>>, vector<1x128xf32>
    %39 = vector.broadcast %38 : vector<1x128xf32> to vector<608x128xf32>
    %40 = arith.addf %37, %39 : vector<608x128xf32>
    %41 = arith.mulf %40, %40 : vector<608x128xf32>
    %cst_30 = arith.constant dense<0.000000e+00> : vector<608xf32>
    %42 = vector.multi_reduction <add>, %41, %cst_30 [1] : vector<608x128xf32> to vector<608xf32>
    %43 = vector.shape_cast %42 : vector<608xf32> to vector<608x1xf32>
    %cst_31 = arith.constant 1.000000e-24 : f32
    %44 = vector.broadcast %cst_31 : f32 to vector<608x1xf32>
    %45 = arith.maximumf %43, %44 : vector<608x1xf32>
    %46 = math.rsqrt %45 : vector<608x1xf32>
    %47 = vector.broadcast %46 : vector<608x1xf32> to vector<608x128xf32>
    %48 = arith.mulf %40, %47 : vector<608x128xf32>
    %49 = vector.extract_strided_slice %27 {offsets = [0, 0], sizes = [304, 128], strides = [1, 1]} : vector<608x128xf32> to vector<304x128xf32>
    %50 = vector.extract_strided_slice %27 {offsets = [304, 0], sizes = [304, 128], strides = [1, 1]} : vector<608x128xf32> to vector<304x128xf32>
    %51 = vector.extract_strided_slice %48 {offsets = [0, 0], sizes = [304, 128], strides = [1, 1]} : vector<608x128xf32> to vector<304x128xf32>
    %52 = vector.extract_strided_slice %48 {offsets = [304, 0], sizes = [304, 128], strides = [1, 1]} : vector<608x128xf32> to vector<304x128xf32>
    %53 = arith.mulf %49, %51 : vector<304x128xf32>
    %cst_32 = arith.constant dense<0.000000e+00> : vector<304xf32>
    %54 = vector.multi_reduction <add>, %53, %cst_32 [1] : vector<304x128xf32> to vector<304xf32>
    %55 = vector.shape_cast %54 : vector<304xf32> to vector<304x1xf32>
    %56 = arith.mulf %49, %52 : vector<304x128xf32>
    %cst_33 = arith.constant dense<0.000000e+00> : vector<304xf32>
    %57 = vector.multi_reduction <add>, %56, %cst_33 [1] : vector<304x128xf32> to vector<304xf32>
    %58 = vector.shape_cast %57 : vector<304xf32> to vector<304x1xf32>
    %59 = arith.mulf %51, %50 : vector<304x128xf32>
    %cst_34 = arith.constant dense<0.000000e+00> : vector<304xf32>
    %60 = vector.multi_reduction <add>, %59, %cst_34 [1] : vector<304x128xf32> to vector<304xf32>
    %61 = vector.shape_cast %60 : vector<304xf32> to vector<304x1xf32>
    %62 = arith.subf %58, %55 : vector<304x1xf32>
    %cst_35 = arith.constant 1.42857146 : f32
    %63 = vector.broadcast %cst_35 : f32 to vector<304x1xf32>
    %64 = arith.mulf %62, %63 : vector<304x1xf32>
    %65 = math.exp %64 : vector<304x1xf32>
    %cst_36 = arith.constant 2.000000e+00 : f32
    %66 = vector.broadcast %cst_36 : f32 to vector<304x1xf32>
    %67 = arith.addf %66, %65 : vector<304x1xf32>
    %68 = arith.subf %61, %55 : vector<304x1xf32>
    %cst_37 = arith.constant 1.42857146 : f32
    %69 = vector.broadcast %cst_37 : f32 to vector<304x1xf32>
    %70 = arith.mulf %68, %69 : vector<304x1xf32>
    %71 = math.exp %70 : vector<304x1xf32>
    %72 = arith.addf %67, %71 : vector<304x1xf32>
    %73 = math.log %72 : vector<304x1xf32>
    %74 = tpu.iota {dimensions = array<i32: 0>} : vector<304x1xi32>
    %75 = vector.broadcast %0 : i32 to vector<304x1xi32>
    %76 = arith.addi %75, %74 : vector<304x1xi32>
    %c300_i32 = arith.constant 300 : i32
    %77 = vector.broadcast %c300_i32 : i32 to vector<304x1xi32>
    %78 = arith.cmpi slt, %76, %77 : vector<304x1xi32>
    %cst_38 = arith.constant 0.000000e+00 : f32
    %79 = vector.broadcast %cst_38 : f32 to vector<304x1xf32>
    %80 = arith.select %78, %73, %79 : vector<304x1xi1>, vector<304x1xf32>
    %cst_39 = arith.constant dense<0.000000e+00> : vector<1xf32>
    %81 = vector.multi_reduction <add>, %80, %cst_39 [0] : vector<304x1xf32> to vector<1xf32>
    %82 = vector.shape_cast %81 : vector<1xf32> to vector<1x1xf32>
    %83 = vector.shape_cast %82 : vector<1x1xf32> to vector<1x1xf32>
    %84 = vector.broadcast %83 : vector<1x1xf32> to vector<1x128xf32>
    %c0_40 = arith.constant 0 : index
    %c0_41 = arith.constant 0 : index
    %85 = vector.load %arg13[%c0_40, %c0_41] : memref<1x128xf32, #tpu.memory_space<vmem>>, vector<1x128xf32>
    tpu.vector_store %arg13[%c0_40, %c0_41], %84 {strides = array<i32>} : memref<1x128xf32, #tpu.memory_space<vmem>>, vector<1x128xf32>,
    return
  }
  func.func @transform_0(%arg0: i32) -> (i32, i32) {
    %c0_i32 = arith.constant 0 : i32
    %c0_i32_0 = arith.constant 0 : i32
    return %arg0, %c0_i32 : i32, i32
  }
  func.func @transform_1(%arg0: i32) -> (i32, i32) {
    %c0_i32 = arith.constant 0 : i32
    %c0_i32_0 = arith.constant 0 : i32
    return %arg0, %c0_i32 : i32, i32
  }
  func.func @transform_2(%arg0: i32) -> (i32, i32) {
    %c0_i32 = arith.constant 0 : i32
    %c0_i32_0 = arith.constant 0 : i32
    return %arg0, %c0_i32 : i32, i32
  }
  func.func @transform_3(%arg0: i32) -> (i32, i32) {
    %c0_i32 = arith.constant 0 : i32
    %c0_i32_0 = arith.constant 0 : i32
    return %arg0, %c0_i32 : i32, i32
  }
  func.func @transform_4(%arg0: i32) -> (i32, i32) {
    %c0_i32 = arith.constant 0 : i32
    %c0_i32_0 = arith.constant 0 : i32
    %c0_i32_1 = arith.constant 0 : i32
    return %c0_i32, %c0_i32_0 : i32, i32
  }
  func.func @transform_5(%arg0: i32) -> (i32, i32) {
    %c0_i32 = arith.constant 0 : i32
    %c0_i32_0 = arith.constant 0 : i32
    %c0_i32_1 = arith.constant 0 : i32
    return %c0_i32, %c0_i32_0 : i32, i32
  }
  func.func @transform_6(%arg0: i32) -> (i32, i32) {
    %c0_i32 = arith.constant 0 : i32
    %c0_i32_0 = arith.constant 0 : i32
    %c0_i32_1 = arith.constant 0 : i32
    return %c0_i32, %c0_i32_0 : i32, i32
  }
  func.func @transform_7(%arg0: i32) -> (i32, i32) {
    %c0_i32 = arith.constant 0 : i32
    %c0_i32_0 = arith.constant 0 : i32
    %c0_i32_1 = arith.constant 0 : i32
    return %c0_i32, %c0_i32_0 : i32, i32
  }
  func.func @transform_8(%arg0: i32) -> (i32, i32) {
    %c0_i32 = arith.constant 0 : i32
    %c0_i32_0 = arith.constant 0 : i32
    %c0_i32_1 = arith.constant 0 : i32
    return %c0_i32, %c0_i32_0 : i32, i32
  }
  func.func @transform_9(%arg0: i32) -> (i32, i32) {
    %c0_i32 = arith.constant 0 : i32
    %c0_i32_0 = arith.constant 0 : i32
    %c0_i32_1 = arith.constant 0 : i32
    return %c0_i32, %c0_i32_0 : i32, i32
  }
  func.func @transform_10(%arg0: i32) -> (i32, i32) {
    %c0_i32 = arith.constant 0 : i32
    %c0_i32_0 = arith.constant 0 : i32
    %c0_i32_1 = arith.constant 0 : i32
    return %c0_i32, %c0_i32_0 : i32, i32
  }
  func.func @transform_11(%arg0: i32) -> (i32, i32) {
    %c0_i32 = arith.constant 0 : i32
    %c0_i32_0 = arith.constant 0 : i32
    %c0_i32_1 = arith.constant 0 : i32
    return %c0_i32, %c0_i32_0 : i32, i32
  }
  func.func @transform_12(%arg0: i32) -> (i32, i32) {
    %c0_i32 = arith.constant 0 : i32
    %c0_i32_0 = arith.constant 0 : i32
    return %arg0, %c0_i32 : i32, i32
  }
}

</mosaic_0001>

<bundles_post_ra>
// kernel: tpu_custom_call.1
= control target key start
LH: loop header
LB: loop body
LE: loop exit
PB: predicated region body
PF: predicated region fallthrough
CT: control target
= control target key end

     0   :  { %17 = vsyncpa [#allocation3], 0  ;;  %s8492_s0 = inlined_call_operand.hbm [shape: bf16[304,128], index: 0, kind: input, shape index: {}]   ;;  %s8493_s1 = inlined_call_operand.hbm [shape: bf16[304,128], index: 1, kind: input, shape index: {}]   ;;  %s8494_s2 = inlined_call_operand.hbm [shape: bf16[304,128], index: 2, kind: input, shape index: {}]   ;;  %s8495_s3 = inlined_call_operand.hbm [shape: bf16[304,128], index: 3, kind: input, shape index: {}]   ;;  %s8496_s4 = inlined_call_operand.hbm [shape: bf16[128,128], index: 4, kind: input, shape index: {}]   ;;  %s8497_s5 = inlined_call_operand.vmem [shape: f32[1,128], index: 5, kind: input, shape index: {}]   ;;  %s8498_s6 = inlined_call_operand.hbm [shape: bf16[128,128], index: 6, kind: input, shape index: {}]   ;;  %s8499_s7 = inlined_call_operand.vmem [shape: f32[1,128], index: 7, kind: input, shape index: {}]   ;;  %s8500_s8 = inlined_call_operand.hbm [shape: bf16[128,128], index: 8, kind: input, shape index: {}]   ;;  %s8501_s9 = inlined_call_operand.vmem [shape: f32[1,128], index: 9, kind: input, shape index: {}]   ;;  %s8502_s10 = inlined_call_operand.hbm [shape: bf16[128,128], index: 10, kind: input, shape index: {}]   ;;  %s8503_s11 = inlined_call_operand.vmem [shape: f32[1,128], index: 11, kind: input, shape index: {}]   ;;  %s8504_s12 = inlined_call_operand.hbm [shape: f32[1,128], index: 12, kind: output, shape index: {}]  }
   0x1   :  { %18 = vsyncpa [#allocation6], 0 }
   0x2   :  { %19 = vsyncpa [#allocation9], 0 }
   0x3   :  { %20 = vsyncpa [#allocation12], 0 }
   0x4   :  { %21 = vsyncpa [#allocation15], 0 }
   0x5   :  { %22 = vsyncpa [#allocation4], 0  ;;  %s6073_s21 = smov [#allocation5]   ;;  %s6074_s23 = smov [#allocation8]  }
   0x6   :  { %s40_s22 = sshll.u32 %s6073_s21, 4  ;;  %s64_s24 = sshll.u32 %s6074_s23, 4  ;;  %s41_s22 = int_to_ptr.vmem [resolvable:$true] %s40_s22  ;;  %s6149_s24 = int_to_ptr.vmem [resolvable:$true] %s64_s24 }
   0x7   :  { %s5863_s27 = scalar_lea.hbm %s8493_s1, 2432 }
   0x8   :  { %p5864_p0 = scmp.ne.s32.totalorder %s8493_s1, %s5863_s27  ;;  %p5867_p1 = scmp.lt.u32.totalorder %s5863_s27, %s8493_s1 }
   0xa   :  { %p5869_p2 = pnand %p5867_p1, %p5864_p0 }
   0xc   :  { %5872 = shalt.err (!%p5869_p2)
}
   0xd   :  { %s5873_s14 = scalar_lea.vmem %s41_s22, 2432  ;;  %p5878_p4 = scmp.lt.s32.totalorder %s41_s22, %s41_s22 }
   0xe   :  { %p5874_p3 = scmp.ne.s32.totalorder %s41_s22, %s5873_s14  ;;  %p5879_p5 = scmp.lt.s32.totalorder %s5873_s14, %s5873_s14 }
  0x10   :  { %p5880_p6 = por %p5879_p5, %p5878_p4 }
  0x12   :  { %p5881_p7 = pnand %p5880_p6, %p5874_p3 }
  0x14   :  { %5884 = shalt.err (!%p5881_p7)
}
  0x15   :  { %s6075_s15 = smov 64   ;;  %s6076_s16 = smov 4  }
  0x16   :  { %46 = dma.hbm_to_vmem [thread:$0]  %s8493_s1, 2432, %s41_s22, [#allocation6], %s6075_s15, %s6075_s15, %s6076_s16  }
  0x17   :  { %s5885_s21 = scalar_lea.hbm %s8495_s3, 2432 }
  0x18   :  { %p5886_p8 = scmp.ne.s32.totalorder %s8495_s3, %s5885_s21  ;;  %p5889_p9 = scmp.lt.u32.totalorder %s5885_s21, %s8495_s3 }
  0x1a   :  { %p5891_p10 = pnand %p5889_p9, %p5886_p8 }
  0x1c   :  { %5894 = shalt.err (!%p5891_p10)
}
  0x1d   :  { %s5895_s28 = scalar_lea.vmem %s6149_s24, 2432  ;;  %p5900_p12 = scmp.lt.s32.totalorder %s6149_s24, %s6149_s24 }
  0x1e   :  { %p5896_p11 = scmp.ne.s32.totalorder %s6149_s24, %s5895_s28  ;;  %p5901_p13 = scmp.lt.s32.totalorder %s5895_s28, %s5895_s28 }
  0x20   :  { %p5902_p0 = por %p5901_p13, %p5900_p12 }
  0x22   :  { %p5903_p1 = pnand %p5902_p0, %p5896_p11 }
  0x24   :  { %5906 = shalt.err (!%p5903_p1)
}
  0x25   :  { %70 = dma.hbm_to_vmem [thread:$0]  %s8495_s3, 2432, %s6149_s24, [#allocation9], %s6075_s15, %s6075_s15, %s6076_s16  }
  0x26   :  { %s6077_s29 = smov [#allocation11]   ;;  %s6078_s13 = smov [#allocation2]  }
  0x27   :  { %s90_s30 = sshll.u32 %s6077_s29, 4  ;;  %s28_s14 = sshll.u32 %s6078_s13, 4  ;;  %s91_s30 = int_to_ptr.vmem [resolvable:$true] %s90_s30  ;;  %s6186_s14 = int_to_ptr.vmem [resolvable:$true] %s28_s14 }
  0x28   :  { %s5907_s19 = scalar_lea.hbm %s8498_s6, 1024 }
  0x29   :  { %p5908_p2 = scmp.ne.s32.totalorder %s8498_s6, %s5907_s19  ;;  %p5911_p3 = scmp.lt.u32.totalorder %s5907_s19, %s8498_s6 }
  0x2b   :  { %p5913_p4 = pnand %p5911_p3, %p5908_p2 }
  0x2d   :  { %5916 = shalt.err (!%p5913_p4)
}
  0x2e   :  { %s5917_s3 = scalar_lea.vmem %s91_s30, 1024  ;;  %p5922_p6 = scmp.lt.s32.totalorder %s91_s30, %s91_s30 }
  0x2f   :  { %p5918_p5 = scmp.ne.s32.totalorder %s91_s30, %s5917_s3  ;;  %p5923_p7 = scmp.lt.s32.totalorder %s5917_s3, %s5917_s3 }
  0x31   :  { %p5924_p8 = por %p5923_p7, %p5922_p6 }
  0x33   :  { %p5925_p9 = pnand %p5924_p8, %p5918_p5 }
  0x35   :  { %5928 = shalt.err (!%p5925_p9)
}
  0x36   :  { %96 = dma.hbm_to_vmem [thread:$0]  %s8498_s6, 1024, %s91_s30, [#allocation12], %s6075_s15, %s6075_s15, %s6076_s16  }
  0x37   :  { %s5929_s1 = scalar_lea.hbm %s8492_s0, 2432 }
  0x38   :  { %p5930_p10 = scmp.ne.s32.totalorder %s8492_s0, %s5929_s1  ;;  %p5933_p11 = scmp.lt.u32.totalorder %s5929_s1, %s8492_s0 }
  0x3a   :  { %p5935_p12 = pnand %p5933_p11, %p5930_p10 }
  0x3c   :  { %5938 = shalt.err (!%p5935_p12)
}
  0x3d   :  { %s5939_s18 = scalar_lea.vmem %s6186_s14, 2432  ;;  %p5944_p0 = scmp.lt.s32.totalorder %s6186_s14, %s6186_s14 }
  0x3e   :  { %p5940_p13 = scmp.ne.s32.totalorder %s6186_s14, %s5939_s18  ;;  %p5945_p1 = scmp.lt.s32.totalorder %s5939_s18, %s5939_s18 }
  0x40   :  { %p5946_p2 = por %p5945_p1, %p5944_p0 }
  0x42   :  { %p5947_p3 = pnand %p5946_p2, %p5940_p13 }
  0x44   :  { %5950 = shalt.err (!%p5947_p3)
}
  0x45   :  { %34 = dma.hbm_to_vmem [thread:$0]  %s8492_s0, 2432, %s6186_s14, [#allocation3], %s6075_s15, %s6075_s15, %s6076_s16  }
  0x46   :  { %s6079_s19 = smov [#allocation7]   ;;  %s6080_s21 = smov [#allocation10]  }
  0x47   :  { %s52_s20 = sshll.u32 %s6079_s19, 4  ;;  %s76_s23 = sshll.u32 %s6080_s21, 4  ;;  %s53_s20 = int_to_ptr.vmem [resolvable:$true] %s52_s20  ;;  %s6223_s23 = int_to_ptr.vmem [resolvable:$true] %s76_s23 }
  0x48   :  { %s5951_s24 = scalar_lea.hbm %s8494_s2, 2432 }
  0x49   :  { %p5952_p4 = scmp.ne.s32.totalorder %s8494_s2, %s5951_s24  ;;  %p5955_p5 = scmp.lt.u32.totalorder %s5951_s24, %s8494_s2 }
  0x4b   :  { %p5957_p6 = pnand %p5955_p5, %p5952_p4 }
  0x4d   :  { %5960 = shalt.err (!%p5957_p6)
}
  0x4e   :  { %s5961_s0 = scalar_lea.vmem %s53_s20, 2432  ;;  %p5966_p8 = scmp.lt.s32.totalorder %s53_s20, %s53_s20 }
  0x4f   :  { %p5962_p7 = scmp.ne.s32.totalorder %s53_s20, %s5961_s0  ;;  %p5967_p9 = scmp.lt.s32.totalorder %s5961_s0, %s5961_s0 }
  0x51   :  { %p5968_p10 = por %p5967_p9, %p5966_p8 }
  0x53   :  { %p5969_p11 = pnand %p5968_p10, %p5962_p7 }
  0x55   :  { %5972 = shalt.err (!%p5969_p11)
}
  0x56   :  { %58 = dma.hbm_to_vmem [thread:$0]  %s8494_s2, 2432, %s53_s20, [#allocation6], %s6075_s15, %s6075_s15, %s6076_s16  }
  0x57   :  { %s5973_s17 = scalar_lea.hbm %s8496_s4, 1024 }
  0x58   :  { %p5974_p12 = scmp.ne.s32.totalorder %s8496_s4, %s5973_s17  ;;  %p5977_p13 = scmp.lt.u32.totalorder %s5973_s17, %s8496_s4 }
  0x5a   :  { %p5979_p0 = pnand %p5977_p13, %p5974_p12 }
  0x5c   :  { %5982 = shalt.err (!%p5979_p0)
}
  0x5d   :  { %s5983_s21 = scalar_lea.vmem %s6223_s23, 1024  ;;  %p5988_p2 = scmp.lt.s32.totalorder %s6223_s23, %s6223_s23 }
  0x5e   :  { %p5984_p1 = scmp.ne.s32.totalorder %s6223_s23, %s5983_s21  ;;  %p5989_p3 = scmp.lt.s32.totalorder %s5983_s21, %s5983_s21 }
  0x60   :  { %p5990_p4 = por %p5989_p3, %p5988_p2 }
  0x62   :  { %p5991_p5 = pnand %p5990_p4, %p5984_p1 }
  0x64   :  { %5994 = shalt.err (!%p5991_p5)
}
  0x65   :  { %82 = dma.hbm_to_vmem [thread:$0]  %s8496_s4, 1024, %s6223_s23, [#allocation9], %s6075_s15, %s6075_s15, %s6076_s16  }
  0x66   :  { %s6081_s25 = smov [#allocation13]   ;;  %s6082_s24 = smov [#allocation14]  }
  0x67   :  { %s104_s3 = sshll.u32 %s6081_s25, 4  ;;  %s118_s26 = sshll.u32 %s6082_s24, 4  ;;  %s105_s3 = int_to_ptr.vmem [resolvable:$true] %s104_s3  ;;  %s6260_s26 = int_to_ptr.vmem [resolvable:$true] %s118_s26 }
  0x68   :  { %s5995_s1 = scalar_lea.hbm %s8500_s8, 1024 }
  0x69   :  { %p5996_p6 = scmp.ne.s32.totalorder %s8500_s8, %s5995_s1  ;;  %p5999_p7 = scmp.lt.u32.totalorder %s5995_s1, %s8500_s8 }
  0x6b   :  { %p6001_p8 = pnand %p5999_p7, %p5996_p6 }
  0x6d   :  { %6004 = shalt.err (!%p6001_p8)
}
  0x6e   :  { %s6005_s4 = scalar_lea.vmem %s105_s3, 1024  ;;  %p6010_p10 = scmp.lt.s32.totalorder %s105_s3, %s105_s3 }
  0x6f   :  { %p6006_p9 = scmp.ne.s32.totalorder %s105_s3, %s6005_s4  ;;  %p6011_p11 = scmp.lt.s32.totalorder %s6005_s4, %s6005_s4 }
  0x71   :  { %p6012_p12 = por %p6011_p11, %p6010_p10 }
  0x73   :  { %p6013_p13 = pnand %p6012_p12, %p6006_p9 }
  0x75   :  { %6016 = shalt.err (!%p6013_p13)
}
  0x76   :  { %110 = dma.hbm_to_vmem [thread:$0]  %s8500_s8, 1024, %s105_s3, [#allocation12], %s6075_s15, %s6075_s15, %s6076_s16  }
  0x77   :  { %s6017_s6 = scalar_lea.hbm %s8502_s10, 1024 }
  0x78   :  { %p6018_p0 = scmp.ne.s32.totalorder %s8502_s10, %s6017_s6  ;;  %p6021_p1 = scmp.lt.u32.totalorder %s6017_s6, %s8502_s10 }
  0x7a   :  { %p6023_p2 = pnand %p6021_p1, %p6018_p0 }
  0x7c   :  { %6026 = shalt.err (!%p6023_p2)
}
  0x7d   :  { %s6027_s20 = scalar_lea.vmem %s6260_s26, 1024  ;;  %p6032_p4 = scmp.lt.s32.totalorder %s6260_s26, %s6260_s26 }
  0x7e   :  { %p6028_p3 = scmp.ne.s32.totalorder %s6260_s26, %s6027_s20  ;;  %p6033_p5 = scmp.lt.s32.totalorder %s6027_s20, %s6027_s20 }
  0x80   :  { %p6034_p6 = por %p6033_p5, %p6032_p4 }
  0x82   :  { %p6035_p7 = pnand %p6034_p6, %p6028_p3 }
  0x84   :  { %6038 = shalt.err (!%p6035_p7)
}
  0x85   :  { %124 = dma.hbm_to_vmem [thread:$0]  %s8502_s10, 1024, %s6260_s26, [#allocation15], %s6075_s15, %s6075_s15, %s6076_s16  }
  0x86   :  { %6061 = dma.done.wait [#allocation3], 2432  }
  0x87   :  { %6062 = vsyncadd [#allocation3], 4294964864 }
  0x88   :  { %6063 = dma.done.wait [#allocation6], 4864  }
  0x89   :  { %6064 = vsyncadd [#allocation6], 4294962432 }
  0x8a   :  { %6065 = dma.done.wait [#allocation9], 3456  }
  0x8b   :  { %6066 = vsyncadd [#allocation9], 4294963840 }
  0x8c   :  { %6067 = dma.done.wait [#allocation12], 2048  }
  0x8d   :  { %6068 = vsyncadd [#allocation12], 4294965248 }
  0x8e   :  { %6069 = dma.done.wait [#allocation15], 1024  }
  0x8f   :  { %6070 = vsyncadd [#allocation15], 4294966272  ;;  %v5223_v0 = vld [vmem:[#allocation10] sm:$0xff]   ;;  %v5224_v1 = vld [vmem:[#allocation10 + $0x8] sm:$0xff]  }
  0x90   :  { %4844 = vmatprep.subr.bf16.mxu0 %v5223_v0  ;;  %v5225_v2 = vld [vmem:[#allocation10 + $0x10] sm:$0xff]   ;;  %v5226_v3 = vld [vmem:[#allocation10 + $0x18] sm:$0xff]   ;;  %v5231_v4 = vld [vmem:[#allocation2] sm:$0xff]  }
  0x91   :  { %4845 = vmatpush3.bf16.msra.mxu0 %v5223_v0  ;;  %4860 = vmatprep.mubr.bf16.mxu0 %v5231_v4  ;;  %v5227_v5 = vld [vmem:[#allocation10 + $0x20] sm:$0xff]   ;;  %v5228_v6 = vld [vmem:[#allocation10 + $0x28] sm:$0xff]   ;;  %v5229_v7 = vld [vmem:[#allocation10 + $0x30] sm:$0xff]  }
  0x92   :  { %4846 = vmatprep.subr.bf16.mxu0 %v5224_v1  ;;  %v5230_v8 = vld [vmem:[#allocation10 + $0x38] sm:$0xff]   ;;  %v5233_v9 = vld [vmem:[#allocation13] sm:$0xff]   ;;  %v5232_v10 = vld [vmem:[#allocation2 + $0x8] sm:$0xff]  }
  0x93   :  { %v5234_v11 = vld [vmem:[#allocation2 + $0x10] sm:$0xff]   ;;  %v5238_v12 = vld [vmem:[#allocation13 + $0x8] sm:$0xff]   ;;  %v5235_v14 = vld [vmem:[#allocation2 + $0x18] sm:$0xff]  }
  0x94   :  { %v5243_v13 = vld [vmem:[#allocation13 + $0x10] sm:$0xff]   ;;  %v5236_v15 = vld [vmem:[#allocation2 + $0x20] sm:$0xff]   ;;  %v5250_v16 = vld [vmem:[#allocation13 + $0x18] sm:$0xff]  }
  0x95   :  { %4847 = vmatpush3.bf16.msra.mxu0 %v5224_v1  ;;  %v5255_v17 = vld [vmem:[#allocation13 + $0x20] sm:$0xff]   ;;  %v5237_v18 = vld [vmem:[#allocation2 + $0x28] sm:$0xff]   ;;  %v5239_v19 = vld [vmem:[#allocation2 + $0x30] sm:$0xff]  }
  0x96   :  { %4848 = vmatprep.subr.bf16.mxu0 %v5225_v2  ;;  %v5261_v20 = vld [vmem:[#allocation13 + $0x28] sm:$0xff]   ;;  %v5267_v21 = vld [vmem:[#allocation13 + $0x30] sm:$0xff]   ;;  %v5240_v22 = vld [vmem:[#allocation2 + $0x38] sm:$0xff]  }
  0x97   :  { %v5241_v23 = vld [vmem:[#allocation2 + $0x40] sm:$0xff]   ;;  %v5272_v24 = vld [vmem:[#allocation13 + $0x38] sm:$0xff]   ;;  %v5242_v25 = vld [vmem:[#allocation2 + $0x48] sm:$0xff]  }
  0x98   :  { %v5244_v26 = vld [vmem:[#allocation2 + $0x50] sm:$0xff]   ;;  %v5245_v27 = vld [vmem:[#allocation2 + $0x58] sm:$0xff]   ;;  %v5246_v28 = vld [vmem:[#allocation2 + $0x60] sm:$0xff]  }
  0x99   :  { %4849 = vmatpush3.bf16.msra.mxu0 %v5225_v2  ;;  %v5247_v29 = vld [vmem:[#allocation2 + $0x68] sm:$0xff]   ;;  %v5248_v30 = vld [vmem:[#allocation2 + $0x70] sm:$0xff]   ;;  %v5249_v31 = vld [vmem:[#allocation2 + $0x78] sm:$0xff]  }
  0x9a   :  { %4850 = vmatprep.subr.bf16.mxu0 %v5226_v3  ;;  %v5251_v32 = vld [vmem:[#allocation2 + $0x80] sm:$0xff]   ;;  %v5252_v34 = vld [vmem:[#allocation2 + $0x88] sm:$0xff]   ;;  %v5253_v35 = vld [vmem:[#allocation2 + $0x90] sm:$0xff]  }
  0x9b   :  { %v5287_v33 = vld [vmem:[#allocation11] sm:$0xff]   ;;  %v5290_v36 = vld [vmem:[#allocation11 + $0x8] sm:$0xff]   ;;  %v5291_v37 = vld [vmem:[#allocation11 + $0x10] sm:$0xff]  }
  0x9c   :  { %4936 = vmatprep.subr.bf16.mxu1 %v5287_v33  ;;  %v5254_v38 = vld [vmem:[#allocation5] sm:$0xff]   ;;  %v5256_v39 = vld [vmem:[#allocation5 + $0x8] sm:$0xff]   ;;  %v5257_v42 = vld [vmem:[#allocation5 + $0x10] sm:$0xff]  }
  0x9d   :  { %4851 = vmatpush3.bf16.msra.mxu0 %v5226_v3  ;;  %4937 = vmatpush3.bf16.msra.mxu1 %v5287_v33  ;;  %v5294_v40 = vld [vmem:[#allocation11 + $0x18] sm:$0xff]   ;;  %v5295_v41 = vld [vmem:[#allocation11 + $0x20] sm:$0xff]   ;;  %v5258_v43 = vld [vmem:[#allocation5 + $0x18] sm:$0xff]  }
  0x9e   :  { %4852 = vmatprep.subr.bf16.mxu0 %v5227_v5  ;;  %4938 = vmatprep.subr.bf16.mxu1 %v5290_v36  ;;  %v5298_v44 = vld [vmem:[#allocation11 + $0x28] sm:$0xff]   ;;  %v5259_v45 = vld [vmem:[#allocation5 + $0x20] sm:$0xff]   ;;  %v5299_v46 = vld [vmem:[#allocation11 + $0x30] sm:$0xff]  }
  0x9f   :  { %v5260_v47 = vld [vmem:[#allocation5 + $0x28] sm:$0xff]   ;;  %v5302_v48 = vld [vmem:[#allocation11 + $0x38] sm:$0xff]   ;;  %v5262_v49 = vld [vmem:[#allocation5 + $0x30] sm:$0xff]  }
  0xa0   :  { %v5263_v50 = vld [vmem:[#allocation5 + $0x38] sm:$0xff]   ;;  %v6297_v51 = vld [vmem:[#allocation14] sm:$0xff]   ;;  %v5264_v52 = vld [vmem:[#allocation5 + $0x40] sm:$0xff]  }
  0xa1   :  { %4853 = vmatpush3.bf16.msra.mxu0 %v5227_v5  ;;  %4939 = vmatpush3.bf16.msra.mxu1 %v5290_v36  ;;  %v5265_v53 = vld [vmem:[#allocation5 + $0x48] sm:$0xff]   ;;  %v5266_v54 = vld [vmem:[#allocation5 + $0x50] sm:$0xff]   ;;  %v5268_v55 = vld [vmem:[#allocation5 + $0x58] sm:$0xff]  }
  0xa2   :  { %4854 = vmatprep.subr.bf16.mxu0 %v5228_v6  ;;  %4940 = vmatprep.subr.bf16.mxu1 %v5291_v37  ;;  %v5269_v56 = vld [vmem:[#allocation5 + $0x60] sm:$0xff]   ;;  %v5270_v57 = vld [vmem:[#allocation5 + $0x68] sm:$0xff]   ;;  %v5271_v58 = vld [vmem:[#allocation5 + $0x70] sm:$0xff]  }
  0xa3   :  { %v5273_v59 = vld [vmem:[#allocation5 + $0x78] sm:$0xff]   ;;  %v5274_v60 = vld [vmem:[#allocation5 + $0x80] sm:$0xff]   ;;  %v5275_v61 = vld [vmem:[#allocation5 + $0x88] sm:$0xff]  }
  0xa4   :  { %v5276_v62 = vld [vmem:[#allocation5 + $0x90] sm:$0xff]   ;;  %v5277_v63 = vld [vmem:[#allocation7] sm:$0xff]   ;;  %v5278_v0 = vld [vmem:[#allocation7 + $0x8] sm:$0xff]  }
  0xa5   :  { %4855 = vmatpush3.bf16.msra.mxu0 %v5228_v6  ;;  %4941 = vmatpush3.bf16.msra.mxu1 %v5291_v37  ;;  %v5279_v1 = vld [vmem:[#allocation7 + $0x10] sm:$0xff]   ;;  %v5280_v2 = vld [vmem:[#allocation7 + $0x18] sm:$0xff]   ;;  %v5281_v3 = vld [vmem:[#allocation7 + $0x20] sm:$0xff]  }
  0xa6   :  { %4856 = vmatprep.subr.bf16.mxu0 %v5229_v7  ;;  %4942 = vmatprep.subr.bf16.mxu1 %v5294_v40  ;;  %v5282_v4 = vld [vmem:[#allocation7 + $0x28] sm:$0xff]   ;;  %v5283_v5 = vld [vmem:[#allocation7 + $0x30] sm:$0xff]   ;;  %v5284_v6 = vld [vmem:[#allocation7 + $0x38] sm:$0xff]  }
  0xa7   :  { %v5305_v36 = vld [vmem:[#allocation8] sm:$0xff]  }
  0xa8   :  { %v5310_v37 = vld [vmem:[#allocation14 + $0x8] sm:$0xff]  }
  0xa9   :  { %4857 = vmatpush3.bf16.msra.mxu0 %v5229_v7  ;;  %4943 = vmatpush3.bf16.msra.mxu1 %v5294_v40  ;;  %v5285_v7 = vld [vmem:[#allocation7 + $0x40] sm:$0xff]  }
  0xaa   :  { %4858 = vmatprep.subr.bf16.mxu0 %v5230_v8  ;;  %4944 = vmatprep.subr.bf16.mxu1 %v5295_v41  ;;  %v5306_v40 = vld [vmem:[#allocation8 + $0x8] sm:$0xff]  }
  0xad   :  { %4859 = vmatpush3.bf16.msra.mxu0 %v5230_v8  ;;  %4945 = vmatpush3.bf16.msra.mxu1 %v5295_v41  ;;  %v5286_v8 = vld [vmem:[#allocation7 + $0x48] sm:$0xff]  }
  0xae   :  { %5028 = vmatprep.subr.bf16.mxu0 %v5233_v9  ;;  %4946 = vmatprep.subr.bf16.mxu1 %v5298_v44 }
  0xb0   :  { %4861 = vmatmul.mubr.bf16.vlgmr.msra.gmra.mrb[0].mxu0 %v5232_v10  ;;  %v5289_v10 = vld [vmem:[#allocation7 + $0x58] sm:$0xff]  }
  0xb1   :  { %5029 = vmatpush3.bf16.msra.mxu0 %v5233_v9  ;;  %4864 = vmatprep.mubr.bf16.mxu0 %v5234_v11  ;;  %v5288_v9 = vld [vmem:[#allocation7 + $0x50] sm:$0xff]   ;;  %v5292_v11 = vld [vmem:[#allocation7 + $0x60] sm:$0xff]  }
  0xb2   :  { %5030 = vmatprep.subr.bf16.mxu0 %v5238_v12  ;;  %4947 = vmatpush3.bf16.msra.mxu1 %v5298_v44 }
  0xb3   :  { %4948 = vmatprep.subr.bf16.mxu1 %v5299_v46 }
  0xb5   :  { %5031 = vmatpush3.bf16.msra.mxu0 %v5238_v12  ;;  %v5293_v12 = vld [vmem:[#allocation7 + $0x68] sm:$0xff]  }
  0xb6   :  { %5032 = vmatprep.subr.bf16.mxu0 %v5243_v13  ;;  %4949 = vmatpush3.bf16.msra.mxu1 %v5299_v46  ;;  %v5315_v46 = vld [vmem:[#allocation14 + $0x10] sm:$0xff]  }
  0xb7   :  { %4950 = vmatprep.subr.bf16.mxu1 %v5302_v48 }
  0xb8   :  { %4865 = vmatmul.mubr.bf16.gmra.mrb[4].mxu0 %v5235_v14  ;;  %v5297_v14 = vld [vmem:[#allocation7 + $0x78] sm:$0xff]  }
  0xb9   :  { %4868 = vmatprep.mubr.bf16.mxu0 %v5236_v15  ;;  %5033 = vmatpush3.bf16.msra.mxu0 %v5243_v13  ;;  %v5296_v13 = vld [vmem:[#allocation7 + $0x70] sm:$0xff]   ;;  %v5300_v15 = vld [vmem:[#allocation7 + $0x80] sm:$0xff]  }
  0xba   :  { %5034 = vmatprep.subr.bf16.mxu0 %v5250_v16  ;;  %4951 = vmatpush3.bf16.msra.mxu1 %v5302_v48 }
  0xbb   :  { %5120 = vmatprep.subr.bf16.mxu1 %v6297_v51 }
  0xbd   :  { %5035 = vmatpush3.bf16.msra.mxu0 %v5250_v16  ;;  %v6303_v16 = vld [vmem:[%s8497_s5] ss:$0 sm:$0xff] }
  0xbe   :  { %5036 = vmatprep.subr.bf16.mxu0 %v5255_v17 }
  0xc0   :  { %4869 = vmatmul.mubr.bf16.gmra.mrb[8].mxu0 %v5237_v18 }
  0xc1   :  { %4872 = vmatprep.mubr.bf16.mxu0 %v5239_v19  ;;  %5037 = vmatpush3.bf16.msra.mxu0 %v5255_v17 }
  0xc2   :  { %5038 = vmatprep.subr.bf16.mxu0 %v5261_v20 }
  0xc5   :  { %5039 = vmatpush3.bf16.msra.mxu0 %v5261_v20  ;;  %v5301_v20 = vld [vmem:[#allocation7 + $0x88] sm:$0xff]  }
  0xc6   :  { %5040 = vmatprep.subr.bf16.mxu0 %v5267_v21 }
  0xc8   :  { %4873 = vmatmul.mubr.bf16.gmra.mrb[12].mxu0 %v5240_v22 }
  0xc9   :  { %4876 = vmatprep.mubr.bf16.mxu0 %v5241_v23  ;;  %5041 = vmatpush3.bf16.msra.mxu0 %v5267_v21  ;;  %v5304_v23 = vld [vmem:[#allocation7 + $0x90] sm:$0xff]  }
  0xca   :  { %5042 = vmatprep.subr.bf16.mxu0 %v5272_v24 }
  0xcd   :  { %5043 = vmatpush3.bf16.msra.mxu0 %v5272_v24 }
  0xd0   :  { %4877 = vmatmul.mubr.bf16.gmra.mrb[16].mxu0 %v5242_v25 }
  0xd1   :  { %4880 = vmatprep.mubr.bf16.mxu0 %v5244_v26 }
  0xd8   :  { %4881 = vmatmul.mubr.bf16.gmra.mrb[20].mxu0 %v5245_v27 }
  0xd9   :  { %4884 = vmatprep.mubr.bf16.mxu0 %v5246_v28 }
  0xe0   :  { %4885 = vmatmul.mubr.bf16.gmra.mrb[24].mxu0 %v5247_v29 }
  0xe1   :  { %4888 = vmatprep.mubr.bf16.mxu0 %v5248_v30 }
  0xe8   :  { %4889 = vmatmul.mubr.bf16.gmra.mrb[28].mxu0 %v5249_v31 }
  0xe9   :  { %4892 = vmatprep.mubr.bf16.mxu0 %v5251_v32 }
  0xf0   :  { %4893 = vmatmul.mubr.bf16.gmra.mrb[32].mxu0 %v5252_v34 }
  0xf1   :  { %4896 = vmatprep.mubr.bf16.mxu0 %v5253_v35 }
  0xf8   :  { %4897 = vmatmul.mubr.bf16.gmra.mrb[36].mxu0 %v5254_v38 }
  0xf9   :  { %4900 = vmatprep.mubr.bf16.mxu0 %v5256_v39 }
 0x100   :  { %4901 = vmatmul.mubr.bf16.gmra.mrb[40].mxu0 %v5257_v42 }
 0x101   :  { %4904 = vmatprep.mubr.bf16.mxu0 %v5258_v43 }
 0x108   :  { %4905 = vmatmul.mubr.bf16.gmra.mrb[44].mxu0 %v5259_v45 }
 0x109   :  { %4908 = vmatprep.mubr.bf16.mxu0 %v5260_v47 }
 0x110   :  { %4909 = vmatmul.mubr.bf16.gmra.mrb[48].mxu0 %v5262_v49 }
 0x111   :  { %4912 = vmatprep.mubr.bf16.mxu0 %v5263_v50 }
 0x118   :  { %4913 = vmatmul.mubr.bf16.gmra.mrb[52].mxu0 %v5264_v52 }
 0x119   :  { %4916 = vmatprep.mubr.bf16.mxu0 %v5265_v53 }
 0x120   :  { %4917 = vmatmul.mubr.bf16.gmra.mrb[56].mxu0 %v5266_v54 }
 0x121   :  { %4920 = vmatprep.mubr.bf16.mxu0 %v5268_v55  ;;  %v5307_v55 = vld [vmem:[#allocation8 + $0x10] sm:$0xff]  }
 0x128   :  { %4921 = vmatmul.mubr.bf16.gmra.mrb[60].mxu0 %v5269_v56  ;;  %v5321_v56 = vld [vmem:[#allocation14 + $0x18] sm:$0xff]  }
 0x129   :  { %4924 = vmatprep.mubr.bf16.mxu0 %v5270_v57 }
 0x130   :  { %4925 = vmatmul.mubr.bf16.gmra.mrb[64].mxu0 %v5271_v58  ;;  %v5308_v58 = vld [vmem:[#allocation8 + $0x18] sm:$0xff]  }
 0x131   :  { %4928 = vmatprep.mubr.bf16.mxu0 %v5273_v59 }
 0x138   :  { %4929 = vmatmul.mubr.bf16.gmra.mrb[68].mxu0 %v5274_v60 }
 0x139   :  { %4932 = vmatprep.mubr.bf16.mxu0 %v5275_v61 }
 0x140   :  { %4933 = vmatmul.mubr.bf16.gmra.mrb[72].mxu0 %v5276_v62 }
 0x141   :  { %5044 = vmatprep.mubr.bf16.mxu0 %v5277_v63 }
 0x148   :  { %5045 = vmatmul.mubr.bf16.vlgmr.msra.gmra.mrb[76].mxu0 %v5278_v0  ;;  %v5327_v0 = vld [vmem:[#allocation14 + $0x20] sm:$0xff]  }
 0x149   :  { %5048 = vmatprep.mubr.bf16.mxu0 %v5279_v1 }
 0x150   :  { %5049 = vmatmul.mubr.bf16.gmra.mrb[80].mxu0 %v5280_v2 }
 0x151   :  { %5052 = vmatprep.mubr.bf16.mxu0 %v5281_v3 }
 0x158   :  { %5053 = vmatmul.mubr.bf16.gmra.mrb[84].mxu0 %v5282_v4 }
 0x159   :  { %5056 = vmatprep.mubr.bf16.mxu0 %v5283_v5 }
 0x160   :  { %5057 = vmatmul.mubr.bf16.gmra.mrb[88].mxu0 %v5284_v6 }
 0x161   :  { %5060 = vmatprep.mubr.bf16.mxu0 %v5285_v7 }
 0x168   :  { %5061 = vmatmul.mubr.bf16.gmra.mrb[92].mxu0 %v5286_v8  ;;  %v5309_v8 = vld [vmem:[#allocation8 + $0x20] sm:$0xff]  }
 0x169   :  { %5064 = vmatprep.mubr.bf16.mxu0 %v5288_v9  ;;  %v5328_v9 = vld [vmem:[#allocation14 + $0x28] sm:$0xff]  }
 0x170   :  { %5065 = vmatmul.mubr.bf16.gmra.mrb[96].mxu0 %v5289_v10 }
 0x171   :  { %5068 = vmatprep.mubr.bf16.mxu0 %v5292_v11 }
 0x178   :  { %5069 = vmatmul.mubr.bf16.gmra.mrb[100].mxu0 %v5293_v12  ;;  %v5311_v12 = vld [vmem:[#allocation8 + $0x28] sm:$0xff]  }
 0x179   :  { %5072 = vmatprep.mubr.bf16.mxu0 %v5296_v13 }
 0x180   :  { %5073 = vmatmul.mubr.bf16.gmra.mrb[104].mxu0 %v5297_v14 }
 0x181   :  { %5076 = vmatprep.mubr.bf16.mxu0 %v5300_v15 }
 0x183   :  { %v4862_v17 = vpop.f32.mrb[0].mxu0 }
 0x184   :  { %v875_v18 = vadd.f32 %v4862_v17, %v6303_v16  ;;  %v866_v19 = vpop.f32.mrb[1].mxu0 }
 0x185   :  { %v867_v21 = vadd.f32 %v6303_v16, %v866_v19  ;;  %v4863_v22 = vpop.f32.mrb[2].mxu0  ;;  %v5329_v19 = vld [vmem:[#allocation14 + $0x30] sm:$0xff]  }
 0x186   :  { %v878_v24 = vadd.f32 %v4863_v22, %v6303_v16  ;;  %v869_v25 = vpop.f32.mrb[3].mxu0  ;;  %v1171_v27 = vmax.f32 %v875_v18, 0.0 }
 0x187   :  { %v870_v26 = vadd.f32 %v6303_v16, %v869_v25  ;;  %v1169_v29 = vmax.f32 %v867_v21, 0.0 }
 0x188   :  { %v1172_v28 = vmax.f32 %v878_v24, 0.0  ;;  %5077 = vmatmul.mubr.bf16.gmra.mrb[108].mxu0 %v5301_v20 }
 0x189   :  { %v1170_v30 = vmax.f32 %v870_v26, 0.0  ;;  %5080 = vmatprep.mubr.bf16.mxu0 %v5304_v23 }
 0x18a   :  { %v1246_v31 = vpack.c.bf16 %v1172_v28, %v1171_v27  ;;  %v5312_v27 = vld [vmem:[#allocation8 + $0x30] sm:$0xff]  }
 0x18b   :  { %v4866_v32 = vpop.f32.mrb[4].mxu0  ;;  %v1245_v33 = vpack.c.bf16 %v1170_v30, %v1169_v29  ;;  %v5330_v28 = vld [vmem:[#allocation14 + $0x38] sm:$0xff]  }
 0x18c   :  { %v891_v34 = vadd.f32 %v4866_v32, %v6303_v16  ;;  %v882_v35 = vpop.f32.mrb[5].mxu0 }
 0x18d   :  { %v883_v38 = vadd.f32 %v6303_v16, %v882_v35  ;;  %v4867_v39 = vpop.f32.mrb[6].mxu0  ;;  %4952 = vmatprep.mubr.bf16.mxu1 %v1245_v33 }
 0x18e   :  { %v1175_v41 = vmax.f32 %v891_v34, 0.0  ;;  %v894_v42 = vadd.f32 %v4867_v39, %v6303_v16  ;;  %v885_v43 = vpop.f32.mrb[7].mxu0  ;;  %4953 = vmatmul.mubr.bf16.vlgmr.msra.gmra.mrb[0].mxu1 %v1246_v31  ;;  %v5313_v31 = vld [vmem:[#allocation8 + $0x38] sm:$0xff]  }
 0x18f   :  { %v886_v44 = vadd.f32 %v6303_v16, %v885_v43  ;;  %5121 = vmatpush3.bf16.msra.mxu1 %v6297_v51  ;;  %v1173_v47 = vmax.f32 %v883_v38, 0.0 }
 0x190   :  { %v1176_v45 = vmax.f32 %v894_v42, 0.0  ;;  %5081 = vmatmul.mubr.bf16.gmra.mrb[112].mxu0 %v5305_v36  ;;  %5122 = vmatprep.subr.bf16.mxu1 %v5310_v37 }
 0x191   :  { %v1174_v48 = vmax.f32 %v886_v44, 0.0  ;;  %5084 = vmatprep.mubr.bf16.mxu0 %v5306_v40  ;;  %v5314_v44 = vld [vmem:[#allocation8 + $0x40] sm:$0xff]  }
 0x192   :  { %v1248_v49 = vpack.c.bf16 %v1176_v45, %v1175_v41 }
 0x193   :  { %v1247_v50 = vpack.c.bf16 %v1174_v48, %v1173_v47  ;;  %v4870_v52 = vpop.f32.mrb[8].mxu0  ;;  %5123 = vmatpush3.bf16.msra.mxu1 %v5310_v37  ;;  %v5316_v47 = vld [vmem:[#allocation8 + $0x48] sm:$0xff]  }
 0x194   :  { %v907_v53 = vadd.f32 %v4870_v52, %v6303_v16  ;;  %v898_v54 = vpop.f32.mrb[9].mxu0  ;;  %5124 = vmatprep.subr.bf16.mxu1 %v5315_v46 }
 0x195   :  { %v899_v57 = vadd.f32 %v6303_v16, %v898_v54  ;;  %v4871_v51 = vpop.f32.mrb[10].mxu0  ;;  %4956 = vmatprep.mubr.bf16.mxu1 %v1247_v50 }
 0x196   :  { %v1179_v59 = vmax.f32 %v907_v53, 0.0  ;;  %v910_v60 = vadd.f32 %v4871_v51, %v6303_v16  ;;  %v901_v61 = vpop.f32.mrb[11].mxu0  ;;  %4957 = vmatmul.mubr.bf16.gmra.mrb[4].mxu1 %v1248_v49 }
 0x197   :  { %v902_v62 = vadd.f32 %v6303_v16, %v901_v61  ;;  %5125 = vmatpush3.bf16.msra.mxu1 %v5315_v46  ;;  %v1177_v1 = vmax.f32 %v899_v57, 0.0 }
 0x198   :  { %v1180_v63 = vmax.f32 %v910_v60, 0.0  ;;  %5085 = vmatmul.mubr.bf16.gmra.mrb[116].mxu0 %v5307_v55  ;;  %5126 = vmatprep.subr.bf16.mxu1 %v5321_v56  ;;  %v5317_v60 = vld [vmem:[#allocation8 + $0x50] sm:$0xff]  }
 0x199   :  { %v1178_v2 = vmax.f32 %v902_v62, 0.0  ;;  %5088 = vmatprep.mubr.bf16.mxu0 %v5308_v58 }
 0x19a   :  { %v1250_v3 = vpack.c.bf16 %v1180_v63, %v1179_v59  ;;  %v5318_v63 = vld [vmem:[#allocation8 + $0x58] sm:$0xff]  }
 0x19b   :  { %v1249_v4 = vpack.c.bf16 %v1178_v2, %v1177_v1  ;;  %v4874_v5 = vpop.f32.mrb[12].mxu0  ;;  %5127 = vmatpush3.bf16.msra.mxu1 %v5321_v56 }
 0x19c   :  { %v923_v6 = vadd.f32 %v4874_v5, %v6303_v16  ;;  %v914_v7 = vpop.f32.mrb[13].mxu0  ;;  %5128 = vmatprep.subr.bf16.mxu1 %v5327_v0 }
 0x19d   :  { %v915_v10 = vadd.f32 %v6303_v16, %v914_v7  ;;  %v4875_v11 = vpop.f32.mrb[14].mxu0  ;;  %4960 = vmatprep.mubr.bf16.mxu1 %v1249_v4 }
 0x19e   :  { %v1183_v13 = vmax.f32 %v923_v6, 0.0  ;;  %v926_v14 = vadd.f32 %v4875_v11, %v6303_v16  ;;  %v917_v15 = vpop.f32.mrb[15].mxu0  ;;  %4961 = vmatmul.mubr.bf16.gmra.mrb[8].mxu1 %v1250_v3 }
 0x19f   :  { %v918_v17 = vadd.f32 %v6303_v16, %v917_v15  ;;  %5129 = vmatpush3.bf16.msra.mxu1 %v5327_v0  ;;  %v1181_v20 = vmax.f32 %v915_v10, 0.0  ;;  %v5320_v15 = vld [vmem:[#allocation8 + $0x68] sm:$0xff]  }
 0x1a0   :  { %v1184_v18 = vmax.f32 %v926_v14, 0.0  ;;  %5089 = vmatmul.mubr.bf16.gmra.mrb[120].mxu0 %v5309_v8  ;;  %5130 = vmatprep.subr.bf16.mxu1 %v5328_v9 }
 0x1a1   :  { %v1182_v21 = vmax.f32 %v918_v17, 0.0  ;;  %5092 = vmatprep.mubr.bf16.mxu0 %v5311_v12  ;;  %v5319_v12 = vld [vmem:[#allocation8 + $0x60] sm:$0xff]  }
 0x1a2   :  { %v1252_v22 = vpack.c.bf16 %v1184_v18, %v1183_v13 }
 0x1a3   :  { %v1251_v23 = vpack.c.bf16 %v1182_v21, %v1181_v20  ;;  %v4878_v24 = vpop.f32.mrb[16].mxu0  ;;  %5131 = vmatpush3.bf16.msra.mxu1 %v5328_v9 }
 0x1a4   :  { %v939_v25 = vadd.f32 %v4878_v24, %v6303_v16  ;;  %v930_v26 = vpop.f32.mrb[17].mxu0  ;;  %5132 = vmatprep.subr.bf16.mxu1 %v5329_v19 }
 0x1a5   :  { %v931_v29 = vadd.f32 %v6303_v16, %v930_v26  ;;  %v4879_v30 = vpop.f32.mrb[18].mxu0  ;;  %4964 = vmatprep.mubr.bf16.mxu1 %v1251_v23 }
 0x1a6   :  { %v1187_v32 = vmax.f32 %v939_v25, 0.0  ;;  %v942_v33 = vadd.f32 %v4879_v30, %v6303_v16  ;;  %v933_v34 = vpop.f32.mrb[19].mxu0  ;;  %4965 = vmatmul.mubr.bf16.gmra.mrb[12].mxu1 %v1252_v22 }
 0x1a7   :  { %v934_v35 = vadd.f32 %v6303_v16, %v933_v34  ;;  %5133 = vmatpush3.bf16.msra.mxu1 %v5329_v19  ;;  %v1185_v37 = vmax.f32 %v931_v29, 0.0  ;;  %v5322_v29 = vld [vmem:[#allocation8 + $0x70] sm:$0xff]  }
 0x1a8   :  { %v1188_v36 = vmax.f32 %v942_v33, 0.0  ;;  %5093 = vmatmul.mubr.bf16.gmra.mrb[124].mxu0 %v5312_v27  ;;  %5134 = vmatprep.subr.bf16.mxu1 %v5330_v28 }
 0x1a9   :  { %v1186_v38 = vmax.f32 %v934_v35, 0.0  ;;  %5096 = vmatprep.mubr.bf16.mxu0 %v5313_v31 }
 0x1aa   :  { %v1254_v39 = vpack.c.bf16 %v1188_v36, %v1187_v32  ;;  %v5323_v32 = vld [vmem:[#allocation8 + $0x78] sm:$0xff]  }
 0x1ab   :  { %v1253_v40 = vpack.c.bf16 %v1186_v38, %v1185_v37  ;;  %v4882_v41 = vpop.f32.mrb[20].mxu0  ;;  %5135 = vmatpush3.bf16.msra.mxu1 %v5330_v28 }
 0x1ac   :  { %v955_v42 = vadd.f32 %v4882_v41, %v6303_v16  ;;  %v946_v43 = vpop.f32.mrb[21].mxu0 }
 0x1ad   :  { %v947_v45 = vadd.f32 %v6303_v16, %v946_v43  ;;  %v4883_v46 = vpop.f32.mrb[22].mxu0  ;;  %4968 = vmatprep.mubr.bf16.mxu1 %v1253_v40 }
 0x1ae   :  { %v1191_v48 = vmax.f32 %v955_v42, 0.0  ;;  %v958_v49 = vadd.f32 %v4883_v46, %v6303_v16  ;;  %v949_v50 = vpop.f32.mrb[23].mxu0  ;;  %4969 = vmatmul.mubr.bf16.gmra.mrb[16].mxu1 %v1254_v39 }
 0x1af   :  { %v950_v52 = vadd.f32 %v6303_v16, %v949_v50  ;;  %v1189_v54 = vmax.f32 %v947_v45, 0.0  ;;  %v5324_v45 = vld [vmem:[#allocation8 + $0x80] sm:$0xff]  }
 0x1b0   :  { %v1192_v53 = vmax.f32 %v958_v49, 0.0  ;;  %5097 = vmatmul.mubr.bf16.gmra.mrb[128].mxu0 %v5314_v44 }
 0x1b1   :  { %v1190_v55 = vmax.f32 %v950_v52, 0.0  ;;  %5100 = vmatprep.mubr.bf16.mxu0 %v5316_v47 }
 0x1b2   :  { %v1256_v56 = vpack.c.bf16 %v1192_v53, %v1191_v48  ;;  %v5325_v48 = vld [vmem:[#allocation8 + $0x88] sm:$0xff]  }
 0x1b3   :  { %v1255_v57 = vpack.c.bf16 %v1190_v55, %v1189_v54  ;;  %v4886_v51 = vpop.f32.mrb[24].mxu0 }
 0x1b4   :  { %v971_v58 = vadd.f32 %v4886_v51, %v6303_v16  ;;  %v962_v59 = vpop.f32.mrb[25].mxu0 }
 0x1b5   :  { %v963_v61 = vadd.f32 %v6303_v16, %v962_v59  ;;  %v4887_v62 = vpop.f32.mrb[26].mxu0  ;;  %4972 = vmatprep.mubr.bf16.mxu1 %v1255_v57 }
 0x1b6   :  { %v1195_v0 = vmax.f32 %v971_v58, 0.0  ;;  %v974_v1 = vadd.f32 %v4887_v62, %v6303_v16  ;;  %v965_v2 = vpop.f32.mrb[27].mxu0  ;;  %4973 = vmatmul.mubr.bf16.gmra.mrb[20].mxu1 %v1256_v56 }
 0x1b7   :  { %v966_v3 = vadd.f32 %v6303_v16, %v965_v2  ;;  %v1193_v5 = vmax.f32 %v963_v61, 0.0  ;;  %v5326_v61 = vld [vmem:[#allocation8 + $0x90] sm:$0xff]  }
 0x1b8   :  { %v1196_v4 = vmax.f32 %v974_v1, 0.0  ;;  %5101 = vmatmul.mubr.bf16.gmra.mrb[132].mxu0 %v5317_v60 }
 0x1b9   :  { %v1194_v6 = vmax.f32 %v966_v3, 0.0  ;;  %5104 = vmatprep.mubr.bf16.mxu0 %v5318_v63 }
 0x1ba   :  { %v1258_v7 = vpack.c.bf16 %v1196_v4, %v1195_v0 }
 0x1bb   :  { %v1257_v8 = vpack.c.bf16 %v1194_v6, %v1193_v5  ;;  %v4890_v9 = vpop.f32.mrb[28].mxu0 }
 0x1bc   :  { %v987_v10 = vadd.f32 %v4890_v9, %v6303_v16  ;;  %v978_v11 = vpop.f32.mrb[29].mxu0 }
 0x1bd   :  { %v979_v13 = vadd.f32 %v6303_v16, %v978_v11  ;;  %v4891_v14 = vpop.f32.mrb[30].mxu0  ;;  %4976 = vmatprep.mubr.bf16.mxu1 %v1257_v8 }
 0x1be   :  { %v1199_v17 = vmax.f32 %v987_v10, 0.0  ;;  %v990_v18 = vadd.f32 %v4891_v14, %v6303_v16  ;;  %v981_v19 = vpop.f32.mrb[31].mxu0  ;;  %4977 = vmatmul.mubr.bf16.gmra.mrb[24].mxu1 %v1258_v7 }
 0x1bf   :  { %v982_v20 = vadd.f32 %v6303_v16, %v981_v19  ;;  %v1197_v22 = vmax.f32 %v979_v13, 0.0 }
 0x1c0   :  { %v1200_v21 = vmax.f32 %v990_v18, 0.0  ;;  %5105 = vmatmul.mubr.bf16.gmra.mrb[136].mxu0 %v5319_v12 }
 0x1c1   :  { %v1198_v23 = vmax.f32 %v982_v20, 0.0  ;;  %5108 = vmatprep.mubr.bf16.mxu0 %v5320_v15 }
 0x1c2   :  { %v1260_v24 = vpack.c.bf16 %v1200_v21, %v1199_v17 }
 0x1c3   :  { %v1259_v25 = vpack.c.bf16 %v1198_v23, %v1197_v22  ;;  %v4894_v26 = vpop.f32.mrb[32].mxu0 }
 0x1c4   :  { %v1003_v27 = vadd.f32 %v4894_v26, %v6303_v16  ;;  %v994_v28 = vpop.f32.mrb[33].mxu0 }
 0x1c5   :  { %v995_v30 = vadd.f32 %v6303_v16, %v994_v28  ;;  %v4895_v31 = vpop.f32.mrb[34].mxu0  ;;  %4980 = vmatprep.mubr.bf16.mxu1 %v1259_v25 }
 0x1c6   :  { %v1203_v33 = vmax.f32 %v1003_v27, 0.0  ;;  %v1006_v34 = vadd.f32 %v4895_v31, %v6303_v16  ;;  %v997_v35 = vpop.f32.mrb[35].mxu0  ;;  %4981 = vmatmul.mubr.bf16.gmra.mrb[28].mxu1 %v1260_v24 }
 0x1c7   :  { %v998_v36 = vadd.f32 %v6303_v16, %v997_v35  ;;  %v1201_v38 = vmax.f32 %v995_v30, 0.0 }
 0x1c8   :  { %v1204_v37 = vmax.f32 %v1006_v34, 0.0  ;;  %5109 = vmatmul.mubr.bf16.gmra.mrb[140].mxu0 %v5322_v29 }
 0x1c9   :  { %v1202_v39 = vmax.f32 %v998_v36, 0.0  ;;  %5112 = vmatprep.mubr.bf16.mxu0 %v5323_v32 }
 0x1ca   :  { %v1262_v40 = vpack.c.bf16 %v1204_v37, %v1203_v33 }
 0x1cb   :  { %v1261_v41 = vpack.c.bf16 %v1202_v39, %v1201_v38  ;;  %v4898_v42 = vpop.f32.mrb[36].mxu0 }
 0x1cc   :  { %v1019_v43 = vadd.f32 %v4898_v42, %v6303_v16  ;;  %v1010_v44 = vpop.f32.mrb[37].mxu0 }
 0x1cd   :  { %v1011_v46 = vadd.f32 %v6303_v16, %v1010_v44  ;;  %v4899_v47 = vpop.f32.mrb[38].mxu0  ;;  %4984 = vmatprep.mubr.bf16.mxu1 %v1261_v41 }
 0x1ce   :  { %v1207_v49 = vmax.f32 %v1019_v43, 0.0  ;;  %v1022_v50 = vadd.f32 %v4899_v47, %v6303_v16  ;;  %v1013_v52 = vpop.f32.mrb[39].mxu0  ;;  %4985 = vmatmul.mubr.bf16.gmra.mrb[32].mxu1 %v1262_v40 }
 0x1cf   :  { %v1014_v53 = vadd.f32 %v6303_v16, %v1013_v52  ;;  %v1205_v55 = vmax.f32 %v1011_v46, 0.0 }
 0x1d0   :  { %v1208_v54 = vmax.f32 %v1022_v50, 0.0  ;;  %5113 = vmatmul.mubr.bf16.gmra.mrb[144].mxu0 %v5324_v45 }
 0x1d1   :  { %v1206_v56 = vmax.f32 %v1014_v53, 0.0  ;;  %5116 = vmatprep.mubr.bf16.mxu0 %v5325_v48 }
 0x1d2   :  { %v1264_v57 = vpack.c.bf16 %v1208_v54, %v1207_v49 }
 0x1d3   :  { %v1263_v51 = vpack.c.bf16 %v1206_v56, %v1205_v55  ;;  %v4902_v58 = vpop.f32.mrb[40].mxu0 }
 0x1d4   :  { %v1035_v59 = vadd.f32 %v4902_v58, %v6303_v16  ;;  %v1026_v60 = vpop.f32.mrb[41].mxu0 }
 0x1d5   :  { %v1027_v62 = vadd.f32 %v6303_v16, %v1026_v60  ;;  %v4903_v63 = vpop.f32.mrb[42].mxu0  ;;  %4988 = vmatprep.mubr.bf16.mxu1 %v1263_v51 }
 0x1d6   :  { %v1211_v0 = vmax.f32 %v1035_v59, 0.0  ;;  %v1038_v1 = vadd.f32 %v4903_v63, %v6303_v16  ;;  %v1029_v2 = vpop.f32.mrb[43].mxu0  ;;  %4989 = vmatmul.mubr.bf16.gmra.mrb[36].mxu1 %v1264_v57 }
 0x1d7   :  { %v1030_v3 = vadd.f32 %v6303_v16, %v1029_v2  ;;  %v1209_v5 = vmax.f32 %v1027_v62, 0.0 }
 0x1d8   :  { %v1212_v4 = vmax.f32 %v1038_v1, 0.0  ;;  %5117 = vmatmul.mubr.bf16.gmra.mrb[148].mxu0 %v5326_v61 }
 0x1d9   :  { %v1210_v6 = vmax.f32 %v1030_v3, 0.0 }
 0x1da   :  { %v1266_v7 = vpack.c.bf16 %v1212_v4, %v1211_v0 }
 0x1db   :  { %v1265_v8 = vpack.c.bf16 %v1210_v6, %v1209_v5  ;;  %v4906_v9 = vpop.f32.mrb[44].mxu0 }
 0x1dc   :  { %v1051_v10 = vadd.f32 %v4906_v9, %v6303_v16  ;;  %v1042_v11 = vpop.f32.mrb[45].mxu0 }
 0x1dd   :  { %v1043_v12 = vadd.f32 %v6303_v16, %v1042_v11  ;;  %v4907_v13 = vpop.f32.mrb[46].mxu0  ;;  %4992 = vmatprep.mubr.bf16.mxu1 %v1265_v8 }
 0x1de   :  { %v1215_v14 = vmax.f32 %v1051_v10, 0.0  ;;  %v1054_v15 = vadd.f32 %v4907_v13, %v6303_v16  ;;  %v1045_v17 = vpop.f32.mrb[47].mxu0  ;;  %4993 = vmatmul.mubr.bf16.gmra.mrb[40].mxu1 %v1266_v7 }
 0x1df   :  { %v1046_v18 = vadd.f32 %v6303_v16, %v1045_v17  ;;  %v1213_v20 = vmax.f32 %v1043_v12, 0.0 }
 0x1e0   :  { %v1216_v19 = vmax.f32 %v1054_v15, 0.0 }
 0x1e1   :  { %v1214_v21 = vmax.f32 %v1046_v18, 0.0 }
 0x1e2   :  { %v1268_v22 = vpack.c.bf16 %v1216_v19, %v1215_v14 }
 0x1e3   :  { %v1267_v23 = vpack.c.bf16 %v1214_v21, %v1213_v20  ;;  %v4910_v24 = vpop.f32.mrb[48].mxu0 }
 0x1e4   :  { %v1067_v25 = vadd.f32 %v4910_v24, %v6303_v16  ;;  %v1058_v26 = vpop.f32.mrb[49].mxu0 }
 0x1e5   :  { %v1059_v27 = vadd.f32 %v6303_v16, %v1058_v26  ;;  %v4911_v28 = vpop.f32.mrb[50].mxu0  ;;  %4996 = vmatprep.mubr.bf16.mxu1 %v1267_v23 }
 0x1e6   :  { %v1219_v29 = vmax.f32 %v1067_v25, 0.0  ;;  %v1070_v30 = vadd.f32 %v4911_v28, %v6303_v16  ;;  %v1061_v31 = vpop.f32.mrb[51].mxu0  ;;  %4997 = vmatmul.mubr.bf16.gmra.mrb[44].mxu1 %v1268_v22 }
 0x1e7   :  { %v1062_v32 = vadd.f32 %v6303_v16, %v1061_v31  ;;  %v1217_v34 = vmax.f32 %v1059_v27, 0.0 }
 0x1e8   :  { %v1220_v33 = vmax.f32 %v1070_v30, 0.0 }
 0x1e9   :  { %v1218_v35 = vmax.f32 %v1062_v32, 0.0 }
 0x1ea   :  { %v1270_v36 = vpack.c.bf16 %v1220_v33, %v1219_v29 }
 0x1eb   :  { %v1269_v37 = vpack.c.bf16 %v1218_v35, %v1217_v34  ;;  %v4914_v38 = vpop.f32.mrb[52].mxu0 }
 0x1ec   :  { %v1083_v39 = vadd.f32 %v4914_v38, %v6303_v16  ;;  %v1074_v40 = vpop.f32.mrb[53].mxu0 }
 0x1ed   :  { %v1075_v41 = vadd.f32 %v6303_v16, %v1074_v40  ;;  %v4915_v42 = vpop.f32.mrb[54].mxu0  ;;  %5000 = vmatprep.mubr.bf16.mxu1 %v1269_v37 }
 0x1ee   :  { %v1223_v43 = vmax.f32 %v1083_v39, 0.0  ;;  %v1086_v44 = vadd.f32 %v4915_v42, %v6303_v16  ;;  %v1077_v45 = vpop.f32.mrb[55].mxu0  ;;  %5001 = vmatmul.mubr.bf16.gmra.mrb[48].mxu1 %v1270_v36 }
 0x1ef   :  { %v1078_v46 = vadd.f32 %v6303_v16, %v1077_v45  ;;  %v1221_v48 = vmax.f32 %v1075_v41, 0.0 }
 0x1f0   :  { %v1224_v47 = vmax.f32 %v1086_v44, 0.0 }
 0x1f1   :  { %v1222_v49 = vmax.f32 %v1078_v46, 0.0 }
 0x1f2   :  { %v1272_v50 = vpack.c.bf16 %v1224_v47, %v1223_v43 }
 0x1f3   :  { %v1271_v52 = vpack.c.bf16 %v1222_v49, %v1221_v48  ;;  %v4918_v53 = vpop.f32.mrb[56].mxu0 }
 0x1f4   :  { %v1099_v54 = vadd.f32 %v4918_v53, %v6303_v16  ;;  %v1090_v55 = vpop.f32.mrb[57].mxu0 }
 0x1f5   :  { %v1091_v56 = vadd.f32 %v6303_v16, %v1090_v55  ;;  %v4919_v57 = vpop.f32.mrb[58].mxu0  ;;  %5004 = vmatprep.mubr.bf16.mxu1 %v1271_v52 }
 0x1f6   :  { %v1227_v51 = vmax.f32 %v1099_v54, 0.0  ;;  %v1102_v58 = vadd.f32 %v4919_v57, %v6303_v16  ;;  %v1093_v59 = vpop.f32.mrb[59].mxu0  ;;  %5005 = vmatmul.mubr.bf16.gmra.mrb[52].mxu1 %v1272_v50 }
 0x1f7   :  { %v1094_v60 = vadd.f32 %v6303_v16, %v1093_v59  ;;  %v1225_v62 = vmax.f32 %v1091_v56, 0.0 }
 0x1f8   :  { %v1228_v61 = vmax.f32 %v1102_v58, 0.0 }
 0x1f9   :  { %v1226_v63 = vmax.f32 %v1094_v60, 0.0 }
 0x1fa   :  { %v1274_v0 = vpack.c.bf16 %v1228_v61, %v1227_v51  ;;  %v6385_v51 = vld [vmem:[%s8501_s9] ss:$0 sm:$0xff] }
 0x1fb   :  { %v1273_v1 = vpack.c.bf16 %v1226_v63, %v1225_v62  ;;  %v4922_v2 = vpop.f32.mrb[60].mxu0 }
 0x1fc   :  { %v1115_v3 = vadd.f32 %v4922_v2, %v6303_v16  ;;  %v1106_v4 = vpop.f32.mrb[61].mxu0 }
 0x1fd   :  { %v1107_v5 = vadd.f32 %v6303_v16, %v1106_v4  ;;  %v4923_v6 = vpop.f32.mrb[62].mxu0  ;;  %5008 = vmatprep.mubr.bf16.mxu1 %v1273_v1 }
 0x1fe   :  { %v1231_v7 = vmax.f32 %v1115_v3, 0.0  ;;  %v1118_v8 = vadd.f32 %v4923_v6, %v6303_v16  ;;  %v1109_v9 = vpop.f32.mrb[63].mxu0  ;;  %5009 = vmatmul.mubr.bf16.gmra.mrb[56].mxu1 %v1274_v0 }
 0x1ff   :  { %v1110_v10 = vadd.f32 %v6303_v16, %v1109_v9  ;;  %v1229_v12 = vmax.f32 %v1107_v5, 0.0 }
 0x200   :  { %v1232_v11 = vmax.f32 %v1118_v8, 0.0 }
 0x201   :  { %v1230_v13 = vmax.f32 %v1110_v10, 0.0 }
 0x202   :  { %v1276_v14 = vpack.c.bf16 %v1232_v11, %v1231_v7 }
 0x203   :  { %v1275_v15 = vpack.c.bf16 %v1230_v13, %v1229_v12  ;;  %v4926_v17 = vpop.f32.mrb[64].mxu0 }
 0x204   :  { %v1131_v18 = vadd.f32 %v4926_v17, %v6303_v16  ;;  %v1122_v19 = vpop.f32.mrb[65].mxu0 }
 0x205   :  { %v1123_v20 = vadd.f32 %v6303_v16, %v1122_v19  ;;  %v4927_v21 = vpop.f32.mrb[66].mxu0  ;;  %5012 = vmatprep.mubr.bf16.mxu1 %v1275_v15 }
 0x206   :  { %v1235_v22 = vmax.f32 %v1131_v18, 0.0  ;;  %v1134_v23 = vadd.f32 %v4927_v21, %v6303_v16  ;;  %v1125_v24 = vpop.f32.mrb[67].mxu0  ;;  %5013 = vmatmul.mubr.bf16.gmra.mrb[60].mxu1 %v1276_v14 }
 0x207   :  { %v1126_v25 = vadd.f32 %v6303_v16, %v1125_v24  ;;  %v1233_v27 = vmax.f32 %v1123_v20, 0.0 }
 0x208   :  { %v1236_v26 = vmax.f32 %v1134_v23, 0.0 }
 0x209   :  { %v1234_v28 = vmax.f32 %v1126_v25, 0.0 }
 0x20a   :  { %v1278_v29 = vpack.c.bf16 %v1236_v26, %v1235_v22 }
 0x20b   :  { %v1277_v30 = vpack.c.bf16 %v1234_v28, %v1233_v27  ;;  %v4930_v31 = vpop.f32.mrb[68].mxu0 }
 0x20c   :  { %v1147_v32 = vadd.f32 %v4930_v31, %v6303_v16  ;;  %v1138_v33 = vpop.f32.mrb[69].mxu0 }
 0x20d   :  { %v1139_v34 = vadd.f32 %v6303_v16, %v1138_v33  ;;  %v4931_v35 = vpop.f32.mrb[70].mxu0  ;;  %5016 = vmatprep.mubr.bf16.mxu1 %v1277_v30 }
 0x20e   :  { %v1239_v36 = vmax.f32 %v1147_v32, 0.0  ;;  %v1150_v37 = vadd.f32 %v4931_v35, %v6303_v16  ;;  %v1141_v38 = vpop.f32.mrb[71].mxu0  ;;  %5017 = vmatmul.mubr.bf16.gmra.mrb[64].mxu1 %v1278_v29 }
 0x20f   :  { %v1142_v39 = vadd.f32 %v6303_v16, %v1141_v38  ;;  %v1237_v41 = vmax.f32 %v1139_v34, 0.0 }
 0x210   :  { %v1240_v40 = vmax.f32 %v1150_v37, 0.0 }
 0x211   :  { %v1238_v42 = vmax.f32 %v1142_v39, 0.0 }
 0x212   :  { %v1280_v43 = vpack.c.bf16 %v1240_v40, %v1239_v36 }
 0x213   :  { %v1279_v44 = vpack.c.bf16 %v1238_v42, %v1237_v41  ;;  %v4934_v45 = vpop.f32.mrb[72].mxu0 }
 0x214   :  { %v1163_v46 = vadd.f32 %v4934_v45, %v6303_v16  ;;  %v1154_v47 = vpop.f32.mrb[73].mxu0 }
 0x215   :  { %v1155_v48 = vadd.f32 %v6303_v16, %v1154_v47  ;;  %v4935_v49 = vpop.f32.mrb[74].mxu0  ;;  %5020 = vmatprep.mubr.bf16.mxu1 %v1279_v44 }
 0x216   :  { %v1243_v50 = vmax.f32 %v1163_v46, 0.0  ;;  %v1166_v52 = vadd.f32 %v4935_v49, %v6303_v16  ;;  %v1157_v53 = vpop.f32.mrb[75].mxu0  ;;  %5021 = vmatmul.mubr.bf16.gmra.mrb[68].mxu1 %v1280_v43 }
 0x217   :  { %v1158_v54 = vadd.f32 %v6303_v16, %v1157_v53  ;;  %v1241_v56 = vmax.f32 %v1155_v48, 0.0 }
 0x218   :  { %v1244_v55 = vmax.f32 %v1166_v52, 0.0 }
 0x219   :  { %v1242_v57 = vmax.f32 %v1158_v54, 0.0 }
 0x21a   :  { %v1282_v58 = vpack.c.bf16 %v1244_v55, %v1243_v50 }
 0x21b   :  { %v1281_v59 = vpack.c.bf16 %v1242_v57, %v1241_v56  ;;  %v5046_v60 = vpop.f32.mrb[76].mxu0 }
 0x21c   :  { %v2261_v61 = vadd.f32 %v5046_v60, %v6385_v51  ;;  %v2252_v62 = vpop.f32.mrb[77].mxu0 }
 0x21d   :  { %v2253_v63 = vadd.f32 %v6385_v51, %v2252_v62  ;;  %5024 = vmatprep.mubr.bf16.mxu1 %v1281_v59  ;;  %v5047_v0 = vpop.f32.mrb[78].mxu0 }
 0x21e   :  { %v2557_v1 = vmax.f32 %v2261_v61, 0.0  ;;  %v2264_v16 = vadd.f32 %v5047_v0, %v6385_v51  ;;  %5025 = vmatmul.mubr.bf16.gmra.mrb[72].mxu1 %v1282_v58  ;;  %v2255_v2 = vpop.f32.mrb[79].mxu0 }
 0x21f   :  { %v2256_v3 = vadd.f32 %v6385_v51, %v2255_v2  ;;  %v2555_v5 = vmax.f32 %v2253_v63, 0.0 }
 0x220   :  { %v2558_v4 = vmax.f32 %v2264_v16, 0.0 }
 0x221   :  { %v2556_v6 = vmax.f32 %v2256_v3, 0.0 }
 0x222   :  { %v2632_v7 = vpack.c.bf16 %v2558_v4, %v2557_v1 }
 0x223   :  { %v2631_v8 = vpack.c.bf16 %v2556_v6, %v2555_v5  ;;  %v5050_v9 = vpop.f32.mrb[80].mxu0 }
 0x224   :  { %v2277_v10 = vadd.f32 %v5050_v9, %v6385_v51  ;;  %v2268_v11 = vpop.f32.mrb[81].mxu0 }
 0x225   :  { %v2269_v12 = vadd.f32 %v6385_v51, %v2268_v11  ;;  %v5051_v13 = vpop.f32.mrb[82].mxu0  ;;  %5136 = vmatprep.mubr.bf16.mxu1 %v2631_v8 }
 0x226   :  { %v2561_v14 = vmax.f32 %v2277_v10, 0.0  ;;  %v2280_v15 = vadd.f32 %v5051_v13, %v6385_v51  ;;  %v2271_v17 = vpop.f32.mrb[83].mxu0  ;;  %5137 = vmatmul.mubr.bf16.vlgmr.msra.gmra.mrb[76].mxu1 %v2632_v7 }
 0x227   :  { %v2559_v18 = vmax.f32 %v2269_v12, 0.0  ;;  %v2272_v19 = vadd.f32 %v6385_v51, %v2271_v17 }
 0x228   :  { %v2562_v20 = vmax.f32 %v2280_v15, 0.0 }
 0x229   :  { %v2560_v21 = vmax.f32 %v2272_v19, 0.0 }
 0x22a   :  { %v2634_v22 = vpack.c.bf16 %v2562_v20, %v2561_v14 }
 0x22b   :  { %v2633_v23 = vpack.c.bf16 %v2560_v21, %v2559_v18  ;;  %v5054_v24 = vpop.f32.mrb[84].mxu0 }
 0x22c   :  { %v2293_v25 = vadd.f32 %v5054_v24, %v6385_v51  ;;  %v2284_v26 = vpop.f32.mrb[85].mxu0 }
 0x22d   :  { %v2285_v27 = vadd.f32 %v6385_v51, %v2284_v26  ;;  %v5055_v28 = vpop.f32.mrb[86].mxu0  ;;  %5140 = vmatprep.mubr.bf16.mxu1 %v2633_v23 }
 0x22e   :  { %v2565_v29 = vmax.f32 %v2293_v25, 0.0  ;;  %v2296_v30 = vadd.f32 %v5055_v28, %v6385_v51  ;;  %v2287_v31 = vpop.f32.mrb[87].mxu0  ;;  %5141 = vmatmul.mubr.bf16.gmra.mrb[80].mxu1 %v2634_v22 }
 0x22f   :  { %v2563_v32 = vmax.f32 %v2285_v27, 0.0  ;;  %v2288_v33 = vadd.f32 %v6385_v51, %v2287_v31 }
 0x230   :  { %v2566_v34 = vmax.f32 %v2296_v30, 0.0 }
 0x231   :  { %v2564_v35 = vmax.f32 %v2288_v33, 0.0 }
 0x232   :  { %v2636_v36 = vpack.c.bf16 %v2566_v34, %v2565_v29 }
 0x233   :  { %v2635_v37 = vpack.c.bf16 %v2564_v35, %v2563_v32  ;;  %v5058_v38 = vpop.f32.mrb[88].mxu0 }
 0x234   :  { %v2309_v39 = vadd.f32 %v5058_v38, %v6385_v51  ;;  %v2300_v40 = vpop.f32.mrb[89].mxu0 }
 0x235   :  { %v2301_v41 = vadd.f32 %v6385_v51, %v2300_v40  ;;  %v5059_v42 = vpop.f32.mrb[90].mxu0  ;;  %5144 = vmatprep.mubr.bf16.mxu1 %v2635_v37 }
 0x236   :  { %v2569_v43 = vmax.f32 %v2309_v39, 0.0  ;;  %v2312_v44 = vadd.f32 %v5059_v42, %v6385_v51  ;;  %v2303_v45 = vpop.f32.mrb[91].mxu0  ;;  %5145 = vmatmul.mubr.bf16.gmra.mrb[84].mxu1 %v2636_v36 }
 0x237   :  { %v2567_v46 = vmax.f32 %v2301_v41, 0.0  ;;  %v2304_v47 = vadd.f32 %v6385_v51, %v2303_v45 }
 0x238   :  { %v2570_v48 = vmax.f32 %v2312_v44, 0.0 }
 0x239   :  { %v2568_v49 = vmax.f32 %v2304_v47, 0.0 }
 0x23a   :  { %v2638_v50 = vpack.c.bf16 %v2570_v48, %v2569_v43 }
 0x23b   :  { %v2637_v52 = vpack.c.bf16 %v2568_v49, %v2567_v46  ;;  %v5062_v53 = vpop.f32.mrb[92].mxu0 }
 0x23c   :  { %v2325_v54 = vadd.f32 %v5062_v53, %v6385_v51  ;;  %v2316_v55 = vpop.f32.mrb[93].mxu0 }
 0x23d   :  { %v2317_v56 = vadd.f32 %v6385_v51, %v2316_v55  ;;  %v5063_v57 = vpop.f32.mrb[94].mxu0  ;;  %5148 = vmatprep.mubr.bf16.mxu1 %v2637_v52 }
 0x23e   :  { %v2573_v58 = vmax.f32 %v2325_v54, 0.0  ;;  %v2328_v59 = vadd.f32 %v5063_v57, %v6385_v51  ;;  %v2319_v60 = vpop.f32.mrb[95].mxu0  ;;  %5149 = vmatmul.mubr.bf16.gmra.mrb[88].mxu1 %v2638_v50 }
 0x23f   :  { %v2571_v61 = vmax.f32 %v2317_v56, 0.0  ;;  %v2320_v62 = vadd.f32 %v6385_v51, %v2319_v60  ;;  %v6426_v56 = vld [vmem:[%s8499_s7] ss:$0 sm:$0xff] }
 0x240   :  { %v2574_v63 = vmax.f32 %v2328_v59, 0.0 }
 0x241   :  { %v2572_v0 = vmax.f32 %v2320_v62, 0.0 }
 0x242   :  { %v2640_v1 = vpack.c.bf16 %v2574_v63, %v2573_v58 }
 0x243   :  { %v2639_v16 = vpack.c.bf16 %v2572_v0, %v2571_v61  ;;  %v5066_v2 = vpop.f32.mrb[96].mxu0 }
 0x244   :  { %v2341_v3 = vadd.f32 %v5066_v2, %v6385_v51  ;;  %v2332_v4 = vpop.f32.mrb[97].mxu0 }
 0x245   :  { %v2333_v5 = vadd.f32 %v6385_v51, %v2332_v4  ;;  %v5067_v6 = vpop.f32.mrb[98].mxu0  ;;  %5152 = vmatprep.mubr.bf16.mxu1 %v2639_v16 }
 0x246   :  { %v2577_v7 = vmax.f32 %v2341_v3, 0.0  ;;  %v2344_v8 = vadd.f32 %v5067_v6, %v6385_v51  ;;  %v2335_v9 = vpop.f32.mrb[99].mxu0  ;;  %5153 = vmatmul.mubr.bf16.gmra.mrb[92].mxu1 %v2640_v1 }
 0x247   :  { %v2575_v10 = vmax.f32 %v2333_v5, 0.0  ;;  %v2336_v11 = vadd.f32 %v6385_v51, %v2335_v9 }
 0x248   :  { %v2578_v12 = vmax.f32 %v2344_v8, 0.0 }
 0x249   :  { %v2576_v13 = vmax.f32 %v2336_v11, 0.0 }
 0x24a   :  { %v2642_v14 = vpack.c.bf16 %v2578_v12, %v2577_v7 }
 0x24b   :  { %v2641_v15 = vpack.c.bf16 %v2576_v13, %v2575_v10  ;;  %v5070_v17 = vpop.f32.mrb[100].mxu0 }
 0x24c   :  { %v2357_v18 = vadd.f32 %v5070_v17, %v6385_v51  ;;  %v2348_v19 = vpop.f32.mrb[101].mxu0 }
 0x24d   :  { %v2349_v20 = vadd.f32 %v6385_v51, %v2348_v19  ;;  %v5071_v21 = vpop.f32.mrb[102].mxu0  ;;  %5156 = vmatprep.mubr.bf16.mxu1 %v2641_v15 }
 0x24e   :  { %v2581_v22 = vmax.f32 %v2357_v18, 0.0  ;;  %v2360_v23 = vadd.f32 %v5071_v21, %v6385_v51  ;;  %v2351_v24 = vpop.f32.mrb[103].mxu0  ;;  %5157 = vmatmul.mubr.bf16.gmra.mrb[96].mxu1 %v2642_v14 }
 0x24f   :  { %v2579_v25 = vmax.f32 %v2349_v20, 0.0  ;;  %v2352_v26 = vadd.f32 %v6385_v51, %v2351_v24 }
 0x250   :  { %v2582_v27 = vmax.f32 %v2360_v23, 0.0 }
 0x251   :  { %v2580_v28 = vmax.f32 %v2352_v26, 0.0 }
 0x252   :  { %v2644_v29 = vpack.c.bf16 %v2582_v27, %v2581_v22 }
 0x253   :  { %v2643_v30 = vpack.c.bf16 %v2580_v28, %v2579_v25  ;;  %v5074_v31 = vpop.f32.mrb[104].mxu0 }
 0x254   :  { %v2373_v32 = vadd.f32 %v5074_v31, %v6385_v51  ;;  %v2364_v33 = vpop.f32.mrb[105].mxu0 }
 0x255   :  { %v2365_v34 = vadd.f32 %v6385_v51, %v2364_v33  ;;  %v5075_v35 = vpop.f32.mrb[106].mxu0  ;;  %5160 = vmatprep.mubr.bf16.mxu1 %v2643_v30 }
 0x256   :  { %v2585_v36 = vmax.f32 %v2373_v32, 0.0  ;;  %v2376_v37 = vadd.f32 %v5075_v35, %v6385_v51  ;;  %v2367_v38 = vpop.f32.mrb[107].mxu0  ;;  %5161 = vmatmul.mubr.bf16.gmra.mrb[100].mxu1 %v2644_v29 }
 0x257   :  { %v2583_v39 = vmax.f32 %v2365_v34, 0.0  ;;  %v2368_v40 = vadd.f32 %v6385_v51, %v2367_v38 }
 0x258   :  { %v2586_v41 = vmax.f32 %v2376_v37, 0.0 }
 0x259   :  { %v2584_v42 = vmax.f32 %v2368_v40, 0.0 }
 0x25a   :  { %v2646_v43 = vpack.c.bf16 %v2586_v41, %v2585_v36 }
 0x25b   :  { %v2645_v44 = vpack.c.bf16 %v2584_v42, %v2583_v39  ;;  %v5078_v45 = vpop.f32.mrb[108].mxu0 }
 0x25c   :  { %v2389_v46 = vadd.f32 %v5078_v45, %v6385_v51  ;;  %v2380_v47 = vpop.f32.mrb[109].mxu0 }
 0x25d   :  { %v2381_v48 = vadd.f32 %v6385_v51, %v2380_v47  ;;  %v5079_v49 = vpop.f32.mrb[110].mxu0  ;;  %5164 = vmatprep.mubr.bf16.mxu1 %v2645_v44 }
 0x25e   :  { %v2589_v50 = vmax.f32 %v2389_v46, 0.0  ;;  %v2392_v52 = vadd.f32 %v5079_v49, %v6385_v51  ;;  %v2383_v53 = vpop.f32.mrb[111].mxu0  ;;  %5165 = vmatmul.mubr.bf16.gmra.mrb[104].mxu1 %v2646_v43 }
 0x25f   :  { %v2587_v54 = vmax.f32 %v2381_v48, 0.0  ;;  %v2384_v55 = vadd.f32 %v6385_v51, %v2383_v53 }
 0x260   :  { %v2590_v57 = vmax.f32 %v2392_v52, 0.0 }
 0x261   :  { %v2588_v58 = vmax.f32 %v2384_v55, 0.0  ;;  %v4954_v59 = vpop.f32.mrb[0].mxu1 }
 0x262   :  { %v2648_v60 = vpack.c.bf16 %v2590_v57, %v2589_v50  ;;  %v6429_v61 = vadd.f32 %v4954_v59, %v6426_v56  ;;  %v1388_v62 = vpop.f32.mrb[1].mxu1 }
 0x263   :  { %v2647_v63 = vpack.c.bf16 %v2588_v58, %v2587_v54  ;;  %v6432_v0 = vadd.f32 %v6426_v56, %v1388_v62  ;;  %v4955_v1 = vpop.f32.mrb[2].mxu1  ;;  %v5082_v16 = vpop.f32.mrb[112].mxu0 }
 0x264   :  { %v6435_v2 = vadd.f32 %v4955_v1, %v6426_v56  ;;  %v2405_v3 = vadd.f32 %v5082_v16, %v6385_v51  ;;  %v1391_v4 = vpop.f32.mrb[3].mxu1  ;;  %v2396_v5 = vpop.f32.mrb[113].mxu0  ;;  %v1693_v6 = vmul.f32 %v6429_v61, %v6429_v61 }
 0x265   :  { %v6441_v7 = vadd.f32 %v6426_v56, %v1391_v4  ;;  %v2397_v8 = vadd.f32 %v6385_v51, %v2396_v5  ;;  %v5083_v9 = vpop.f32.mrb[114].mxu0  ;;  %5168 = vmatprep.mubr.bf16.mxu1 %v2647_v63  ;;  %v1691_v10 = vmul.f32 %v6432_v0, %v6432_v0 }
 0x266   :  { %v2593_v11 = vmax.f32 %v2405_v3, 0.0  ;;  %v2408_v12 = vadd.f32 %v5083_v9, %v6385_v51  ;;  %v2399_v13 = vpop.f32.mrb[115].mxu0  ;;  %5169 = vmatmul.mubr.bf16.gmra.mrb[108].mxu1 %v2648_v60  ;;  %1771 = vadd.xlane.f32.xlu1 %v1693_v6  ;;  %v1694_v18 = vmul.f32 %v6435_v2, %v6435_v2 }
 0x267   :  { %v2591_v14 = vmax.f32 %v2397_v8, 0.0  ;;  %v2400_v15 = vadd.f32 %v6385_v51, %v2399_v13  ;;  %1767 = vadd.xlane.f32.xlu0 %v1691_v10  ;;  %v1692_v21 = vmul.f32 %v6441_v7, %v6441_v7 }
 0x268   :  { %v2594_v17 = vmax.f32 %v2408_v12, 0.0 }
 0x269   :  { %v2592_v19 = vmax.f32 %v2400_v15, 0.0  ;;  %v4958_v20 = vpop.f32.mrb[4].mxu1 }
 0x26a   :  { %v2650_v22 = vpack.c.bf16 %v2594_v17, %v2593_v11  ;;  %v6453_v23 = vadd.f32 %v4958_v20, %v6426_v56  ;;  %1773 = vadd.xlane.f32.xlu1 %v1694_v18  ;;  %v1404_v24 = vpop.f32.mrb[5].mxu1 }
 0x26b   :  { %v2649_v25 = vpack.c.bf16 %v2592_v19, %v2591_v14  ;;  %v4959_v26 = vpop.f32.mrb[6].mxu1  ;;  %v5086_v27 = vpop.f32.mrb[116].mxu0  ;;  %1769 = vadd.xlane.f32.xlu0 %v1692_v21  ;;  %v6462_v33 = vadd.f32 %v6426_v56, %v1404_v24 }
 0x26c   :  { %v6456_v28 = vadd.f32 %v4959_v26, %v6426_v56  ;;  %v2421_v29 = vadd.f32 %v5086_v27, %v6385_v51  ;;  %v1407_v30 = vpop.f32.mrb[7].mxu1  ;;  %v2412_v31 = vpop.f32.mrb[117].mxu0  ;;  %v1697_v32 = vmul.f32 %v6453_v23, %v6453_v23 }
 0x26d   :  { %8660 = vst [vmem:[#allocation23_spill] sm:$0xff] %v6462_v33  ;;  %v2413_v34 = vadd.f32 %v6385_v51, %v2412_v31  ;;  %v5087_v35 = vpop.f32.mrb[118].mxu0  ;;  %5172 = vmatprep.mubr.bf16.mxu1 %v2649_v25  ;;  %v6466_v37 = vadd.f32 %v6426_v56, %v1407_v30  ;;  %v1695_v46 = vmul.f32 %v6462_v33, %v6462_v33 }
 0x26e   :  { %v2597_v36 = vmax.f32 %v2421_v29, 0.0  ;;  %v2424_v38 = vadd.f32 %v5087_v35, %v6385_v51  ;;  %v2415_v39 = vpop.f32.mrb[119].mxu0  ;;  %5173 = vmatmul.mubr.bf16.gmra.mrb[112].mxu1 %v2650_v22  ;;  %v1698_v40 = vmul.f32 %v6456_v28, %v6456_v28 }
 0x26f   :  { %v2595_v41 = vmax.f32 %v2413_v34, 0.0  ;;  %v2416_v42 = vadd.f32 %v6385_v51, %v2415_v39  ;;  %1779 = vadd.xlane.f32.xlu0 %v1697_v32  ;;  %v1696_v50 = vmul.f32 %v6466_v37, %v6466_v37 }
 0x270   :  { %v2598_v43 = vmax.f32 %v2424_v38, 0.0  ;;  %1781 = vadd.xlane.f32.xlu1 %v1698_v40 }
 0x271   :  { %v2596_v44 = vmax.f32 %v2416_v42, 0.0  ;;  %v4962_v45 = vpop.f32.mrb[8].mxu1 }
 0x272   :  { %v2652_v47 = vpack.c.bf16 %v2598_v43, %v2597_v36  ;;  %v6475_v48 = vadd.f32 %v4962_v45, %v6426_v56  ;;  %v1420_v49 = vpop.f32.mrb[9].mxu1 }
 0x273   :  { %v2651_v52 = vpack.c.bf16 %v2596_v44, %v2595_v41  ;;  %v4963_v53 = vpop.f32.mrb[10].mxu1  ;;  %v5090_v54 = vpop.f32.mrb[120].mxu0  ;;  %1775 = vadd.xlane.f32.xlu0 %v1695_v46  ;;  %v6486_v62 = vadd.f32 %v6426_v56, %v1420_v49 }
 0x274   :  { %8661 = vst [vmem:[#allocation24_spill] sm:$0xff] %v6475_v48  ;;  %v6480_v55 = vadd.f32 %v4963_v53, %v6426_v56  ;;  %v2437_v57 = vadd.f32 %v5090_v54, %v6385_v51  ;;  %v1423_v58 = vpop.f32.mrb[11].mxu1  ;;  %v2428_v59 = vpop.f32.mrb[121].mxu0  ;;  %1777 = vadd.xlane.f32.xlu1 %v1696_v50  ;;  %v1701_v60 = vmul.f32 %v6475_v48, %v6475_v48 }
 0x275   :  { %8662 = vst [vmem:[#allocation25_spill] sm:$0xff] %v6486_v62  ;;  %v2429_v63 = vadd.f32 %v6385_v51, %v2428_v59  ;;  %v5091_v1 = vpop.f32.mrb[122].mxu0  ;;  %5176 = vmatprep.mubr.bf16.mxu1 %v2651_v52  ;;  %v6490_v3 = vadd.f32 %v6426_v56, %v1423_v58  ;;  %v1699_v13 = vmul.f32 %v6486_v62, %v6486_v62 }
 0x276   :  { %v2601_v16 = vmax.f32 %v2437_v57, 0.0  ;;  %v2440_v4 = vadd.f32 %v5091_v1, %v6385_v51  ;;  %v2431_v5 = vpop.f32.mrb[123].mxu0  ;;  %5177 = vmatmul.mubr.bf16.gmra.mrb[116].mxu1 %v2652_v47  ;;  %v1702_v6 = vmul.f32 %v6480_v55, %v6480_v55 }
 0x277   :  { %8663 = vst [vmem:[#allocation26_spill] sm:$0xff] %v6490_v3  ;;  %v2599_v8 = vmax.f32 %v2429_v63, 0.0  ;;  %v2432_v9 = vadd.f32 %v6385_v51, %v2431_v5  ;;  %1787 = vadd.xlane.f32.xlu0 %v1701_v60  ;;  %v1700_v18 = vmul.f32 %v6490_v3, %v6490_v3 }
 0x278   :  { %v2602_v10 = vmax.f32 %v2440_v4, 0.0  ;;  %1789 = vadd.xlane.f32.xlu1 %v1702_v6 }
 0x279   :  { %v2600_v11 = vmax.f32 %v2432_v9, 0.0  ;;  %v4966_v12 = vpop.f32.mrb[12].mxu1 }
 0x27a   :  { %v2654_v14 = vpack.c.bf16 %v2602_v10, %v2601_v16  ;;  %v6499_v15 = vadd.f32 %v4966_v12, %v6426_v56  ;;  %v1436_v17 = vpop.f32.mrb[13].mxu1 }
 0x27b   :  { %v2653_v19 = vpack.c.bf16 %v2600_v11, %v2599_v8  ;;  %v4967_v20 = vpop.f32.mrb[14].mxu1  ;;  %v5094_v21 = vpop.f32.mrb[124].mxu0  ;;  %1783 = vadd.xlane.f32.xlu0 %v1699_v13  ;;  %v6510_v29 = vadd.f32 %v6426_v56, %v1436_v17 }
 0x27c   :  { %8664 = vst [vmem:[#allocation27_spill] sm:$0xff] %v6499_v15  ;;  %v6504_v22 = vadd.f32 %v4967_v20, %v6426_v56  ;;  %v2453_v24 = vadd.f32 %v5094_v21, %v6385_v51  ;;  %v1439_v25 = vpop.f32.mrb[15].mxu1  ;;  %v2444_v26 = vpop.f32.mrb[125].mxu0  ;;  %1785 = vadd.xlane.f32.xlu1 %v1700_v18  ;;  %v1705_v27 = vmul.f32 %v6499_v15, %v6499_v15 }
 0x27d   :  { %8666 = vst [vmem:[#allocation29_spill] sm:$0xff] %v6510_v29  ;;  %v2445_v30 = vadd.f32 %v6385_v51, %v2444_v26  ;;  %v5095_v31 = vpop.f32.mrb[126].mxu0  ;;  %5180 = vmatprep.mubr.bf16.mxu1 %v2653_v19  ;;  %v6514_v34 = vadd.f32 %v6426_v56, %v1439_v25  ;;  %v1703_v44 = vmul.f32 %v6510_v29, %v6510_v29 }
 0x27e   :  { %8665 = vst [vmem:[#allocation28_spill] sm:$0xff] %v6504_v22  ;;  %v2605_v32 = vmax.f32 %v2453_v24, 0.0  ;;  %v2456_v35 = vadd.f32 %v5095_v31, %v6385_v51  ;;  %v2447_v36 = vpop.f32.mrb[127].mxu0  ;;  %5181 = vmatmul.mubr.bf16.gmra.mrb[120].mxu1 %v2654_v14  ;;  %v1706_v38 = vmul.f32 %v6504_v22, %v6504_v22 }
 0x27f   :  { %8667 = vst [vmem:[#allocation30_spill] sm:$0xff] %v6514_v34  ;;  %v2603_v39 = vmax.f32 %v2445_v30, 0.0  ;;  %v2448_v40 = vadd.f32 %v6385_v51, %v2447_v36  ;;  %1795 = vadd.xlane.f32.xlu0 %v1705_v27  ;;  %v1704_v49 = vmul.f32 %v6514_v34, %v6514_v34 }
 0x280   :  { %v2606_v41 = vmax.f32 %v2456_v35, 0.0  ;;  %1797 = vadd.xlane.f32.xlu1 %v1706_v38 }
 0x281   :  { %v2604_v42 = vmax.f32 %v2448_v40, 0.0  ;;  %v4970_v43 = vpop.f32.mrb[16].mxu1 }
 0x282   :  { %v2656_v45 = vpack.c.bf16 %v2606_v41, %v2605_v32  ;;  %v6523_v46 = vadd.f32 %v4970_v43, %v6426_v56  ;;  %v1452_v47 = vpop.f32.mrb[17].mxu1 }
 0x283   :  { %v2655_v50 = vpack.c.bf16 %v2604_v42, %v2603_v39  ;;  %v4971_v52 = vpop.f32.mrb[18].mxu1  ;;  %v5098_v53 = vpop.f32.mrb[128].mxu0  ;;  %1791 = vadd.xlane.f32.xlu0 %v1703_v44  ;;  %v6534_v63 = vadd.f32 %v6426_v56, %v1452_v47 }
 0x284   :  { %8668 = vst [vmem:[#allocation31_spill] sm:$0xff] %v6523_v46  ;;  %v6528_v54 = vadd.f32 %v4971_v52, %v6426_v56  ;;  %v2469_v57 = vadd.f32 %v5098_v53, %v6385_v51  ;;  %v1455_v58 = vpop.f32.mrb[19].mxu1  ;;  %v2460_v59 = vpop.f32.mrb[129].mxu0  ;;  %1793 = vadd.xlane.f32.xlu1 %v1704_v49  ;;  %v1709_v60 = vmul.f32 %v6523_v46, %v6523_v46 }
 0x285   :  { %8670 = vst [vmem:[#allocation33_spill] sm:$0xff] %v6534_v63  ;;  %v2461_v1 = vadd.f32 %v6385_v51, %v2460_v59  ;;  %v5099_v16 = vpop.f32.mrb[130].mxu0  ;;  %5184 = vmatprep.mubr.bf16.mxu1 %v2655_v50  ;;  %v6538_v5 = vadd.f32 %v6426_v56, %v1455_v58  ;;  %v1707_v17 = vmul.f32 %v6534_v63, %v6534_v63 }
 0x286   :  { %8669 = vst [vmem:[#allocation32_spill] sm:$0xff] %v6528_v54  ;;  %v2609_v4 = vmax.f32 %v2469_v57, 0.0  ;;  %v2472_v6 = vadd.f32 %v5099_v16, %v6385_v51  ;;  %v2463_v8 = vpop.f32.mrb[131].mxu0  ;;  %5185 = vmatmul.mubr.bf16.gmra.mrb[124].mxu1 %v2656_v45  ;;  %v1710_v9 = vmul.f32 %v6528_v54, %v6528_v54 }
 0x287   :  { %8671 = vst [vmem:[#allocation34_spill] sm:$0xff] %v6538_v5  ;;  %v2607_v10 = vmax.f32 %v2461_v1, 0.0  ;;  %v2464_v11 = vadd.f32 %v6385_v51, %v2463_v8  ;;  %1803 = vadd.xlane.f32.xlu0 %v1709_v60  ;;  %v1708_v21 = vmul.f32 %v6538_v5, %v6538_v5 }
 0x288   :  { %v2610_v12 = vmax.f32 %v2472_v6, 0.0  ;;  %1805 = vadd.xlane.f32.xlu1 %v1710_v9 }
 0x289   :  { %v2608_v13 = vmax.f32 %v2464_v11, 0.0  ;;  %v4974_v14 = vpop.f32.mrb[20].mxu1 }
 0x28a   :  { %v2658_v18 = vpack.c.bf16 %v2610_v12, %v2609_v4  ;;  %v6547_v19 = vadd.f32 %v4974_v14, %v6426_v56  ;;  %v1468_v20 = vpop.f32.mrb[21].mxu1 }
 0x28b   :  { %v2657_v24 = vpack.c.bf16 %v2608_v13, %v2607_v10  ;;  %v4975_v25 = vpop.f32.mrb[22].mxu1  ;;  %v5102_v26 = vpop.f32.mrb[132].mxu0  ;;  %1799 = vadd.xlane.f32.xlu0 %v1707_v17  ;;  %v6558_v36 = vadd.f32 %v6426_v56, %v1468_v20 }
 0x28c   :  { %8672 = vst [vmem:[#allocation35_spill] sm:$0xff] %v6547_v19  ;;  %v6552_v27 = vadd.f32 %v4975_v25, %v6426_v56  ;;  %v2485_v30 = vadd.f32 %v5102_v26, %v6385_v51  ;;  %v1471_v31 = vpop.f32.mrb[23].mxu1  ;;  %v2476_v32 = vpop.f32.mrb[133].mxu0  ;;  %1801 = vadd.xlane.f32.xlu1 %v1708_v21  ;;  %v1713_v35 = vmul.f32 %v6547_v19, %v6547_v19 }
 0x28d   :  { %8674 = vst [vmem:[#allocation37_spill] sm:$0xff] %v6558_v36  ;;  %v2477_v38 = vadd.f32 %v6385_v51, %v2476_v32  ;;  %v5103_v39 = vpop.f32.mrb[134].mxu0  ;;  %5188 = vmatprep.mubr.bf16.mxu1 %v2657_v24  ;;  %v6562_v41 = vadd.f32 %v6426_v56, %v1471_v31  ;;  %v1711_v53 = vmul.f32 %v6558_v36, %v6558_v36 }
 0x28e   :  { %8673 = vst [vmem:[#allocation36_spill] sm:$0xff] %v6552_v27  ;;  %v2613_v40 = vmax.f32 %v2485_v30, 0.0  ;;  %v2488_v42 = vadd.f32 %v5103_v39, %v6385_v51  ;;  %v2479_v43 = vpop.f32.mrb[135].mxu0  ;;  %5189 = vmatmul.mubr.bf16.gmra.mrb[128].mxu1 %v2658_v18  ;;  %v1714_v44 = vmul.f32 %v6552_v27, %v6552_v27 }
 0x28f   :  { %8675 = vst [vmem:[#allocation38_spill] sm:$0xff] %v6562_v41  ;;  %v2611_v45 = vmax.f32 %v2477_v38, 0.0  ;;  %v2480_v47 = vadd.f32 %v6385_v51, %v2479_v43  ;;  %1811 = vadd.xlane.f32.xlu0 %v1713_v35  ;;  %v1712_v60 = vmul.f32 %v6562_v41, %v6562_v41 }
 0x290   :  { %v2614_v49 = vmax.f32 %v2488_v42, 0.0  ;;  %1813 = vadd.xlane.f32.xlu1 %v1714_v44 }
 0x291   :  { %v2612_v50 = vmax.f32 %v2480_v47, 0.0  ;;  %v4978_v52 = vpop.f32.mrb[24].mxu1 }
 0x292   :  { %v2660_v57 = vpack.c.bf16 %v2614_v49, %v2613_v40  ;;  %v6571_v58 = vadd.f32 %v4978_v52, %v6426_v56  ;;  %v1484_v59 = vpop.f32.mrb[25].mxu1 }
 0x293   :  { %v2659_v1 = vpack.c.bf16 %v2612_v50, %v2611_v45  ;;  %v4979_v16 = vpop.f32.mrb[26].mxu1  ;;  %v5106_v4 = vpop.f32.mrb[136].mxu0  ;;  %1807 = vadd.xlane.f32.xlu0 %v1711_v53  ;;  %v6582_v12 = vadd.f32 %v6426_v56, %v1484_v59 }
 0x294   :  { %8676 = vst [vmem:[#allocation39_spill] sm:$0xff] %v6571_v58  ;;  %v6576_v6 = vadd.f32 %v4979_v16, %v6426_v56  ;;  %v2501_v8 = vadd.f32 %v5106_v4, %v6385_v51  ;;  %v1487_v9 = vpop.f32.mrb[27].mxu1  ;;  %v2492_v10 = vpop.f32.mrb[137].mxu0  ;;  %1809 = vadd.xlane.f32.xlu1 %v1712_v60  ;;  %v1717_v11 = vmul.f32 %v6571_v58, %v6571_v58 }
 0x295   :  { %8678 = vst [vmem:[#allocation41_spill] sm:$0xff] %v6582_v12  ;;  %v2493_v13 = vadd.f32 %v6385_v51, %v2492_v10  ;;  %v5107_v14 = vpop.f32.mrb[138].mxu0  ;;  %5192 = vmatprep.mubr.bf16.mxu1 %v2659_v1  ;;  %v6586_v18 = vadd.f32 %v6426_v56, %v1487_v9  ;;  %v1715_v35 = vmul.f32 %v6582_v12, %v6582_v12 }
 0x296   :  { %8677 = vst [vmem:[#allocation40_spill] sm:$0xff] %v6576_v6  ;;  %v2617_v17 = vmax.f32 %v2501_v8, 0.0  ;;  %v2504_v20 = vadd.f32 %v5107_v14, %v6385_v51  ;;  %v2495_v21 = vpop.f32.mrb[139].mxu0  ;;  %5193 = vmatmul.mubr.bf16.gmra.mrb[132].mxu1 %v2660_v57  ;;  %v1718_v24 = vmul.f32 %v6576_v6, %v6576_v6 }
 0x297   :  { %8679 = vst [vmem:[#allocation42_spill] sm:$0xff] %v6586_v18  ;;  %v2615_v25 = vmax.f32 %v2493_v13, 0.0  ;;  %v2496_v26 = vadd.f32 %v6385_v51, %v2495_v21  ;;  %1819 = vadd.xlane.f32.xlu0 %v1717_v11  ;;  %v1716_v42 = vmul.f32 %v6586_v18, %v6586_v18 }
 0x298   :  { %v2618_v30 = vmax.f32 %v2504_v20, 0.0  ;;  %1821 = vadd.xlane.f32.xlu1 %v1718_v24 }
 0x299   :  { %v2616_v31 = vmax.f32 %v2496_v26, 0.0  ;;  %v4982_v32 = vpop.f32.mrb[28].mxu1 }
 0x29a   :  { %v2662_v38 = vpack.c.bf16 %v2618_v30, %v2617_v17  ;;  %v6595_v39 = vadd.f32 %v4982_v32, %v6426_v56  ;;  %v1500_v40 = vpop.f32.mrb[29].mxu1 }
 0x29b   :  { %v2661_v43 = vpack.c.bf16 %v2616_v31, %v2615_v25  ;;  %v4983_v44 = vpop.f32.mrb[30].mxu1  ;;  %v5110_v45 = vpop.f32.mrb[140].mxu0  ;;  %1815 = vadd.xlane.f32.xlu0 %v1715_v35  ;;  %v6606_v57 = vadd.f32 %v6426_v56, %v1500_v40 }
 0x29c   :  { %8680 = vst [vmem:[#allocation43_spill] sm:$0xff] %v6595_v39  ;;  %v6600_v47 = vadd.f32 %v4983_v44, %v6426_v56  ;;  %v2517_v49 = vadd.f32 %v5110_v45, %v6385_v51  ;;  %v1503_v50 = vpop.f32.mrb[31].mxu1  ;;  %v2508_v52 = vpop.f32.mrb[141].mxu0  ;;  %1817 = vadd.xlane.f32.xlu1 %v1716_v42  ;;  %v1721_v53 = vmul.f32 %v6595_v39, %v6595_v39 }
 0x29d   :  { %8682 = vst [vmem:[#allocation45_spill] sm:$0xff] %v6606_v57  ;;  %v2509_v59 = vadd.f32 %v6385_v51, %v2508_v52  ;;  %v5111_v60 = vpop.f32.mrb[142].mxu0  ;;  %5196 = vmatprep.mubr.bf16.mxu1 %v2661_v43  ;;  %v6610_v16 = vadd.f32 %v6426_v56, %v1503_v50  ;;  %v1719_v20 = vmul.f32 %v6606_v57, %v6606_v57 }
 0x29e   :  { %8681 = vst [vmem:[#allocation44_spill] sm:$0xff] %v6600_v47  ;;  %v2621_v1 = vmax.f32 %v2517_v49, 0.0  ;;  %v2520_v4 = vadd.f32 %v5111_v60, %v6385_v51  ;;  %v2511_v8 = vpop.f32.mrb[143].mxu0  ;;  %5197 = vmatmul.mubr.bf16.gmra.mrb[136].mxu1 %v2662_v38  ;;  %v1722_v9 = vmul.f32 %v6600_v47, %v6600_v47 }
 0x29f   :  { %8683 = vst [vmem:[#allocation46_spill] sm:$0xff] %v6610_v16  ;;  %v2619_v10 = vmax.f32 %v2509_v59, 0.0  ;;  %v2512_v11 = vadd.f32 %v6385_v51, %v2511_v8  ;;  %1827 = vadd.xlane.f32.xlu0 %v1721_v53  ;;  %v1720_v26 = vmul.f32 %v6610_v16, %v6610_v16 }
 0x2a0   :  { %v2622_v13 = vmax.f32 %v2520_v4, 0.0  ;;  %1829 = vadd.xlane.f32.xlu1 %v1722_v9 }
 0x2a1   :  { %v2620_v14 = vmax.f32 %v2512_v11, 0.0  ;;  %v4986_v17 = vpop.f32.mrb[32].mxu1 }
 0x2a2   :  { %v2664_v21 = vpack.c.bf16 %v2622_v13, %v2621_v1  ;;  %v6619_v24 = vadd.f32 %v4986_v17, %v6426_v56  ;;  %v1516_v25 = vpop.f32.mrb[33].mxu1 }
 0x2a3   :  { %v2663_v30 = vpack.c.bf16 %v2620_v14, %v2619_v10  ;;  %v4987_v31 = vpop.f32.mrb[34].mxu1  ;;  %v5114_v32 = vpop.f32.mrb[144].mxu0  ;;  %1823 = vadd.xlane.f32.xlu0 %v1719_v20  ;;  %v6630_v44 = vadd.f32 %v6426_v56, %v1516_v25 }
 0x2a4   :  { %8684 = vst [vmem:[#allocation47_spill] sm:$0xff] %v6619_v24  ;;  %v6624_v35 = vadd.f32 %v4987_v31, %v6426_v56  ;;  %v2533_v38 = vadd.f32 %v5114_v32, %v6385_v51  ;;  %v1519_v40 = vpop.f32.mrb[35].mxu1  ;;  %v2524_v42 = vpop.f32.mrb[145].mxu0  ;;  %1825 = vadd.xlane.f32.xlu1 %v1720_v26  ;;  %v1725_v43 = vmul.f32 %v6619_v24, %v6619_v24 }
 0x2a5   :  { %8686 = vst [vmem:[#allocation49_spill] sm:$0xff] %v6630_v44  ;;  %v2525_v45 = vadd.f32 %v6385_v51, %v2524_v42  ;;  %v5115_v49 = vpop.f32.mrb[146].mxu0  ;;  %5200 = vmatprep.mubr.bf16.mxu1 %v2663_v30  ;;  %v6634_v52 = vadd.f32 %v6426_v56, %v1519_v40  ;;  %v1723_v11 = vmul.f32 %v6630_v44, %v6630_v44 }
 0x2a6   :  { %8685 = vst [vmem:[#allocation48_spill] sm:$0xff] %v6624_v35  ;;  %v2625_v50 = vmax.f32 %v2533_v38, 0.0  ;;  %v2536_v53 = vadd.f32 %v5115_v49, %v6385_v51  ;;  %v2527_v59 = vpop.f32.mrb[147].mxu0  ;;  %5201 = vmatmul.mubr.bf16.gmra.mrb[140].mxu1 %v2664_v21  ;;  %v1726_v60 = vmul.f32 %v6624_v35, %v6624_v35 }
 0x2a7   :  { %8687 = vst [vmem:[#allocation50_spill] sm:$0xff] %v6634_v52  ;;  %v2623_v1 = vmax.f32 %v2525_v45, 0.0  ;;  %v2528_v4 = vadd.f32 %v6385_v51, %v2527_v59  ;;  %1835 = vadd.xlane.f32.xlu0 %v1725_v43  ;;  %v1724_v20 = vmul.f32 %v6634_v52, %v6634_v52 }
 0x2a8   :  { %v2626_v8 = vmax.f32 %v2536_v53, 0.0  ;;  %1837 = vadd.xlane.f32.xlu1 %v1726_v60 }
 0x2a9   :  { %v2624_v9 = vmax.f32 %v2528_v4, 0.0  ;;  %v4990_v10 = vpop.f32.mrb[36].mxu1 }
 0x2aa   :  { %v2666_v13 = vpack.c.bf16 %v2626_v8, %v2625_v50  ;;  %v6643_v14 = vadd.f32 %v4990_v10, %v6426_v56  ;;  %v1532_v17 = vpop.f32.mrb[37].mxu1 }
 0x2ab   :  { %v2665_v21 = vpack.c.bf16 %v2624_v9, %v2623_v1  ;;  %v4991_v25 = vpop.f32.mrb[38].mxu1  ;;  %v5118_v26 = vpop.f32.mrb[148].mxu0  ;;  %1831 = vadd.xlane.f32.xlu0 %v1723_v11  ;;  %v6654_v42 = vadd.f32 %v6426_v56, %v1532_v17 }
 0x2ac   :  { %v6648_v30 = vadd.f32 %v4991_v25, %v6426_v56  ;;  %v2549_v31 = vadd.f32 %v5118_v26, %v6385_v51  ;;  %v1535_v32 = vpop.f32.mrb[39].mxu1  ;;  %v2540_v38 = vpop.f32.mrb[149].mxu0  ;;  %1833 = vadd.xlane.f32.xlu1 %v1724_v20  ;;  %v1729_v40 = vmul.f32 %v6643_v14, %v6643_v14 }
 0x2ad   :  { %8688 = vst [vmem:[#allocation51_spill] sm:$0xff] %v6654_v42  ;;  %v2541_v43 = vadd.f32 %v6385_v51, %v2540_v38  ;;  %v5119_v45 = vpop.f32.mrb[150].mxu0  ;;  %5204 = vmatprep.mubr.bf16.mxu1 %v2665_v21  ;;  %v6658_v50 = vadd.f32 %v6426_v56, %v1535_v32  ;;  %v1727_v11 = vmul.f32 %v6654_v42, %v6654_v42 }
 0x2ae   :  { %v2629_v49 = vmax.f32 %v2549_v31, 0.0  ;;  %v2552_v53 = vadd.f32 %v5119_v45, %v6385_v51  ;;  %v2543_v59 = vpop.f32.mrb[151].mxu0  ;;  %5205 = vmatmul.mubr.bf16.gmra.mrb[144].mxu1 %v2666_v13  ;;  %v1730_v60 = vmul.f32 %v6648_v30, %v6648_v30 }
 0x2af   :  { %8689 = vst [vmem:[#allocation52_spill] sm:$0xff] %v6658_v50  ;;  %v2627_v1 = vmax.f32 %v2541_v43, 0.0  ;;  %v2544_v4 = vadd.f32 %v6385_v51, %v2543_v59  ;;  %1843 = vadd.xlane.f32.xlu0 %v1729_v40  ;;  %v1728_v13 = vmul.f32 %v6658_v50, %v6658_v50 }
 0x2b0   :  { %v2630_v8 = vmax.f32 %v2552_v53, 0.0  ;;  %1845 = vadd.xlane.f32.xlu1 %v1730_v60 }
 0x2b1   :  { %v2628_v9 = vmax.f32 %v2544_v4, 0.0  ;;  %v4994_v10 = vpop.f32.mrb[40].mxu1 }
 0x2b2   :  { %v2668_v17 = vpack.c.bf16 %v2630_v8, %v2629_v49  ;;  %v6667_v20 = vadd.f32 %v4994_v10, %v6426_v56  ;;  %v1548_v21 = vpop.f32.mrb[41].mxu1 }
 0x2b3   :  { %v2667_v25 = vpack.c.bf16 %v2628_v9, %v2627_v1  ;;  %v4995_v26 = vpop.f32.mrb[42].mxu1  ;;  %1839 = vadd.xlane.f32.xlu0 %v1727_v11  ;;  %v6677_v38 = vadd.f32 %v6426_v56, %v1548_v21 }
 0x2b4   :  { %8690 = vst [vmem:[#allocation53_spill] sm:$0xff] %v6667_v20  ;;  %v6672_v51 = vadd.f32 %v4995_v26, %v6426_v56  ;;  %v1551_v31 = vpop.f32.mrb[43].mxu1  ;;  %1841 = vadd.xlane.f32.xlu1 %v1728_v13  ;;  %v1733_v32 = vmul.f32 %v6667_v20, %v6667_v20 }
 0x2b5   :  { %5208 = vmatprep.mubr.bf16.mxu1 %v2667_v25  ;;  %v6680_v40 = vadd.f32 %v6426_v56, %v1551_v31  ;;  %v1731_v49 = vmul.f32 %v6677_v38, %v6677_v38 }
 0x2b6   :  { %8691 = vst [vmem:[#allocation54_spill] sm:$0xff] %v6672_v51  ;;  %5209 = vmatmul.mubr.bf16.gmra.mrb[148].mxu1 %v2668_v17  ;;  %v1734_v43 = vmul.f32 %v6672_v51, %v6672_v51 }
 0x2b7   :  { %1851 = vadd.xlane.f32.xlu0 %v1733_v32  ;;  %v1732_v60 = vmul.f32 %v6680_v40, %v6680_v40 }
 0x2b8   :  { %1853 = vadd.xlane.f32.xlu1 %v1734_v43 }
 0x2b9   :  { %v4998_v45 = vpop.f32.mrb[44].mxu1 }
 0x2ba   :  { %v6687_v53 = vadd.f32 %v4998_v45, %v6426_v56  ;;  %v1564_v59 = vpop.f32.mrb[45].mxu1 }
 0x2bb   :  { %v4999_v1 = vpop.f32.mrb[46].mxu1  ;;  %1847 = vadd.xlane.f32.xlu0 %v1731_v49  ;;  %v6697_v10 = vadd.f32 %v6426_v56, %v1564_v59 }
 0x2bc   :  { %8692 = vst [vmem:[#allocation55_spill] sm:$0xff] %v6687_v53  ;;  %v6692_v4 = vadd.f32 %v4999_v1, %v6426_v56  ;;  %v1567_v8 = vpop.f32.mrb[47].mxu1  ;;  %1849 = vadd.xlane.f32.xlu1 %v1732_v60  ;;  %v1737_v9 = vmul.f32 %v6687_v53, %v6687_v53 }
 0x2bd   :  { %v6700_v11 = vadd.f32 %v6426_v56, %v1567_v8  ;;  %v1735_v13 = vmul.f32 %v6697_v10, %v6697_v10 }
 0x2be   :  { %8693 = vst [vmem:[#allocation56_spill] sm:$0xff] %v6692_v4  ;;  %v1738_v17 = vmul.f32 %v6692_v4, %v6692_v4 }
 0x2bf   :  { %8694 = vst [vmem:[#allocation57_spill] sm:$0xff] %v6700_v11  ;;  %1859 = vadd.xlane.f32.xlu0 %v1737_v9  ;;  %v1736_v31 = vmul.f32 %v6700_v11, %v6700_v11 }
 0x2c0   :  { %1861 = vadd.xlane.f32.xlu1 %v1738_v17 }
 0x2c1   :  { %v5002_v21 = vpop.f32.mrb[48].mxu1 }
 0x2c2   :  { %v6707_v25 = vadd.f32 %v5002_v21, %v6426_v56  ;;  %v1580_v26 = vpop.f32.mrb[49].mxu1 }
 0x2c3   :  { %v5003_v32 = vpop.f32.mrb[50].mxu1  ;;  %1855 = vadd.xlane.f32.xlu0 %v1735_v13  ;;  %v6717_v59 = vadd.f32 %v6426_v56, %v1580_v26 }
 0x2c4   :  { %8695 = vst [vmem:[#allocation58_spill] sm:$0xff] %v6707_v25  ;;  %v6712_v43 = vadd.f32 %v5003_v32, %v6426_v56  ;;  %v1583_v45 = vpop.f32.mrb[51].mxu1  ;;  %1857 = vadd.xlane.f32.xlu1 %v1736_v31  ;;  %v1741_v49 = vmul.f32 %v6707_v25, %v6707_v25 }
 0x2c5   :  { %8697 = vst [vmem:[#allocation60_spill] sm:$0xff] %v6717_v59  ;;  %v6720_v60 = vadd.f32 %v6426_v56, %v1583_v45  ;;  %v1739_v9 = vmul.f32 %v6717_v59, %v6717_v59 }
 0x2c6   :  { %8696 = vst [vmem:[#allocation59_spill] sm:$0xff] %v6712_v43  ;;  %v1742_v1 = vmul.f32 %v6712_v43, %v6712_v43 }
 0x2c7   :  { %8698 = vst [vmem:[#allocation61_spill] sm:$0xff] %v6720_v60  ;;  %1867 = vadd.xlane.f32.xlu0 %v1741_v49  ;;  %v1740_v13 = vmul.f32 %v6720_v60, %v6720_v60 }
 0x2c8   :  { %1869 = vadd.xlane.f32.xlu1 %v1742_v1 }
 0x2c9   :  { %v5006_v8 = vpop.f32.mrb[52].mxu1 }
 0x2ca   :  { %v6727_v17 = vadd.f32 %v5006_v8, %v6426_v56  ;;  %v1596_v21 = vpop.f32.mrb[53].mxu1 }
 0x2cb   :  { %v5007_v26 = vpop.f32.mrb[54].mxu1  ;;  %1863 = vadd.xlane.f32.xlu0 %v1739_v9  ;;  %v6737_v49 = vadd.f32 %v6426_v56, %v1596_v21 }
 0x2cc   :  { %8699 = vst [vmem:[#allocation62_spill] sm:$0xff] %v6727_v17  ;;  %v6732_v31 = vadd.f32 %v5007_v26, %v6426_v56  ;;  %v1599_v32 = vpop.f32.mrb[55].mxu1  ;;  %1865 = vadd.xlane.f32.xlu1 %v1740_v13  ;;  %v1745_v45 = vmul.f32 %v6727_v17, %v6727_v17 }
 0x2cd   :  { %8701 = vst [vmem:[#allocation64_spill] sm:$0xff] %v6737_v49  ;;  %v6740_v1 = vadd.f32 %v6426_v56, %v1599_v32  ;;  %v1743_v26 = vmul.f32 %v6737_v49, %v6737_v49 }
 0x2ce   :  { %8700 = vst [vmem:[#allocation63_spill] sm:$0xff] %v6732_v31  ;;  %v1746_v8 = vmul.f32 %v6732_v31, %v6732_v31 }
 0x2cf   :  { %8702 = vst [vmem:[#allocation65_spill] sm:$0xff] %v6740_v1  ;;  %1875 = vadd.xlane.f32.xlu0 %v1745_v45  ;;  %v1744_v21 = vmul.f32 %v6740_v1, %v6740_v1 }
 0x2d0   :  { %1877 = vadd.xlane.f32.xlu1 %v1746_v8 }
 0x2d1   :  { %v5010_v9 = vpop.f32.mrb[56].mxu1 }
 0x2d2   :  { %v6747_v13 = vadd.f32 %v5010_v9, %v6426_v56  ;;  %v1612_v52 = vpop.f32.mrb[57].mxu1 }
 0x2d3   :  { %v5011_v47 = vpop.f32.mrb[58].mxu1  ;;  %1871 = vadd.xlane.f32.xlu0 %v1743_v26  ;;  %v6757_v8 = vadd.f32 %v6426_v56, %v1612_v52 }
 0x2d4   :  { %8703 = vst [vmem:[#allocation66_spill] sm:$0xff] %v6747_v13  ;;  %v6752_v32 = vadd.f32 %v5011_v47, %v6426_v56  ;;  %v1615_v16 = vpop.f32.mrb[59].mxu1  ;;  %1873 = vadd.xlane.f32.xlu1 %v1744_v21  ;;  %v1749_v45 = vmul.f32 %v6747_v13, %v6747_v13 }
 0x2d5   :  { %8705 = vst [vmem:[#allocation68_spill] sm:$0xff] %v6757_v8  ;;  %v6760_v9 = vadd.f32 %v6426_v56, %v1615_v16  ;;  %v1747_v47 = vmul.f32 %v6757_v8, %v6757_v8 }
 0x2d6   :  { %8704 = vst [vmem:[#allocation67_spill] sm:$0xff] %v6752_v32  ;;  %v1750_v18 = vmul.f32 %v6752_v32, %v6752_v32 }
 0x2d7   :  { %8706 = vst [vmem:[#allocation69_spill] sm:$0xff] %v6760_v9  ;;  %1883 = vadd.xlane.f32.xlu0 %v1749_v45  ;;  %v1748_v52 = vmul.f32 %v6760_v9, %v6760_v9 }
 0x2d8   :  { %1885 = vadd.xlane.f32.xlu1 %v1750_v18 }
 0x2d9   :  { %v5014_v26 = vpop.f32.mrb[60].mxu1 }
 0x2da   :  { %v6767_v21 = vadd.f32 %v5014_v26, %v6426_v56  ;;  %v1628_v6 = vpop.f32.mrb[61].mxu1 }
 0x2db   :  { %v5015_v42 = vpop.f32.mrb[62].mxu1  ;;  %1879 = vadd.xlane.f32.xlu0 %v1747_v47  ;;  %v6777_v45 = vadd.f32 %v6426_v56, %v1628_v6 }
 0x2dc   :  { %8707 = vst [vmem:[#allocation70_spill] sm:$0xff] %v6767_v21  ;;  %v6772_v16 = vadd.f32 %v5015_v42, %v6426_v56  ;;  %v1631_v41 = vpop.f32.mrb[63].mxu1  ;;  %1881 = vadd.xlane.f32.xlu1 %v1748_v52  ;;  %v1753_v18 = vmul.f32 %v6767_v21, %v6767_v21 }
 0x2dd   :  { %8709 = vst [vmem:[#allocation72_spill] sm:$0xff] %v6777_v45  ;;  %v6780_v26 = vadd.f32 %v6426_v56, %v1631_v41  ;;  %v1751_v42 = vmul.f32 %v6777_v45, %v6777_v45 }
 0x2de   :  { %8708 = vst [vmem:[#allocation71_spill] sm:$0xff] %v6772_v16  ;;  %v1754_v24 = vmul.f32 %v6772_v16, %v6772_v16 }
 0x2df   :  { %8710 = vst [vmem:[#allocation73_spill] sm:$0xff] %v6780_v26  ;;  %1891 = vadd.xlane.f32.xlu0 %v1753_v18  ;;  %v1752_v6 = vmul.f32 %v6780_v26, %v6780_v26 }
 0x2e0   :  { %1893 = vadd.xlane.f32.xlu1 %v1754_v24 }
 0x2e1   :  { %v5018_v47 = vpop.f32.mrb[64].mxu1 }
 0x2e2   :  { %v6787_v52 = vadd.f32 %v5018_v47, %v6426_v56  ;;  %v1644_v27 = vpop.f32.mrb[65].mxu1 }
 0x2e3   :  { %v5019_v21 = vpop.f32.mrb[66].mxu1  ;;  %1887 = vadd.xlane.f32.xlu0 %v1751_v42  ;;  %v6797_v18 = vadd.f32 %v6426_v56, %v1644_v27 }
 0x2e4   :  { %8711 = vst [vmem:[#allocation74_spill] sm:$0xff] %v6787_v52  ;;  %v6792_v41 = vadd.f32 %v5019_v21, %v6426_v56  ;;  %v1647_v13 = vpop.f32.mrb[67].mxu1  ;;  %1889 = vadd.xlane.f32.xlu1 %v1752_v6  ;;  %v1757_v24 = vmul.f32 %v6787_v52, %v6787_v52 }
 0x2e5   :  { %8713 = vst [vmem:[#allocation76_spill] sm:$0xff] %v6797_v18  ;;  %v6800_v47 = vadd.f32 %v6426_v56, %v1647_v13  ;;  %v1755_v21 = vmul.f32 %v6797_v18, %v6797_v18 }
 0x2e6   :  { %8712 = vst [vmem:[#allocation75_spill] sm:$0xff] %v6792_v41  ;;  %v1758_v44 = vmul.f32 %v6792_v41, %v6792_v41 }
 0x2e7   :  { %8714 = vst [vmem:[#allocation77_spill] sm:$0xff] %v6800_v47  ;;  %1899 = vadd.xlane.f32.xlu0 %v1757_v24  ;;  %v1756_v27 = vmul.f32 %v6800_v47, %v6800_v47 }
 0x2e8   :  { %1901 = vadd.xlane.f32.xlu1 %v1758_v44 }
 0x2e9   :  { %v5022_v42 = vpop.f32.mrb[68].mxu1 }
 0x2ea   :  { %v6807_v6 = vadd.f32 %v5022_v42, %v6426_v56  ;;  %v1660_v45 = vpop.f32.mrb[69].mxu1 }
 0x2eb   :  { %v5023_v52 = vpop.f32.mrb[70].mxu1  ;;  %1895 = vadd.xlane.f32.xlu0 %v1755_v21  ;;  %v6817_v24 = vadd.f32 %v6426_v56, %v1660_v45 }
 0x2ec   :  { %8715 = vst [vmem:[#allocation78_spill] sm:$0xff] %v6807_v6  ;;  %v6812_v13 = vadd.f32 %v5023_v52, %v6426_v56  ;;  %v1663_v54 = vpop.f32.mrb[71].mxu1  ;;  %1897 = vadd.xlane.f32.xlu1 %v1756_v27  ;;  %v1761_v44 = vmul.f32 %v6807_v6, %v6807_v6 }
 0x2ed   :  { %8717 = vst [vmem:[#allocation80_spill] sm:$0xff] %v6817_v24  ;;  %v6820_v42 = vadd.f32 %v6426_v56, %v1663_v54  ;;  %v1759_v52 = vmul.f32 %v6817_v24, %v6817_v24 }
 0x2ee   :  { %8716 = vst [vmem:[#allocation79_spill] sm:$0xff] %v6812_v13  ;;  %v1762_v18 = vmul.f32 %v6812_v13, %v6812_v13 }
 0x2ef   :  { %8718 = vst [vmem:[#allocation81_spill] sm:$0xff] %v6820_v42  ;;  %1907 = vadd.xlane.f32.xlu0 %v1761_v44  ;;  %v1760_v45 = vmul.f32 %v6820_v42, %v6820_v42 }
 0x2f0   :  { %1909 = vadd.xlane.f32.xlu1 %v1762_v18 }
 0x2f1   :  { %v5026_v21 = vpop.f32.mrb[72].mxu1 }
 0x2f2   :  { %v6827_v27 = vadd.f32 %v5026_v21, %v6426_v56  ;;  %v1676_v17 = vpop.f32.mrb[73].mxu1 }
 0x2f3   :  { %v6831_v6 = vpop.xlane.xlu1 %1771  ;;  %v5027_v54 = vpop.f32.mrb[74].mxu1  ;;  %1903 = vadd.xlane.f32.xlu0 %v1759_v52  ;;  %v6841_v21 = vadd.f32 %v6426_v56, %v1676_v17  ;;  %v6851_v52 = vld [vmem:[%s8503_s11] ss:$0 sm:$0xff]  ;;  %s6083_s11 = smov [#allocation16]  }
 0x2f4   :  { %8719 = vst [vmem:[#allocation82_spill] sm:$0xff] %v6827_v27  ;;  %v6834_v41 = vadd.f32 %v5027_v54, %v6426_v56  ;;  %v1679_v44 = vpop.f32.mrb[75].mxu1  ;;  %1905 = vadd.xlane.f32.xlu1 %v1760_v45  ;;  %v6836_v18 = vpop.xlane.xlu0 %1767  ;;  %v1765_v13 = vmul.f32 %v6827_v27, %v6827_v27  ;;  %s4535_s26 = sshll.u32 %s6083_s11, 4  ;;  %s4536_s26 = int_to_ptr.vmem [resolvable:$true] %s4535_s26 }
 0x2f5   :  { %8721 = vst [vmem:[#allocation84_spill] sm:$0xff] %v6841_v21  ;;  %v6844_v63 = vadd.f32 %v6426_v56, %v1679_v44  ;;  %v1763_v17 = vmul.f32 %v6841_v21, %v6841_v21  ;;  %s6039_s27 = scalar_lea.vmem %s4536_s26, 16  ;;  %s6043_s28 = scalar_lea.vmem %s4536_s26, 32 }
 0x2f6   :  { %8720 = vst [vmem:[#allocation83_spill] sm:$0xff] %v6834_v41  ;;  %v1766_v42 = vmul.f32 %v6834_v41, %v6834_v41  ;;  %p6040_p8 = scmp.ne.s32.totalorder %s4536_s26, %s6039_s27  ;;  %p6044_p9 = scmp.lt.s32.totalorder %s4536_s26, %s4536_s26 }
 0x2f7   :  { %8722 = vst [vmem:[#allocation85_spill] sm:$0xff] %v6844_v63  ;;  %1915 = vadd.xlane.f32.xlu0 %v1765_v13  ;;  %v6855_v54 = vpop.xlane.xlu1 %1773  ;;  %v1764_v13 = vmul.f32 %v6844_v63, %v6844_v63  ;;  %p6045_p10 = scmp.lt.s32.totalorder %s6043_s28, %s6039_s27 }
 0x2f8   :  { %1917 = vadd.xlane.f32.xlu1 %v1766_v42  ;;  %v6853_v45 = vpop.xlane.xlu0 %1769 }
 0x2f9   :  { %v5138_v57 = vpop.f32.mrb[76].mxu1  ;;  %p6046_p11 = por %p6045_p10, %p6044_p9 }
 0x2fa   :  { %v6860_v56 = vadd.f32 %v5138_v57, %v6851_v52  ;;  %v2774_v44 = vpop.f32.mrb[77].mxu1 }
 0x2fb   :  { %v5139_v8 = vpop.f32.mrb[78].mxu1  ;;  %1911 = vadd.xlane.f32.xlu0 %v1763_v17  ;;  %v6872_v21 = vadd.f32 %v6851_v52, %v2774_v44  ;;  %p6047_p12 = pnand %p6046_p11, %p6040_p8 }
 0x2fc   :  { %v6865_v39 = vadd.f32 %v5139_v8, %v6851_v52  ;;  %v2777_v42 = vpop.f32.mrb[79].mxu1  ;;  %1913 = vadd.xlane.f32.xlu1 %v1764_v13  ;;  %v6867_v43 = vpop.xlane.xlu0 %1779  ;;  %v3079_v16 = vmul.f32 %v6860_v56, %v6860_v56 }
 0x2fd   :  { %v6874_v57 = vpop.xlane.xlu1 %1781  ;;  %v6877_v1 = vadd.f32 %v6851_v52, %v2777_v42  ;;  %v3077_v25 = vmul.f32 %v6872_v21, %v6872_v21 }
 0x2fe   :  { %v3080_v17 = vmul.f32 %v6865_v39, %v6865_v39 }
 0x2ff   :  { %3157 = vadd.xlane.f32.xlu0 %v3079_v16  ;;  %v3078_v42 = vmul.f32 %v6877_v1, %v6877_v1 }
 0x300   :  { %3159 = vadd.xlane.f32.xlu1 %v3080_v17  ;;  %v6881_v8 = vpop.xlane.xlu0 %1775 }
 0x301   :  { %v5142_v13 = vpop.f32.mrb[80].mxu1  ;;  %v6883_v47 = vpop.xlane.xlu1 %1777 }
 0x302   :  { %v6888_v44 = vadd.f32 %v5142_v13, %v6851_v52  ;;  %v2790_v41 = vpop.f32.mrb[81].mxu1 }
 0x303   :  { %v5143_v27 = vpop.f32.mrb[82].mxu1  ;;  %3153 = vadd.xlane.f32.xlu0 %v3077_v25  ;;  %v6900_v29 = vadd.f32 %v6851_v52, %v2790_v41 }
 0x304   :  { %v6893_v16 = vadd.f32 %v5143_v27, %v6851_v52  ;;  %v2793_v17 = vpop.f32.mrb[83].mxu1  ;;  %3155 = vadd.xlane.f32.xlu1 %v3078_v42  ;;  %v6895_v50 = vpop.xlane.xlu0 %1787  ;;  %v3083_v12 = vmul.f32 %v6888_v44, %v6888_v44 }
 0x305   :  { %8723 = vst [vmem:[#allocation86_spill] sm:$0xff] %v6900_v29  ;;  %v6902_v13 = vpop.xlane.xlu1 %1789  ;;  %v6905_v58 = vadd.f32 %v6851_v52, %v2793_v17  ;;  %v3081_v32 = vmul.f32 %v6900_v29, %v6900_v29 }
 0x306   :  { %v3084_v25 = vmul.f32 %v6893_v16, %v6893_v16 }
 0x307   :  { %3165 = vadd.xlane.f32.xlu0 %v3083_v12  ;;  %v3082_v17 = vmul.f32 %v6905_v58, %v6905_v58 }
 0x308   :  { %3167 = vadd.xlane.f32.xlu1 %v3084_v25  ;;  %v6909_v27 = vpop.xlane.xlu0 %1783 }
 0x309   :  { %v5146_v42 = vpop.f32.mrb[84].mxu1  ;;  %v6911_v49 = vpop.xlane.xlu1 %1785 }
 0x30a   :  { %v6916_v41 = vadd.f32 %v5146_v42, %v6851_v52  ;;  %v2806_v15 = vpop.f32.mrb[85].mxu1 }
 0x30b   :  { %v5147_v63 = vpop.f32.mrb[86].mxu1  ;;  %3161 = vadd.xlane.f32.xlu0 %v3081_v32  ;;  %v6928_v4 = vadd.f32 %v6851_v52, %v2806_v15 }
 0x30c   :  { %8724 = vst [vmem:[#allocation87_spill] sm:$0xff] %v6916_v41  ;;  %v6921_v12 = vadd.f32 %v5147_v63, %v6851_v52  ;;  %v2809_v25 = vpop.f32.mrb[87].mxu1  ;;  %3163 = vadd.xlane.f32.xlu1 %v3082_v17  ;;  %v6923_v26 = vpop.xlane.xlu0 %1795  ;;  %v3087_v35 = vmul.f32 %v6916_v41, %v6916_v41 }
 0x30d   :  { %8725 = vst [vmem:[#allocation88_spill] sm:$0xff] %v6928_v4  ;;  %v6930_v42 = vpop.xlane.xlu1 %1797  ;;  %v6933_v36 = vadd.f32 %v6851_v52, %v2809_v25  ;;  %v3085_v24 = vmul.f32 %v6928_v4, %v6928_v4 }
 0x30e   :  { %v3088_v32 = vmul.f32 %v6921_v12, %v6921_v12 }
 0x30f   :  { %8726 = vst [vmem:[#allocation89_spill] sm:$0xff] %v6933_v36  ;;  %3173 = vadd.xlane.f32.xlu0 %v3087_v35  ;;  %v3086_v25 = vmul.f32 %v6933_v36, %v6933_v36 }
 0x310   :  { %3175 = vadd.xlane.f32.xlu1 %v3088_v32  ;;  %v6937_v63 = vpop.xlane.xlu0 %1791 }
 0x311   :  { %v5150_v17 = vpop.f32.mrb[88].mxu1  ;;  %v6939_v60 = vpop.xlane.xlu1 %1793 }
 0x312   :  { %v6944_v15 = vadd.f32 %v5150_v17, %v6851_v52  ;;  %v2822_v53 = vpop.f32.mrb[89].mxu1 }
 0x313   :  { %v5151_v19 = vpop.f32.mrb[90].mxu1  ;;  %3169 = vadd.xlane.f32.xlu0 %v3085_v24  ;;  %v6956_v4 = vadd.f32 %v6851_v52, %v2822_v53 }
 0x314   :  { %8727 = vst [vmem:[#allocation90_spill] sm:$0xff] %v6944_v15  ;;  %v6949_v35 = vadd.f32 %v5151_v19, %v6851_v52  ;;  %v2825_v32 = vpop.f32.mrb[91].mxu1  ;;  %3171 = vadd.xlane.f32.xlu1 %v3086_v25  ;;  %v6951_v31 = vpop.xlane.xlu0 %1803  ;;  %v3091_v62 = vmul.f32 %v6944_v15, %v6944_v15 }
 0x315   :  { %8729 = vst [vmem:[#allocation92_spill] sm:$0xff] %v6956_v4  ;;  %v6958_v17 = vpop.xlane.xlu1 %1805  ;;  %v6961_v5 = vadd.f32 %v6851_v52, %v2825_v32  ;;  %v3089_v15 = vmul.f32 %v6956_v4, %v6956_v4 }
 0x316   :  { %8728 = vst [vmem:[#allocation91_spill] sm:$0xff] %v6949_v35  ;;  %8730 = vst [vmem:[#allocation93_spill] sm:$0xff] %v6958_v17  ;;  %v3092_v24 = vmul.f32 %v6949_v35, %v6949_v35 }
 0x317   :  { %8731 = vst [vmem:[#allocation94_spill] sm:$0xff] %v6961_v5  ;;  %3181 = vadd.xlane.f32.xlu0 %v3091_v62  ;;  %v3090_v32 = vmul.f32 %v6961_v5, %v6961_v5 }
 0x318   :  { %3183 = vadd.xlane.f32.xlu1 %v3092_v24  ;;  %v6965_v19 = vpop.xlane.xlu0 %1799 }
 0x319   :  { %8732 = vst [vmem:[#allocation95_spill] sm:$0xff] %v6965_v19  ;;  %v5154_v25 = vpop.f32.mrb[92].mxu1  ;;  %v6967_v59 = vpop.xlane.xlu1 %1801 }
 0x31a   :  { %v6972_v53 = vadd.f32 %v5154_v25, %v6851_v52  ;;  %v2838_v17 = vpop.f32.mrb[93].mxu1 }
 0x31b   :  { %v6977_v9 = vadd.f32 %v6851_v52, %v2838_v17  ;;  %v5155_v62 = vpop.f32.mrb[94].mxu1  ;;  %3177 = vadd.xlane.f32.xlu0 %v3089_v15 }
 0x31c   :  { %8733 = vst [vmem:[#allocation96_spill] sm:$0xff] %v6972_v53  ;;  %v6980_v24 = vadd.f32 %v5155_v62, %v6851_v52  ;;  %3179 = vadd.xlane.f32.xlu1 %v3090_v32  ;;  %v6982_v19 = vpop.xlane.xlu0 %1811  ;;  %v2841_v48 = vpop.f32.mrb[95].mxu1  ;;  %v3095_v25 = vmul.f32 %v6972_v53, %v6972_v53 }
 0x31d   :  { %8734 = vst [vmem:[#allocation97_spill] sm:$0xff] %v6977_v9  ;;  %v6986_v4 = vpop.xlane.xlu1 %1813  ;;  %v6989_v41 = vadd.f32 %v6851_v52, %v2841_v48  ;;  %v3093_v15 = vmul.f32 %v6977_v9, %v6977_v9 }
 0x31e   :  { %8735 = vst [vmem:[#allocation98_spill] sm:$0xff] %v6980_v24  ;;  %8736 = vst [vmem:[#allocation99_spill] sm:$0xff] %v6986_v4  ;;  %v3096_v17 = vmul.f32 %v6980_v24, %v6980_v24 }
 0x31f   :  { %8737 = vst [vmem:[#allocation100_spill] sm:$0xff] %v6989_v41  ;;  %3189 = vadd.xlane.f32.xlu0 %v3095_v25  ;;  %v3094_v62 = vmul.f32 %v6989_v41, %v6989_v41 }
 0x320   :  { %3191 = vadd.xlane.f32.xlu1 %v3096_v17  ;;  %v6995_v32 = vpop.xlane.xlu0 %1807 }
 0x321   :  { %v5158_v46 = vpop.f32.mrb[96].mxu1  ;;  %v6999_v51 = vpop.xlane.xlu1 %1809 }
 0x322   :  { %8738 = vst [vmem:[#allocation101_spill] sm:$0xff] %v6999_v51  ;;  %v7002_v4 = vadd.f32 %v5158_v46, %v6851_v52  ;;  %v2854_v48 = vpop.f32.mrb[97].mxu1 }
 0x323   :  { %v7005_v53 = vadd.f32 %v6851_v52, %v2854_v48  ;;  %v5159_v25 = vpop.f32.mrb[98].mxu1  ;;  %3185 = vadd.xlane.f32.xlu0 %v3093_v15 }
 0x324   :  { %8739 = vst [vmem:[#allocation102_spill] sm:$0xff] %v7002_v4  ;;  %v7008_v9 = vadd.f32 %v5159_v25, %v6851_v52  ;;  %3187 = vadd.xlane.f32.xlu1 %v3094_v62  ;;  %v7010_v17 = vpop.xlane.xlu0 %1819  ;;  %v2857_v24 = vpop.f32.mrb[99].mxu1  ;;  %v3099_v41 = vmul.f32 %v7002_v4, %v7002_v4 }
 0x325   :  { %8740 = vst [vmem:[#allocation103_spill] sm:$0xff] %v7005_v53  ;;  %v7014_v51 = vpop.xlane.xlu1 %1821  ;;  %v7017_v46 = vadd.f32 %v6851_v52, %v2857_v24  ;;  %v3097_v15 = vmul.f32 %v7005_v53, %v7005_v53 }
 0x326   :  { %8741 = vst [vmem:[#allocation104_spill] sm:$0xff] %v7008_v9  ;;  %8742 = vst [vmem:[#allocation105_spill] sm:$0xff] %v7014_v51  ;;  %v3100_v48 = vmul.f32 %v7008_v9, %v7008_v9 }
 0x327   :  { %8743 = vst [vmem:[#allocation106_spill] sm:$0xff] %v7017_v46  ;;  %3197 = vadd.xlane.f32.xlu0 %v3099_v41  ;;  %v3098_v62 = vmul.f32 %v7017_v46, %v7017_v46 }
 0x328   :  { %3199 = vadd.xlane.f32.xlu1 %v3100_v48  ;;  %v7025_v25 = vpop.xlane.xlu0 %1815 }
 0x329   :  { %8744 = vst [vmem:[#allocation107_spill] sm:$0xff] %v7025_v25  ;;  %v5162_v11 = vpop.f32.mrb[100].mxu1  ;;  %v7027_v4 = vpop.xlane.xlu1 %1817 }
 0x32a   :  { %8745 = vst [vmem:[#allocation108_spill] sm:$0xff] %v7027_v4  ;;  %v7030_v51 = vadd.f32 %v5162_v11, %v6851_v52  ;;  %v2870_v24 = vpop.f32.mrb[101].mxu1 }
 0x32b   :  { %v7033_v34 = vadd.f32 %v6851_v52, %v2870_v24  ;;  %v5163_v9 = vpop.f32.mrb[102].mxu1  ;;  %3193 = vadd.xlane.f32.xlu0 %v3097_v15 }
 0x32c   :  { %8746 = vst [vmem:[#allocation109_spill] sm:$0xff] %v7030_v51  ;;  %v3103_v41 = vmul.f32 %v7030_v51, %v7030_v51  ;;  %v7038_v46 = vadd.f32 %v5163_v9, %v6851_v52  ;;  %3195 = vadd.xlane.f32.xlu1 %v3098_v62  ;;  %v7040_v48 = vpop.xlane.xlu0 %1827  ;;  %v2873_v53 = vpop.f32.mrb[103].mxu1 }
 0x32d   :  { %8747 = vst [vmem:[#allocation110_spill] sm:$0xff] %v7033_v34  ;;  %8749 = vst [vmem:[#allocation112_spill] sm:$0xff] %v7040_v48  ;;  %v7042_v4 = vpop.xlane.xlu1 %1829  ;;  %v7045_v11 = vadd.f32 %v6851_v52, %v2873_v53  ;;  %v3101_v15 = vmul.f32 %v7033_v34, %v7033_v34 }
 0x32e   :  { %8748 = vst [vmem:[#allocation111_spill] sm:$0xff] %v7038_v46  ;;  %8750 = vst [vmem:[#allocation113_spill] sm:$0xff] %v7042_v4  ;;  %v3104_v24 = vmul.f32 %v7038_v46, %v7038_v46 }
 0x32f   :  { %8751 = vst [vmem:[#allocation114_spill] sm:$0xff] %v7045_v11  ;;  %3205 = vadd.xlane.f32.xlu0 %v3103_v41  ;;  %v3102_v9 = vmul.f32 %v7045_v11, %v7045_v11 }
 0x330   :  { %3207 = vadd.xlane.f32.xlu1 %v3104_v24  ;;  %v7053_v62 = vpop.xlane.xlu0 %1823 }
 0x331   :  { %8752 = vst [vmem:[#allocation115_spill] sm:$0xff] %v7053_v62  ;;  %v5166_v51 = vpop.f32.mrb[104].mxu1  ;;  %v7055_v48 = vpop.xlane.xlu1 %1825 }
 0x332   :  { %8753 = vst [vmem:[#allocation116_spill] sm:$0xff] %v7055_v48  ;;  %v7058_v4 = vadd.f32 %v5166_v51, %v6851_v52  ;;  %v2886_v53 = vpop.f32.mrb[105].mxu1 }
 0x333   :  { %v7061_v5 = vadd.f32 %v6851_v52, %v2886_v53  ;;  %v5167_v46 = vpop.f32.mrb[106].mxu1  ;;  %3201 = vadd.xlane.f32.xlu0 %v3101_v15 }
 0x334   :  { %8754 = vst [vmem:[#allocation117_spill] sm:$0xff] %v7058_v4  ;;  %v3107_v41 = vmul.f32 %v7058_v4, %v7058_v4  ;;  %v7066_v11 = vadd.f32 %v5167_v46, %v6851_v52  ;;  %3203 = vadd.xlane.f32.xlu1 %v3102_v9  ;;  %v7068_v24 = vpop.xlane.xlu0 %1835  ;;  %v2889_v34 = vpop.f32.mrb[107].mxu1 }
 0x335   :  { %8755 = vst [vmem:[#allocation118_spill] sm:$0xff] %v7061_v5  ;;  %8757 = vst [vmem:[#allocation120_spill] sm:$0xff] %v7068_v24  ;;  %v7070_v48 = vpop.xlane.xlu1 %1837  ;;  %v7073_v51 = vadd.f32 %v6851_v52, %v2889_v34  ;;  %v3105_v15 = vmul.f32 %v7061_v5, %v7061_v5 }
 0x336   :  { %8756 = vst [vmem:[#allocation119_spill] sm:$0xff] %v7066_v11  ;;  %8758 = vst [vmem:[#allocation121_spill] sm:$0xff] %v7070_v48  ;;  %v3108_v53 = vmul.f32 %v7066_v11, %v7066_v11 }
 0x337   :  { %8759 = vst [vmem:[#allocation122_spill] sm:$0xff] %v7073_v51  ;;  %3213 = vadd.xlane.f32.xlu0 %v3107_v41  ;;  %v3106_v46 = vmul.f32 %v7073_v51, %v7073_v51 }
 0x338   :  { %3215 = vadd.xlane.f32.xlu1 %v3108_v53  ;;  %v7081_v9 = vpop.xlane.xlu0 %1831 }
 0x339   :  { %8760 = vst [vmem:[#allocation123_spill] sm:$0xff] %v7081_v9  ;;  %v5170_v24 = vpop.f32.mrb[108].mxu1  ;;  %v7083_v62 = vpop.xlane.xlu1 %1833 }
 0x33a   :  { %8761 = vst [vmem:[#allocation124_spill] sm:$0xff] %v7083_v62  ;;  %v7086_v4 = vadd.f32 %v5170_v24, %v6851_v52  ;;  %v2902_v34 = vpop.f32.mrb[109].mxu1 }
 0x33b   :  { %v7089_v20 = vadd.f32 %v6851_v52, %v2902_v34  ;;  %v5171_v11 = vpop.f32.mrb[110].mxu1  ;;  %3209 = vadd.xlane.f32.xlu0 %v3105_v15 }
 0x33c   :  { %8762 = vst [vmem:[#allocation125_spill] sm:$0xff] %v7086_v4  ;;  %v3111_v41 = vmul.f32 %v7086_v4, %v7086_v4  ;;  %v7094_v51 = vadd.f32 %v5171_v11, %v6851_v52  ;;  %3211 = vadd.xlane.f32.xlu1 %v3106_v46  ;;  %v7096_v53 = vpop.xlane.xlu0 %1843  ;;  %v2905_v5 = vpop.f32.mrb[111].mxu1 }
 0x33d   :  { %8763 = vst [vmem:[#allocation126_spill] sm:$0xff] %v7089_v20  ;;  %v7098_v62 = vpop.xlane.xlu1 %1845  ;;  %v7101_v24 = vadd.f32 %v6851_v52, %v2905_v5  ;;  %v3109_v15 = vmul.f32 %v7089_v20, %v7089_v20 }
 0x33e   :  { %8764 = vst [vmem:[#allocation127_spill] sm:$0xff] %v7094_v51  ;;  %v3112_v34 = vmul.f32 %v7094_v51, %v7094_v51 }
 0x33f   :  { %8765 = vst [vmem:[#allocation128_spill] sm:$0xff] %v7101_v24  ;;  %3221 = vadd.xlane.f32.xlu0 %v3111_v41  ;;  %v3110_v11 = vmul.f32 %v7101_v24, %v7101_v24 }
 0x340   :  { %3223 = vadd.xlane.f32.xlu1 %v3112_v34  ;;  %v7109_v46 = vpop.xlane.xlu0 %1839 }
 0x341   :  { %8766 = vst [vmem:[#allocation129_spill] sm:$0xff] %v7109_v46  ;;  %v5174_v4 = vpop.f32.mrb[112].mxu1  ;;  %v7111_v9 = vpop.xlane.xlu1 %1841 }
 0x342   :  { %8767 = vst [vmem:[#allocation130_spill] sm:$0xff] %v7111_v9  ;;  %v7114_v22 = vadd.f32 %v5174_v4, %v6851_v52  ;;  %v2918_v5 = vpop.f32.mrb[113].mxu1 }
 0x343   :  { %v7117_v35 = vadd.f32 %v6851_v52, %v2918_v5  ;;  %v5175_v51 = vpop.f32.mrb[114].mxu1  ;;  %3217 = vadd.xlane.f32.xlu0 %v3109_v15 }
 0x344   :  { %8768 = vst [vmem:[#allocation131_spill] sm:$0xff] %v7114_v22  ;;  %v3115_v41 = vmul.f32 %v7114_v22, %v7114_v22  ;;  %v7122_v24 = vadd.f32 %v5175_v51, %v6851_v52  ;;  %3219 = vadd.xlane.f32.xlu1 %v3110_v11  ;;  %v7124_v34 = vpop.xlane.xlu0 %1851  ;;  %v2921_v20 = vpop.f32.mrb[115].mxu1 }
 0x345   :  { %8769 = vst [vmem:[#allocation132_spill] sm:$0xff] %v7117_v35  ;;  %v7126_v46 = vpop.xlane.xlu1 %1853  ;;  %v7129_v4 = vadd.f32 %v6851_v52, %v2921_v20  ;;  %v3113_v15 = vmul.f32 %v7117_v35, %v7117_v35 }
 0x346   :  { %8770 = vst [vmem:[#allocation133_spill] sm:$0xff] %v7122_v24  ;;  %v3116_v5 = vmul.f32 %v7122_v24, %v7122_v24 }
 0x347   :  { %8771 = vst [vmem:[#allocation134_spill] sm:$0xff] %v7129_v4  ;;  %3229 = vadd.xlane.f32.xlu0 %v3115_v41  ;;  %v3114_v51 = vmul.f32 %v7129_v4, %v7129_v4 }
 0x348   :  { %3231 = vadd.xlane.f32.xlu1 %v3116_v5  ;;  %v7137_v11 = vpop.xlane.xlu0 %1847 }
 0x349   :  { %v5178_v22 = vpop.f32.mrb[116].mxu1  ;;  %v7139_v9 = vpop.xlane.xlu1 %1849 }
 0x34a   :  { %v7142_v33 = vadd.f32 %v5178_v22, %v6851_v52  ;;  %v2934_v20 = vpop.f32.mrb[117].mxu1 }
 0x34b   :  { %v7145_v3 = vadd.f32 %v6851_v52, %v2934_v20  ;;  %v5179_v24 = vpop.f32.mrb[118].mxu1  ;;  %3225 = vadd.xlane.f32.xlu0 %v3113_v15 }
 0x34c   :  { %8772 = vst [vmem:[#allocation135_spill] sm:$0xff] %v7142_v33  ;;  %v3119_v41 = vmul.f32 %v7142_v33, %v7142_v33  ;;  %v7150_v4 = vadd.f32 %v5179_v24, %v6851_v52  ;;  %3227 = vadd.xlane.f32.xlu1 %v3114_v51  ;;  %v7152_v5 = vpop.xlane.xlu0 %1859  ;;  %v2937_v35 = vpop.f32.mrb[119].mxu1 }
 0x34d   :  { %8773 = vst [vmem:[#allocation136_spill] sm:$0xff] %v7145_v3  ;;  %8775 = vst [vmem:[#allocation138_spill] sm:$0xff] %v7152_v5  ;;  %v7154_v48 = vpop.xlane.xlu1 %1861  ;;  %v7157_v22 = vadd.f32 %v6851_v52, %v2937_v35  ;;  %v3117_v15 = vmul.f32 %v7145_v3, %v7145_v3 }
 0x34e   :  { %8774 = vst [vmem:[#allocation137_spill] sm:$0xff] %v7150_v4  ;;  %8776 = vst [vmem:[#allocation139_spill] sm:$0xff] %v7154_v48  ;;  %v3120_v20 = vmul.f32 %v7150_v4, %v7150_v4 }
 0x34f   :  { %8777 = vst [vmem:[#allocation140_spill] sm:$0xff] %v7157_v22  ;;  %3237 = vadd.xlane.f32.xlu0 %v3119_v41  ;;  %v3118_v24 = vmul.f32 %v7157_v22, %v7157_v22 }
 0x350   :  { %3239 = vadd.xlane.f32.xlu1 %v3120_v20  ;;  %v7165_v51 = vpop.xlane.xlu0 %1855 }
 0x351   :  { %v5182_v33 = vpop.f32.mrb[120].mxu1  ;;  %v7167_v5 = vpop.xlane.xlu1 %1857 }
 0x352   :  { %v7170_v48 = vadd.f32 %v5182_v33, %v6851_v52  ;;  %v2950_v35 = vpop.f32.mrb[121].mxu1 }
 0x353   :  { %v7173_v29 = vadd.f32 %v6851_v52, %v2950_v35  ;;  %v5183_v4 = vpop.f32.mrb[122].mxu1  ;;  %3233 = vadd.xlane.f32.xlu0 %v3117_v15 }
 0x354   :  { %8778 = vst [vmem:[#allocation141_spill] sm:$0xff] %v7170_v48  ;;  %v3123_v41 = vmul.f32 %v7170_v48, %v7170_v48  ;;  %v7178_v3 = vadd.f32 %v5183_v4, %v6851_v52  ;;  %3235 = vadd.xlane.f32.xlu1 %v3118_v24  ;;  %v7180_v20 = vpop.xlane.xlu0 %1867  ;;  %v2953_v22 = vpop.f32.mrb[123].mxu1 }
 0x355   :  { %8779 = vst [vmem:[#allocation142_spill] sm:$0xff] %v7173_v29  ;;  %8781 = vst [vmem:[#allocation144_spill] sm:$0xff] %v7180_v20  ;;  %v7182_v36 = vpop.xlane.xlu1 %1869  ;;  %v7185_v33 = vadd.f32 %v6851_v52, %v2953_v22  ;;  %v3121_v15 = vmul.f32 %v7173_v29, %v7173_v29 }
 0x356   :  { %8780 = vst [vmem:[#allocation143_spill] sm:$0xff] %v7178_v3  ;;  %8782 = vst [vmem:[#allocation145_spill] sm:$0xff] %v7182_v36  ;;  %v3124_v35 = vmul.f32 %v7178_v3, %v7178_v3 }
 0x357   :  { %8783 = vst [vmem:[#allocation146_spill] sm:$0xff] %v7185_v33  ;;  %3245 = vadd.xlane.f32.xlu0 %v3123_v41  ;;  %v3122_v4 = vmul.f32 %v7185_v33, %v7185_v33 }
 0x358   :  { %3247 = vadd.xlane.f32.xlu1 %v3124_v35  ;;  %v7193_v24 = vpop.xlane.xlu0 %1863 }
 0x359   :  { %8784 = vst [vmem:[#allocation147_spill] sm:$0xff] %v7193_v24  ;;  %v5186_v48 = vpop.f32.mrb[124].mxu1  ;;  %v7195_v20 = vpop.xlane.xlu1 %1865 }
 0x35a   :  { %8785 = vst [vmem:[#allocation148_spill] sm:$0xff] %v7195_v20  ;;  %v7198_v36 = vadd.f32 %v5186_v48, %v6851_v52  ;;  %v2966_v22 = vpop.f32.mrb[125].mxu1 }
 0x35b   :  { %v7201_v25 = vadd.f32 %v6851_v52, %v2966_v22  ;;  %v5187_v3 = vpop.f32.mrb[126].mxu1  ;;  %3241 = vadd.xlane.f32.xlu0 %v3121_v15 }
 0x35c   :  { %8786 = vst [vmem:[#allocation149_spill] sm:$0xff] %v7198_v36  ;;  %v3127_v41 = vmul.f32 %v7198_v36, %v7198_v36  ;;  %v7206_v33 = vadd.f32 %v5187_v3, %v6851_v52  ;;  %3243 = vadd.xlane.f32.xlu1 %v3122_v4  ;;  %v7208_v35 = vpop.xlane.xlu0 %1875  ;;  %v2969_v29 = vpop.f32.mrb[127].mxu1 }
 0x35d   :  { %8787 = vst [vmem:[#allocation150_spill] sm:$0xff] %v7201_v25  ;;  %8789 = vst [vmem:[#allocation152_spill] sm:$0xff] %v7208_v35  ;;  %v7210_v20 = vpop.xlane.xlu1 %1877  ;;  %v7213_v48 = vadd.f32 %v6851_v52, %v2969_v29  ;;  %v3125_v15 = vmul.f32 %v7201_v25, %v7201_v25 }
 0x35e   :  { %8788 = vst [vmem:[#allocation151_spill] sm:$0xff] %v7206_v33  ;;  %8790 = vst [vmem:[#allocation153_spill] sm:$0xff] %v7210_v20  ;;  %v3128_v22 = vmul.f32 %v7206_v33, %v7206_v33 }
 0x35f   :  { %8791 = vst [vmem:[#allocation154_spill] sm:$0xff] %v7213_v48  ;;  %3253 = vadd.xlane.f32.xlu0 %v3127_v41  ;;  %v3126_v3 = vmul.f32 %v7213_v48, %v7213_v48 }
 0x360   :  { %3255 = vadd.xlane.f32.xlu1 %v3128_v22  ;;  %v7221_v4 = vpop.xlane.xlu0 %1871 }
 0x361   :  { %8792 = vst [vmem:[#allocation155_spill] sm:$0xff] %v7221_v4  ;;  %v5190_v36 = vpop.f32.mrb[128].mxu1  ;;  %v7223_v35 = vpop.xlane.xlu1 %1873 }
 0x362   :  { %8793 = vst [vmem:[#allocation156_spill] sm:$0xff] %v7223_v35  ;;  %v7226_v20 = vadd.f32 %v5190_v36, %v6851_v52  ;;  %v2982_v29 = vpop.f32.mrb[129].mxu1 }
 0x363   :  { %v7229_v24 = vadd.f32 %v6851_v52, %v2982_v29  ;;  %v5191_v33 = vpop.f32.mrb[130].mxu1  ;;  %3249 = vadd.xlane.f32.xlu0 %v3125_v15 }
 0x364   :  { %8794 = vst [vmem:[#allocation157_spill] sm:$0xff] %v7226_v20  ;;  %v3131_v41 = vmul.f32 %v7226_v20, %v7226_v20  ;;  %v7234_v48 = vadd.f32 %v5191_v33, %v6851_v52  ;;  %3251 = vadd.xlane.f32.xlu1 %v3126_v3  ;;  %v7236_v22 = vpop.xlane.xlu0 %1883  ;;  %v2985_v25 = vpop.f32.mrb[131].mxu1 }
 0x365   :  { %8795 = vst [vmem:[#allocation158_spill] sm:$0xff] %v7229_v24  ;;  %8797 = vst [vmem:[#allocation160_spill] sm:$0xff] %v7236_v22  ;;  %v7238_v35 = vpop.xlane.xlu1 %1885  ;;  %v7241_v36 = vadd.f32 %v6851_v52, %v2985_v25  ;;  %v3129_v15 = vmul.f32 %v7229_v24, %v7229_v24 }
 0x366   :  { %8796 = vst [vmem:[#allocation159_spill] sm:$0xff] %v7234_v48  ;;  %8798 = vst [vmem:[#allocation161_spill] sm:$0xff] %v7238_v35  ;;  %v3132_v29 = vmul.f32 %v7234_v48, %v7234_v48 }
 0x367   :  { %8799 = vst [vmem:[#allocation162_spill] sm:$0xff] %v7241_v36  ;;  %3261 = vadd.xlane.f32.xlu0 %v3131_v41  ;;  %v3130_v33 = vmul.f32 %v7241_v36, %v7241_v36 }
 0x368   :  { %3263 = vadd.xlane.f32.xlu1 %v3132_v29  ;;  %v7249_v3 = vpop.xlane.xlu0 %1879 }
 0x369   :  { %8800 = vst [vmem:[#allocation163_spill] sm:$0xff] %v7249_v3  ;;  %v5194_v20 = vpop.f32.mrb[132].mxu1  ;;  %v7251_v22 = vpop.xlane.xlu1 %1881 }
 0x36a   :  { %8801 = vst [vmem:[#allocation164_spill] sm:$0xff] %v7251_v22  ;;  %v7254_v4 = vadd.f32 %v5194_v20, %v6851_v52  ;;  %v2998_v25 = vpop.f32.mrb[133].mxu1 }
 0x36b   :  { %v7257_v35 = vadd.f32 %v6851_v52, %v2998_v25  ;;  %v5195_v48 = vpop.f32.mrb[134].mxu1  ;;  %3257 = vadd.xlane.f32.xlu0 %v3129_v15 }
 0x36c   :  { %8802 = vst [vmem:[#allocation165_spill] sm:$0xff] %v7254_v4  ;;  %v3135_v41 = vmul.f32 %v7254_v4, %v7254_v4  ;;  %v7262_v36 = vadd.f32 %v5195_v48, %v6851_v52  ;;  %3259 = vadd.xlane.f32.xlu1 %v3130_v33  ;;  %v7264_v29 = vpop.xlane.xlu0 %1891  ;;  %v3001_v24 = vpop.f32.mrb[135].mxu1 }
 0x36d   :  { %8803 = vst [vmem:[#allocation166_spill] sm:$0xff] %v7257_v35  ;;  %8805 = vst [vmem:[#allocation168_spill] sm:$0xff] %v7264_v29  ;;  %v7266_v3 = vpop.xlane.xlu1 %1893  ;;  %v7269_v20 = vadd.f32 %v6851_v52, %v3001_v24  ;;  %v3133_v15 = vmul.f32 %v7257_v35, %v7257_v35 }
 0x36e   :  { %8804 = vst [vmem:[#allocation167_spill] sm:$0xff] %v7262_v36  ;;  %8806 = vst [vmem:[#allocation169_spill] sm:$0xff] %v7266_v3  ;;  %v3136_v25 = vmul.f32 %v7262_v36, %v7262_v36 }
 0x36f   :  { %8807 = vst [vmem:[#allocation170_spill] sm:$0xff] %v7269_v20  ;;  %3269 = vadd.xlane.f32.xlu0 %v3135_v41  ;;  %v3134_v48 = vmul.f32 %v7269_v20, %v7269_v20 }
 0x370   :  { %3271 = vadd.xlane.f32.xlu1 %v3136_v25  ;;  %v7277_v33 = vpop.xlane.xlu0 %1887 }
 0x371   :  { %8808 = vst [vmem:[#allocation171_spill] sm:$0xff] %v7277_v33  ;;  %v5198_v4 = vpop.f32.mrb[136].mxu1  ;;  %v7279_v29 = vpop.xlane.xlu1 %1889 }
 0x372   :  { %8809 = vst [vmem:[#allocation172_spill] sm:$0xff] %v7279_v29  ;;  %v7282_v3 = vadd.f32 %v5198_v4, %v6851_v52  ;;  %v3014_v24 = vpop.f32.mrb[137].mxu1 }
 0x373   :  { %v7285_v22 = vadd.f32 %v6851_v52, %v3014_v24  ;;  %v5199_v36 = vpop.f32.mrb[138].mxu1  ;;  %3265 = vadd.xlane.f32.xlu0 %v3133_v15 }
 0x374   :  { %8810 = vst [vmem:[#allocation173_spill] sm:$0xff] %v7282_v3  ;;  %v3139_v41 = vmul.f32 %v7282_v3, %v7282_v3  ;;  %v7290_v20 = vadd.f32 %v5199_v36, %v6851_v52  ;;  %3267 = vadd.xlane.f32.xlu1 %v3134_v48  ;;  %v7292_v25 = vpop.xlane.xlu0 %1899  ;;  %v3017_v35 = vpop.f32.mrb[139].mxu1 }
 0x375   :  { %8811 = vst [vmem:[#allocation174_spill] sm:$0xff] %v7285_v22  ;;  %8813 = vst [vmem:[#allocation176_spill] sm:$0xff] %v7292_v25  ;;  %v7294_v33 = vpop.xlane.xlu1 %1901  ;;  %v7297_v4 = vadd.f32 %v6851_v52, %v3017_v35  ;;  %v3137_v15 = vmul.f32 %v7285_v22, %v7285_v22 }
 0x376   :  { %8812 = vst [vmem:[#allocation175_spill] sm:$0xff] %v7290_v20  ;;  %8814 = vst [vmem:[#allocation177_spill] sm:$0xff] %v7294_v33  ;;  %v3140_v24 = vmul.f32 %v7290_v20, %v7290_v20 }
 0x377   :  { %8815 = vst [vmem:[#allocation178_spill] sm:$0xff] %v7297_v4  ;;  %3277 = vadd.xlane.f32.xlu0 %v3139_v41  ;;  %v3138_v36 = vmul.f32 %v7297_v4, %v7297_v4 }
 0x378   :  { %3279 = vadd.xlane.f32.xlu1 %v3140_v24  ;;  %v7305_v48 = vpop.xlane.xlu0 %1895 }
 0x379   :  { %8816 = vst [vmem:[#allocation179_spill] sm:$0xff] %v7305_v48  ;;  %v5202_v3 = vpop.f32.mrb[140].mxu1  ;;  %v7307_v25 = vpop.xlane.xlu1 %1897 }
 0x37a   :  { %8817 = vst [vmem:[#allocation180_spill] sm:$0xff] %v7307_v25  ;;  %v7310_v33 = vadd.f32 %v5202_v3, %v6851_v52  ;;  %v3030_v35 = vpop.f32.mrb[141].mxu1 }
 0x37b   :  { %v7313_v29 = vadd.f32 %v6851_v52, %v3030_v35  ;;  %v5203_v20 = vpop.f32.mrb[142].mxu1  ;;  %3273 = vadd.xlane.f32.xlu0 %v3137_v15 }
 0x37c   :  { %8818 = vst [vmem:[#allocation181_spill] sm:$0xff] %v7310_v33  ;;  %v3143_v41 = vmul.f32 %v7310_v33, %v7310_v33  ;;  %v7318_v4 = vadd.f32 %v5203_v20, %v6851_v52  ;;  %3275 = vadd.xlane.f32.xlu1 %v3138_v36  ;;  %v7320_v24 = vpop.xlane.xlu0 %1907  ;;  %v3033_v22 = vpop.f32.mrb[143].mxu1 }
 0x37d   :  { %8819 = vst [vmem:[#allocation182_spill] sm:$0xff] %v7313_v29  ;;  %8821 = vst [vmem:[#allocation184_spill] sm:$0xff] %v7320_v24  ;;  %v7322_v48 = vpop.xlane.xlu1 %1909  ;;  %v7325_v3 = vadd.f32 %v6851_v52, %v3033_v22  ;;  %v3141_v15 = vmul.f32 %v7313_v29, %v7313_v29 }
 0x37e   :  { %8820 = vst [vmem:[#allocation183_spill] sm:$0xff] %v7318_v4  ;;  %8822 = vst [vmem:[#allocation185_spill] sm:$0xff] %v7322_v48  ;;  %v3144_v35 = vmul.f32 %v7318_v4, %v7318_v4 }
 0x37f   :  { %8823 = vst [vmem:[#allocation186_spill] sm:$0xff] %v7325_v3  ;;  %3285 = vadd.xlane.f32.xlu0 %v3143_v41  ;;  %v3142_v20 = vmul.f32 %v7325_v3, %v7325_v3 }
 0x380   :  { %3287 = vadd.xlane.f32.xlu1 %v3144_v35  ;;  %v7333_v36 = vpop.xlane.xlu0 %1903 }
 0x381   :  { %8824 = vst [vmem:[#allocation187_spill] sm:$0xff] %v7333_v36  ;;  %v5206_v33 = vpop.f32.mrb[144].mxu1  ;;  %v7335_v24 = vpop.xlane.xlu1 %1905 }
 0x382   :  { %8825 = vst [vmem:[#allocation188_spill] sm:$0xff] %v7335_v24  ;;  %v7338_v48 = vadd.f32 %v5206_v33, %v6851_v52  ;;  %v3046_v22 = vpop.f32.mrb[145].mxu1  ;;  %v1921_v24 = vmax.f32 %v6831_v6, 1e-24 }
 0x383   :  { %v7341_v25 = vadd.f32 %v6851_v52, %v3046_v22  ;;  %v5207_v4 = vpop.f32.mrb[146].mxu1  ;;  %3281 = vadd.xlane.f32.xlu0 %v3141_v15  ;;  %v1919_v22 = vmax.f32 %v6836_v18, 1e-24  ;;  %v1925_v18 = vmax.f32 %v6867_v43, 1e-24 }
 0x384   :  { %8826 = vst [vmem:[#allocation189_spill] sm:$0xff] %v7338_v48  ;;  %v3147_v41 = vmul.f32 %v7338_v48, %v7338_v48  ;;  %v7346_v3 = vadd.f32 %v5207_v4, %v6851_v52  ;;  %3283 = vadd.xlane.f32.xlu1 %v3142_v20  ;;  %v7348_v35 = vpop.xlane.xlu0 %1915  ;;  %v3049_v29 = vpop.f32.mrb[147].mxu1  ;;  %v1922_v48 = vmax.f32 %v6855_v54, 1e-24  ;;  %v1920_v20 = vmax.f32 %v6853_v45, 1e-24 }
 0x385   :  { %8827 = vst [vmem:[#allocation190_spill] sm:$0xff] %v7341_v25  ;;  %8829 = vst [vmem:[#allocation192_spill] sm:$0xff] %v7348_v35  ;;  %v7351_v33 = vpop.xlane.xlu1 %1917  ;;  %v7354_v36 = vadd.f32 %v6851_v52, %v3049_v29  ;;  %v3145_v4 = vmul.f32 %v7341_v25, %v7341_v25  ;;  %5331 = vrsqrt.f32 %v1921_v24  ;;  %v1926_v54 = vmax.f32 %v6874_v57, 1e-24 }
 0x386   :  { %8828 = vst [vmem:[#allocation191_spill] sm:$0xff] %v7346_v3  ;;  %8830 = vst [vmem:[#allocation193_spill] sm:$0xff] %v7351_v33  ;;  %v3148_v15 = vmul.f32 %v7346_v3, %v7346_v3  ;;  %5333 = vrsqrt.f32 %v1919_v22  ;;  %v1957_v24 = vmax.f32 %v7096_v53, 1e-24 }
 0x387   :  { %8831 = vst [vmem:[#allocation194_spill] sm:$0xff] %v7354_v36  ;;  %3293 = vadd.xlane.f32.xlu0 %v3147_v41  ;;  %v3146_v6 = vmul.f32 %v7354_v36, %v7354_v36  ;;  %5335 = vrsqrt.f32 %v1922_v48  ;;  %v1959_v48 = vmax.f32 %v7137_v11, 1e-24 }
 0x388   :  { %3295 = vadd.xlane.f32.xlu1 %v3148_v15  ;;  %v7365_v33 = vpop.xlane.xlu0 %1911  ;;  %5337 = vrsqrt.f32 %v1920_v20 }
 0x389   :  { %8832 = vst [vmem:[#allocation195_spill] sm:$0xff] %v7365_v33  ;;  %v5210_v29 = vpop.f32.mrb[148].mxu1  ;;  %v7368_v35 = vpop.xlane.xlu1 %1913  ;;  %5339 = vrsqrt.f32 %v1925_v18  ;;  %v8927_v33 = vld [vmem:[#allocation83_spill] sm:$0xff] }
 0x38a   :  { %v7372_v25 = vadd.f32 %v5210_v29, %v6851_v52  ;;  %v3062_v41 = vpop.f32.mrb[149].mxu1  ;;  %5341 = vrsqrt.f32 %v1926_v54 }
 0x38b   :  { %v7375_v45 = vadd.f32 %v6851_v52, %v3062_v41  ;;  %v5211_v15 = vpop.f32.mrb[150].mxu1  ;;  %3289 = vadd.xlane.f32.xlu0 %v3145_v4 }
 0x38c   :  { %8833 = vst [vmem:[#allocation196_spill] sm:$0xff] %v7372_v25  ;;  %v3151_v43 = vmul.f32 %v7372_v25, %v7372_v25  ;;  %v7381_v22 = vadd.f32 %v5211_v15, %v6851_v52  ;;  %3291 = vadd.xlane.f32.xlu1 %v3146_v6  ;;  %v3158_v57 = vpop.xlane.xlu0 %3157  ;;  %v3065_v29 = vpop.f32.mrb[151].mxu1  ;;  %v1923_v6 = vmax.f32 %v6881_v8, 1e-24  ;;  %v1930_v8 = vmax.f32 %v6902_v13, 1e-24 }
 0x38d   :  { %8834 = vst [vmem:[#allocation197_spill] sm:$0xff] %v7375_v45  ;;  %v3307_v36 = vmax.f32 %v3158_v57, 1e-24  ;;  %v3160_v41 = vpop.xlane.xlu1 %3159  ;;  %v7385_v3 = vadd.f32 %v6851_v52, %v3065_v29  ;;  %v3149_v20 = vmul.f32 %v7375_v45, %v7375_v45  ;;  %v1924_v52 = vmax.f32 %v6883_v47, 1e-24 }
 0x38e   :  { %v3152_v53 = vmul.f32 %v7381_v22, %v7381_v22  ;;  %v3308_v4 = vmax.f32 %v3160_v41, 1e-24  ;;  %v1929_v57 = vmax.f32 %v6895_v50, 1e-24  ;;  %v1960_v47 = vmax.f32 %v7139_v9, 1e-24 }
 0x38f   :  { %8835 = vst [vmem:[#allocation198_spill] sm:$0xff] %v7385_v3  ;;  %5343 = vrsqrt.f32 %v3307_v36  ;;  %3301 = vadd.xlane.f32.xlu0 %v3151_v43  ;;  %v3150_v11 = vmul.f32 %v7385_v3, %v7385_v3  ;;  %v5332_v29 = vpop.eup %5331  ;;  %v1927_v50 = vmax.f32 %v6909_v27, 1e-24  ;;  %v1928_v13 = vmax.f32 %v6911_v49, 1e-24 }
 0x390   :  { %5345 = vrsqrt.f32 %v1957_v24  ;;  %3303 = vadd.xlane.f32.xlu1 %v3152_v53  ;;  %v3154_v18 = vpop.xlane.xlu0 %3153  ;;  %v7396_v43 = vpop.eup %5333  ;;  %v1958_v9 = vmax.f32 %v7098_v62, 1e-24  ;;  %v7412_v27 = vmul.f32 %v5332_v29, %v6429_v61 }
 0x391   :  { %5347 = vrsqrt.f32 %v1959_v48  ;;  %v3305_v54 = vmax.f32 %v3154_v18, 1e-24  ;;  %v3156_v15 = vpop.xlane.xlu1 %3155  ;;  %v5336_v41 = vpop.eup %5335 }
 0x392   :  { %5349 = vrsqrt.f32 %v3308_v4  ;;  %v3306_v36 = vmax.f32 %v3156_v15, 1e-24  ;;  %v7400_v53 = vpop.eup %5337 }
 0x393   :  { %5351 = vrsqrt.f32 %v3305_v54  ;;  %3297 = vadd.xlane.f32.xlu0 %v3149_v20  ;;  %v7403_v4 = vpop.eup %5339 }
 0x394   :  { %5353 = vrsqrt.f32 %v1923_v6  ;;  %3299 = vadd.xlane.f32.xlu1 %v3150_v11  ;;  %v3166_v24 = vpop.xlane.xlu0 %3165  ;;  %v7405_v18 = vpop.eup %5341 }
 0x395   :  { %5355 = vrsqrt.f32 %v1924_v52  ;;  %v3168_v48 = vpop.xlane.xlu1 %3167  ;;  %v3311_v15 = vmax.f32 %v3166_v24, 1e-24 }
 0x396   :  { %5357 = vrsqrt.f32 %v1929_v57  ;;  %v3312_v20 = vmax.f32 %v3168_v48, 1e-24 }
 0x397   :  { %5359 = vrsqrt.f32 %v3306_v36 }
 0x398   :  { %5361 = vrsqrt.f32 %v1930_v8  ;;  %v7408_v6 = vpop.xlane.xlu0 %3161 }
 0x399   :  { %v5344_v11 = vpop.eup %5343  ;;  %5363 = vrsqrt.f32 %v1960_v47  ;;  %v3164_v52 = vpop.xlane.xlu1 %3163  ;;  %v1933_v47 = vmax.f32 %v6923_v26, 1e-24  ;;  %v1931_v26 = vmax.f32 %v6937_v63, 1e-24  ;;  %v7438_v63 = vmul.f32 %v5336_v41, %v6435_v2 }
 0x39a   :  { %v5346_v54 = vpop.eup %5345  ;;  %5365 = vrsqrt.f32 %v1927_v50  ;;  %v3459_v57 = vmul.f32 %v5344_v11, %v6860_v56  ;;  %v3310_v8 = vmax.f32 %v3164_v52, 1e-24  ;;  %v1934_v50 = vmax.f32 %v6930_v42, 1e-24 }
 0x39b   :  { %v5348_v36 = vpop.eup %5347  ;;  %5367 = vrsqrt.f32 %v3312_v20  ;;  %v2109_v29 = vmul.f32 %v5346_v54, %v6643_v14  ;;  %v1963_v14 = vmax.f32 %v7165_v51, 1e-24  ;;  %v3309_v54 = vmax.f32 %v7408_v6, 1e-24 }
 0x39c   :  { %v5350_v48 = vpop.eup %5349  ;;  %5369 = vrsqrt.f32 %v1928_v13  ;;  %v7415_v49 = vpop.xlane.xlu0 %3173  ;;  %v3535_v3 = vmul.f32 %v3459_v57, %v7412_v27  ;;  %v2111_v56 = vmul.f32 %v5348_v36, %v6677_v38  ;;  %v1932_v36 = vmax.f32 %v6939_v60, 1e-24 }
 0x39d   :  { %v5352_v62 = vpop.eup %5351  ;;  %5371 = vrsqrt.f32 %v1958_v9  ;;  %v3176_v24 = vpop.xlane.xlu1 %3175  ;;  %v1936_v60 = vmax.f32 %v6967_v59, 1e-24 }
 0x39e   :  { %v7420_v61 = vpop.eup %5353  ;;  %5373 = vrsqrt.f32 %v3311_v15  ;;  %3575 = vadd.xlane.f32.xlu0 %v3535_v3  ;;  %v3457_v20 = vmul.f32 %v5352_v62, %v6872_v21  ;;  %v3316_v11 = vmax.f32 %v3176_v24, 1e-24  ;;  %v3763_v9 = vmul.f32 %v3459_v57, %v2111_v56 }
 0x39f   :  { %v7425_v13 = vpop.eup %5355  ;;  %5375 = vrsqrt.f32 %v3310_v8  ;;  %v3460_v3 = vmul.f32 %v5350_v48, %v6865_v39  ;;  %v7442_v57 = vmul.f32 %v7396_v43, %v6432_v0  ;;  %v1937_v0 = vmax.f32 %v6951_v31, 1e-24 }
 0x3a0   :  { %v7427_v52 = vpop.eup %5357  ;;  %v7430_v42 = vpop.xlane.xlu0 %3169  ;;  %v3761_v45 = vmul.f32 %v3457_v20, %v2109_v29  ;;  %5377 = vrsqrt.f32 %v1933_v47  ;;  %v7458_v47 = vmul.f32 %v7400_v53, %v6441_v7  ;;  %v1961_v7 = vmax.f32 %v7124_v34, 1e-24 }
 0x3a1   :  { %v5360_v15 = vpop.eup %5359  ;;  %v3172_v38 = vpop.xlane.xlu1 %3171  ;;  %5379 = vrsqrt.f32 %v1934_v50  ;;  %v3536_v6 = vmul.f32 %v3460_v3, %v7438_v63 }
 0x3a2   :  { %v7434_v21 = vpop.eup %5361  ;;  %3803 = vadd.xlane.f32.xlu0 %v3763_v9  ;;  %3799 = vadd.xlane.f32.xlu1 %v3761_v45  ;;  %5381 = vrsqrt.f32 %v3316_v11  ;;  %v3314_v51 = vmax.f32 %v3172_v38, 1e-24  ;;  %v3533_v45 = vmul.f32 %v3457_v20, %v7442_v57  ;;  %v3458_v2 = vmul.f32 %v5360_v15, %v6877_v1 }
 0x3a3   :  { %v5364_v39 = vpop.eup %5363  ;;  %5383 = vrsqrt.f32 %v1931_v26  ;;  %v7471_v26 = vmul.f32 %v7405_v18, %v6456_v28 }
 0x3a4   :  { %v7445_v8 = vpop.eup %5365  ;;  %v7447_v48 = vpop.xlane.xlu0 %3181  ;;  %5385 = vrsqrt.f32 %v1963_v14  ;;  %v2112_v50 = vmul.f32 %v5364_v39, %v6680_v40  ;;  %v3534_v29 = vmul.f32 %v3458_v2, %v7458_v47  ;;  %v1941_v40 = vmax.f32 %v6982_v19, 1e-24 }
 0x3a5   :  { %v5368_v41 = vpop.eup %5367  ;;  %v3184_v43 = vpop.xlane.xlu1 %3183  ;;  %5387 = vrsqrt.f32 %v3309_v54 }
 0x3a6   :  { %v7453_v62 = vpop.eup %5369  ;;  %3577 = vadd.xlane.f32.xlu1 %v3536_v6  ;;  %3571 = vadd.xlane.f32.xlu0 %v3533_v45  ;;  %5389 = vrsqrt.f32 %v3314_v51  ;;  %v3320_v1 = vmax.f32 %v3184_v43, 1e-24  ;;  %v3764_v20 = vmul.f32 %v3460_v3, %v2112_v50  ;;  %v7465_v59 = vmul.f32 %v5368_v41, %v6893_v16  ;;  %v8837_v50 = vld [vmem:[#allocation107_spill] sm:$0xff] }
 0x3a7   :  { %v5372_v24 = vpop.eup %5371  ;;  %5391 = vrsqrt.f32 %v1932_v36  ;;  %v1939_v16 = vmax.f32 %v6995_v32, 1e-24  ;;  %v1945_v36 = vmax.f32 %v7010_v17, 1e-24  ;;  %v7491_v51 = vmul.f32 %v7425_v13, %v6466_v37 }
 0x3a8   :  { %v5374_v56 = vpop.eup %5373  ;;  %v7461_v31 = vpop.xlane.xlu0 %3177  ;;  %5393 = vrsqrt.f32 %v1937_v0  ;;  %v2110_v9 = vmul.f32 %v5372_v24, %v6648_v30  ;;  %v3540_v19 = vmul.f32 %v7465_v59, %v7471_v26  ;;  %v1964_v30 = vmax.f32 %v7167_v5, 1e-24 }
 0x3a9   :  { %v5376_v11 = vpop.eup %5375  ;;  %v3180_v53 = vpop.xlane.xlu1 %3179  ;;  %5395 = vrsqrt.f32 %v1936_v60  ;;  %v3463_v28 = vmul.f32 %v5374_v56, %v6888_v44  ;;  %v1962_v13 = vmax.f32 %v7126_v46, 1e-24  ;;  %v3315_v0 = vmax.f32 %v7415_v49, 1e-24 }
 0x3aa   :  { %3573 = vadd.xlane.f32.xlu1 %v3534_v29  ;;  %3805 = vadd.xlane.f32.xlu0 %v3764_v20  ;;  %v7474_v3 = vpop.eup %5377  ;;  %5397 = vrsqrt.f32 %v3320_v1  ;;  %v3318_v15 = vmax.f32 %v3180_v53, 1e-24  ;;  %v3762_v38 = vmul.f32 %v3458_v2, %v2110_v9  ;;  %v7482_v54 = vmul.f32 %v5376_v11, %v6905_v58  ;;  %v8838_v20 = vld [vmem:[#allocation89_spill] sm:$0xff] }
 0x3ab   :  { %v7477_v14 = vpop.eup %5379  ;;  %5399 = vrsqrt.f32 %v1961_v7  ;;  %v7495_v58 = vmul.f32 %v7403_v4, %v6453_v23  ;;  %v7511_v43 = vmul.f32 %v7434_v21, %v6480_v55  ;;  %v1943_v24 = vmax.f32 %v8837_v50, 1e-24  ;;  %v8839_v55 = vld [vmem:[#allocation86_spill] sm:$0xff]  ;;  %v8840_v7 = vld [vmem:[#allocation164_spill] sm:$0xff]  ;;  %v8841_v9 = vld [vmem:[#allocation121_spill] sm:$0xff] }
 0x3ac   :  { %v3190_v34 = vpop.xlane.xlu0 %3189  ;;  %v5382_v18 = vpop.eup %5381  ;;  %5401 = vrsqrt.f32 %v1941_v40  ;;  %v3538_v17 = vmul.f32 %v7482_v54, %v7491_v51  ;;  %v1976_v53 = vmax.f32 %v8840_v7, 1e-24  ;;  %v8849_v50 = vld [vmem:[#allocation53_spill] sm:$0xff] }
 0x3ad   :  { %v3192_v39 = vpop.xlane.xlu1 %3191  ;;  %v7486_v32 = vpop.eup %5383  ;;  %5403 = vrsqrt.f32 %v3318_v15  ;;  %v3323_v6 = vmax.f32 %v3190_v34, 1e-24  ;;  %v3539_v2 = vmul.f32 %v3463_v28, %v7495_v58  ;;  %v7503_v41 = vmul.f32 %v5382_v18, %v6921_v12  ;;  %8836 = vst [vmem:[#allocation199_spill] sm:$0xff] %v7511_v43  ;;  %v8842_v15 = vld [vmem:[#allocation26_spill] sm:$0xff] }
 0x3ae   :  { %3585 = vadd.xlane.f32.xlu1 %v3540_v19  ;;  %3801 = vadd.xlane.f32.xlu0 %v3762_v38  ;;  %v5386_v44 = vpop.eup %5385  ;;  %5405 = vrsqrt.f32 %v1939_v16  ;;  %v3324_v46 = vmax.f32 %v3192_v39, 1e-24  ;;  %v1954_v16 = vmax.f32 %v8841_v9, 1e-24  ;;  %v7533_v34 = vmul.f32 %v7453_v62, %v8842_v15  ;;  %v8843_v19 = vld [vmem:[#allocation23_spill] sm:$0xff]  ;;  %v8851_v9 = vld [vmem:[#allocation94_spill] sm:$0xff] }
 0x3af   :  { %v5388_v5 = vpop.eup %5387  ;;  %5407 = vrsqrt.f32 %v1964_v30  ;;  %v2115_v60 = vmul.f32 %v5386_v44, %v6697_v10  ;;  %v3544_v49 = vmul.f32 %v7503_v41, %v7511_v43  ;;  %v7537_v38 = vmul.f32 %v7420_v61, %v8843_v19  ;;  %v8852_v15 = vld [vmem:[#allocation153_spill] sm:$0xff] }
 0x3b0   :  { %v7497_v45 = vpop.xlane.xlu0 %3185  ;;  %v5390_v37 = vpop.eup %5389  ;;  %5409 = vrsqrt.f32 %v1945_v36  ;;  %v3461_v21 = vmul.f32 %v5388_v5, %v8839_v55  ;;  %v1974_v19 = vmax.f32 %v8852_v15, 1e-24 }
 0x3b1   :  { %v3188_v23 = vpop.xlane.xlu1 %3187  ;;  %v7506_v4 = vpop.eup %5391  ;;  %5411 = vrsqrt.f32 %v3323_v6  ;;  %v3767_v29 = vmul.f32 %v3463_v28, %v2115_v60  ;;  %v7524_v11 = vmul.f32 %v5390_v37, %v8838_v20  ;;  %v8844_v6 = vld [vmem:[#allocation91_spill] sm:$0xff]  ;;  %v8850_v20 = vld [vmem:[#allocation138_spill] sm:$0xff] }
 0x3b2   :  { %3581 = vadd.xlane.f32.xlu1 %v3538_v17  ;;  %3583 = vadd.xlane.f32.xlu0 %v3539_v2  ;;  %v7514_v12 = vpop.eup %5393  ;;  %5413 = vrsqrt.f32 %v1962_v13  ;;  %v3322_v18 = vmax.f32 %v3188_v23, 1e-24  ;;  %v3537_v44 = vmul.f32 %v3461_v21, %v7537_v38  ;;  %v8845_v17 = vld [vmem:[#allocation147_spill] sm:$0xff]  ;;  %v8846_v13 = vld [vmem:[#allocation130_spill] sm:$0xff]  ;;  %v1965_v55 = vmax.f32 %v8850_v20, 1e-24 }
 0x3b3   :  { %v7517_v1 = vpop.eup %5395  ;;  %5415 = vrsqrt.f32 %v3315_v0  ;;  %v3542_v36 = vmul.f32 %v7524_v11, %v7533_v34  ;;  %v1967_v61 = vmax.f32 %v8845_v17, 1e-24  ;;  %v1956_v23 = vmax.f32 %v8846_v13, 1e-24  ;;  %v8847_v0 = vld [vmem:[#allocation28_spill] sm:$0xff]  ;;  %v8858_v20 = vld [vmem:[#allocation187_spill] sm:$0xff] }
 0x3b4   :  { %v7519_v56 = vpop.xlane.xlu0 %3197  ;;  %v5398_v10 = vpop.eup %5397  ;;  %5417 = vrsqrt.f32 %v3324_v46  ;;  %v7557_v60 = vmul.f32 %v7477_v14, %v8847_v0 }
 0x3b5   :  { %v7528_v40 = vpop.xlane.xlu1 %3199  ;;  %v5400_v28 = vpop.eup %5399  ;;  %5419 = vrsqrt.f32 %v1943_v24  ;;  %v7547_v62 = vmul.f32 %v5398_v10, %v8844_v6  ;;  %v8856_v6 = vld [vmem:[#allocation57_spill] sm:$0xff] }
 0x3b6   :  { %3593 = vadd.xlane.f32.xlu1 %v3544_v49  ;;  %3811 = vadd.xlane.f32.xlu0 %v3767_v29  ;;  %v7539_v30 = vpop.eup %5401  ;;  %5421 = vrsqrt.f32 %v1976_v53  ;;  %8848 = vst [vmem:[#allocation107_spill] sm:$0xff] %v7557_v60  ;;  %v2113_v24 = vmul.f32 %v5400_v28, %v8849_v50  ;;  %v3313_v49 = vmax.f32 %v7430_v42, 1e-24  ;;  %v8853_v42 = vld [vmem:[#allocation139_spill] sm:$0xff]  ;;  %v8857_v50 = vld [vmem:[#allocation96_spill] sm:$0xff] }
 0x3b7   :  { %v5404_v5 = vpop.eup %5403  ;;  %5423 = vrsqrt.f32 %v1954_v16  ;;  %v3548_v7 = vmul.f32 %v7547_v62, %v7557_v60 }
 0x3b8   :  { %v7541_v39 = vpop.xlane.xlu0 %3193  ;;  %v7552_v37 = vpop.eup %5405  ;;  %5425 = vrsqrt.f32 %v3322_v18  ;;  %v3765_v53 = vmul.f32 %v3461_v21, %v2113_v24  ;;  %v7569_v16 = vmul.f32 %v5404_v5, %v8851_v9  ;;  %v1966_v18 = vmax.f32 %v8853_v42, 1e-24  ;;  %v8860_v9 = vld [vmem:[#allocation31_spill] sm:$0xff] }
 0x3b9   :  { %v7550_v2 = vpop.xlane.xlu1 %3195  ;;  %v5408_v46 = vpop.eup %5407  ;;  %5427 = vrsqrt.f32 %v1967_v61  ;;  %v3327_v5 = vmax.f32 %v7519_v56, 1e-24  ;;  %v3325_v56 = vmax.f32 %v7541_v39, 1e-24 }
 0x3ba   :  { %3589 = vadd.xlane.f32.xlu1 %v3542_v36  ;;  %3579 = vadd.xlane.f32.xlu0 %v3537_v44  ;;  %v7561_v29 = vpop.eup %5409  ;;  %5429 = vrsqrt.f32 %v1956_v23  ;;  %v8854_v36 = vld [vmem:[#allocation30_spill] sm:$0xff]  ;;  %v2116_v21 = vmul.f32 %v5408_v46, %v8856_v6  ;;  %v1987_v46 = vmax.f32 %v8858_v20, 1e-24 }
 0x3bb   :  { %v5412_v14 = vpop.eup %5411  ;;  %v7577_v44 = vmul.f32 %v7506_v4, %v8854_v36  ;;  %5431 = vrsqrt.f32 %v3313_v49  ;;  %v8862_v36 = vld [vmem:[#allocation87_spill] sm:$0xff]  ;;  %v8863_v6 = vld [vmem:[#allocation98_spill] sm:$0xff] }
 0x3bc   :  { %v7564_v10 = vpop.xlane.xlu0 %3205  ;;  %v5414_v17 = vpop.eup %5413  ;;  %5433 = vrsqrt.f32 %v1965_v55  ;;  %v3768_v0 = vmul.f32 %v7465_v59, %v2116_v21  ;;  %v7587_v24 = vmul.f32 %v5412_v14, %v8857_v50  ;;  %v8859_v55 = vld [vmem:[#allocation54_spill] sm:$0xff]  ;;  %v7598_v59 = vmul.f32 %v7514_v12, %v8860_v9 }
 0x3bd   :  { %v7572_v28 = vpop.xlane.xlu1 %3207  ;;  %8855 = vst [vmem:[#allocation89_spill] sm:$0xff] %v7577_v44  ;;  %v5416_v61 = vpop.eup %5415  ;;  %v3546_v23 = vmul.f32 %v7569_v16, %v7577_v44  ;;  %5435 = vrsqrt.f32 %v1974_v19  ;;  %v3328_v9 = vmax.f32 %v7528_v40, 1e-24 }
 0x3be   :  { %3601 = vadd.xlane.f32.xlu1 %v3548_v7  ;;  %3807 = vadd.xlane.f32.xlu0 %v3765_v53  ;;  %v5418_v4 = vpop.eup %5417  ;;  %5437 = vrsqrt.f32 %v1966_v18  ;;  %v2114_v53 = vmul.f32 %v5414_v17, %v8859_v55  ;;  %8861 = vst [vmem:[#allocation86_spill] sm:$0xff] %v7598_v59  ;;  %v3551_v18 = vmul.f32 %v7587_v24, %v7598_v59  ;;  %v8875_v59 = vld [vmem:[#allocation161_spill] sm:$0xff] }
 0x3bf   :  { %v7592_v49 = vpop.eup %5419  ;;  %5439 = vrsqrt.f32 %v3327_v5  ;;  %v3467_v39 = vmul.f32 %v5416_v61, %v8862_v36  ;;  %v7607_v21 = vmul.f32 %v5418_v4, %v8863_v6  ;;  %v8865_v5 = vld [vmem:[#allocation144_spill] sm:$0xff]  ;;  %v8868_v61 = vld [vmem:[#allocation69_spill] sm:$0xff] }
 0x3c0   :  { %v7581_v13 = vpop.xlane.xlu0 %3201  ;;  %v5422_v14 = vpop.eup %5421  ;;  %v3766_v42 = vmul.f32 %v7482_v54, %v2114_v53  ;;  %5441 = vrsqrt.f32 %v1987_v46  ;;  %v1969_v20 = vmax.f32 %v8865_v5, 1e-24  ;;  %v8866_v54 = vld [vmem:[#allocation24_spill] sm:$0xff] }
 0x3c1   :  { %v7590_v7 = vpop.xlane.xlu1 %3203  ;;  %v7600_v15 = vpop.eup %5423  ;;  %5443 = vrsqrt.f32 %v3325_v56  ;;  %v7615_v55 = vmul.f32 %v7427_v52, %v8866_v54  ;;  %v2128_v53 = vmul.f32 %v5422_v14, %v8868_v61  ;;  %v8869_v46 = vld [vmem:[#allocation172_spill] sm:$0xff]  ;;  %v1992_v14 = vmax.f32 %v7368_v35, 1e-24 }
 0x3c2   :  { %3597 = vadd.xlane.f32.xlu1 %v3546_v23  ;;  %3813 = vadd.xlane.f32.xlu0 %v3768_v0  ;;  %v5426_v17 = vpop.eup %5425  ;;  %v8864_v23 = vld [vmem:[#allocation148_spill] sm:$0xff] }
 0x3c3   :  { %v1968_v0 = vmax.f32 %v8864_v23, 1e-24  ;;  %8867 = vst [vmem:[#allocation164_spill] sm:$0xff] %v7615_v55  ;;  %v5428_v4 = vpop.eup %5427  ;;  %v3543_v56 = vmul.f32 %v3467_v39, %v7615_v55  ;;  %v8871_v54 = vld [vmem:[#allocation60_spill] sm:$0xff] }
 0x3c4   :  { %v3214_v19 = vpop.xlane.xlu0 %3213  ;;  %v7619_v36 = vpop.eup %5429  ;;  %v2119_v61 = vmul.f32 %v5428_v4, %v8871_v54  ;;  %v1978_v4 = vmax.f32 %v8875_v59, 1e-24 }
 0x3c5   :  { %v3335_v12 = vmax.f32 %v3214_v19, 1e-24  ;;  %v7610_v50 = vpop.xlane.xlu1 %3215  ;;  %v1980_v19 = vmax.f32 %v8869_v46, 1e-24  ;;  %v5432_v52 = vpop.eup %5431  ;;  %v8872_v46 = vld [vmem:[#allocation34_spill] sm:$0xff] }
 0x3c6   :  { %3809 = vadd.xlane.f32.xlu0 %v3766_v42  ;;  %3607 = vadd.xlane.f32.xlu1 %v3551_v18  ;;  %v3780_v42 = vmul.f32 %v7607_v21, %v2128_v53  ;;  %v8870_v18 = vld [vmem:[#allocation100_spill] sm:$0xff]  ;;  %v5434_v40 = vpop.eup %5433  ;;  %v7634_v25 = vmul.f32 %v7517_v1, %v8872_v46 }
 0x3c7   :  { %5445 = vrsqrt.f32 %v3335_v12  ;;  %v3474_v23 = vmul.f32 %v5426_v17, %v8870_v18  ;;  %v3319_v12 = vmax.f32 %v7447_v48, 1e-24  ;;  %v5436_v53 = vpop.eup %5435  ;;  %v3326_v17 = vmax.f32 %v7550_v2, 1e-24  ;;  %v8874_v48 = vld [vmem:[#allocation88_spill] sm:$0xff] }
 0x3c8   :  { %v7622_v6 = vpop.xlane.xlu0 %3209  ;;  %5447 = vrsqrt.f32 %v1968_v0  ;;  %8873 = vst [vmem:[#allocation121_spill] sm:$0xff] %v7634_v25  ;;  %v5438_v0 = vpop.eup %5437  ;;  %v3771_v18 = vmul.f32 %v3467_v39, %v2119_v61  ;;  %v3331_v61 = vmax.f32 %v7564_v10, 1e-24  ;;  %v3317_v10 = vmax.f32 %v7461_v31, 1e-24 }
 0x3c9   :  { %v7628_v5 = vpop.xlane.xlu1 %3211  ;;  %5449 = vrsqrt.f32 %v1969_v20  ;;  %v3550_v20 = vmul.f32 %v3474_v23, %v7634_v25  ;;  %v3329_v25 = vmax.f32 %v7581_v13, 1e-24 }
 0x3ca   :  { %3591 = vadd.xlane.f32.xlu0 %v3543_v56  ;;  %3837 = vadd.xlane.f32.xlu1 %v3780_v42  ;;  %5451 = vrsqrt.f32 %v3328_v9  ;;  %v3465_v56 = vmul.f32 %v5432_v52, %v8874_v48  ;;  %v5440_v42 = vpop.eup %5439  ;;  %v8876_v9 = vld [vmem:[#allocation25_spill] sm:$0xff] }
 0x3cb   :  { %5453 = vrsqrt.f32 %v1980_v19  ;;  %v7644_v2 = vmul.f32 %v7445_v8, %v8876_v9  ;;  %v8877_v19 = vld [vmem:[#allocation63_spill] sm:$0xff]  ;;  %v5442_v39 = vpop.eup %5441 }
 0x3cc   :  { %v7637_v35 = vpop.xlane.xlu0 %3221  ;;  %5455 = vrsqrt.f32 %v1992_v14  ;;  %v2126_v46 = vmul.f32 %v5436_v53, %v8877_v19  ;;  %v5444_v52 = vpop.eup %5443  ;;  %v8880_v53 = vld [vmem:[#allocation35_spill] sm:$0xff] }
 0x3cd   :  { %v3224_v54 = vpop.xlane.xlu1 %3223  ;;  %5457 = vrsqrt.f32 %v3319_v12  ;;  %v3541_v59 = vmul.f32 %v3465_v56, %v7644_v2  ;;  %v8878_v12 = vld [vmem:[#allocation102_spill] sm:$0xff] }
 0x3ce   :  { %v3340_v1 = vmax.f32 %v3224_v54, 1e-24  ;;  %3819 = vadd.xlane.f32.xlu0 %v3771_v18  ;;  %3605 = vadd.xlane.f32.xlu1 %v3550_v20  ;;  %5459 = vrsqrt.f32 %v3326_v17  ;;  %v3778_v14 = vmul.f32 %v3474_v23, %v2126_v46  ;;  %v7652_v18 = vmul.f32 %v5440_v42, %v8878_v12  ;;  %v8879_v54 = vld [vmem:[#allocation155_spill] sm:$0xff]  ;;  %v8883_v23 = vld [vmem:[#allocation117_spill] sm:$0xff]  ;;  %v8884_v42 = vld [vmem:[#allocation80_spill] sm:$0xff] }
 0x3cf   :  { %v1971_v8 = vmax.f32 %v8879_v54, 1e-24  ;;  %v7659_v17 = vmul.f32 %v7539_v30, %v8880_v53  ;;  %v2139_v12 = vmul.f32 %v5442_v39, %v8884_v42  ;;  %v8885_v54 = vld [vmem:[#allocation192_spill] sm:$0xff]  ;;  %v8888_v53 = vld [vmem:[#allocation193_spill] sm:$0xff] }
 0x3d0   :  { %5461 = vrsqrt.f32 %v3340_v1  ;;  %v7648_v48 = vpop.xlane.xlu0 %3217  ;;  %v8882_v1 = vld [vmem:[#allocation55_spill] sm:$0xff]  ;;  %v8890_v42 = vld [vmem:[#allocation37_spill] sm:$0xff] }
 0x3d1   :  { %v5446_v20 = vpop.eup %5445  ;;  %5463 = vrsqrt.f32 %v1978_v4  ;;  %v7655_v9 = vpop.xlane.xlu1 %3219  ;;  %8881 = vst [vmem:[#allocation26_spill] sm:$0xff] %v7659_v17  ;;  %v2117_v19 = vmul.f32 %v5434_v40, %v8882_v1  ;;  %v1993_v4 = vmax.f32 %v8885_v54, 1e-24  ;;  %v8886_v40 = vld [vmem:[#allocation103_spill] sm:$0xff]  ;;  %v8892_v54 = vld [vmem:[#allocation56_spill] sm:$0xff] }
 0x3d2   :  { %3587 = vadd.xlane.f32.xlu0 %v3541_v59  ;;  %3833 = vadd.xlane.f32.xlu1 %v3778_v14  ;;  %v7664_v46 = vmul.f32 %v5446_v20, %v8883_v23  ;;  %v5448_v60 = vpop.eup %5447  ;;  %5465 = vrsqrt.f32 %v3331_v61  ;;  %v3555_v59 = vmul.f32 %v7652_v18, %v7659_v17  ;;  %v7676_v14 = vmul.f32 %v5444_v52, %v8886_v40  ;;  %v8893_v40 = vld [vmem:[#allocation48_spill] sm:$0xff] }
 0x3d3   :  { %v7669_v43 = vpop.eup %5449  ;;  %v3769_v31 = vmul.f32 %v3465_v56, %v2117_v19  ;;  %5467 = vrsqrt.f32 %v1971_v8  ;;  %v1994_v61 = vmax.f32 %v8888_v53, 1e-24  ;;  %v3332_v23 = vmax.f32 %v7572_v28, 1e-24  ;;  %v8889_v56 = vld [vmem:[#allocation61_spill] sm:$0xff] }
 0x3d4   :  { %v7671_v30 = vpop.xlane.xlu0 %3229  ;;  %v7679_v20 = vmul.f32 %v7664_v46, %v2139_v12  ;;  %v5452_v39 = vpop.eup %5451  ;;  %5469 = vrsqrt.f32 %v3317_v10  ;;  %v2120_v19 = vmul.f32 %v5448_v60, %v8889_v56  ;;  %v7688_v52 = vmul.f32 %v7552_v37, %v8890_v42  ;;  %v8896_v56 = vld [vmem:[#allocation156_spill] sm:$0xff] }
 0x3d5   :  { %v7682_v1 = vpop.xlane.xlu1 %3231  ;;  %v5454_v13 = vpop.eup %5453  ;;  %5471 = vrsqrt.f32 %v3329_v25  ;;  %v2118_v8 = vmul.f32 %v5438_v0, %v8892_v54  ;;  %v7693_v53 = vmul.f32 %v7600_v15, %v8893_v40  ;;  %v1972_v25 = vmax.f32 %v8896_v56, 1e-24  ;;  %v8897_v42 = vld [vmem:[#allocation180_spill] sm:$0xff]  ;;  %v8900_v56 = vld [vmem:[#allocation127_spill] sm:$0xff] }
 0x3d6   :  { %8887 = vst [vmem:[#allocation23_spill] sm:$0xff] %v7679_v20  ;;  %3815 = vadd.xlane.f32.xlu0 %v3769_v31  ;;  %3615 = vadd.xlane.f32.xlu1 %v3555_v59  ;;  %8891 = vst [vmem:[#allocation91_spill] sm:$0xff] %v7688_v52  ;;  %v5456_v12 = vpop.eup %5455  ;;  %5473 = vrsqrt.f32 %v1993_v4  ;;  %v3772_v28 = vmul.f32 %v7503_v41, %v2120_v19  ;;  %v3553_v60 = vmul.f32 %v7676_v14, %v7688_v52  ;;  %v8895_v31 = vld [vmem:[#allocation104_spill] sm:$0xff]  ;;  %v8898_v41 = vld [vmem:[#allocation73_spill] sm:$0xff] }
 0x3d7   :  { %8894 = vst [vmem:[#allocation147_spill] sm:$0xff] %v7693_v53  ;;  %v5458_v17 = vpop.eup %5457  ;;  %v7699_v59 = vmul.f32 %v5452_v39, %v8895_v31  ;;  %v1984_v0 = vmax.f32 %v8897_v42, 1e-24  ;;  %5475 = vrsqrt.f32 %v1994_v61  ;;  %v2132_v19 = vmul.f32 %v5454_v13, %v8898_v41  ;;  %v8899_v20 = vld [vmem:[#allocation85_spill] sm:$0xff] }
 0x3d8   :  { %v3226_v10 = vpop.xlane.xlu0 %3225  ;;  %v5460_v37 = vpop.eup %5459  ;;  %5477 = vrsqrt.f32 %v3332_v23  ;;  %v2144_v52 = vmul.f32 %v5456_v12, %v8899_v20  ;;  %v3330_v39 = vmax.f32 %v7590_v7, 1e-24  ;;  %v3770_v31 = vmul.f32 %v7524_v11, %v2118_v8  ;;  %v8903_v20 = vld [vmem:[#allocation169_spill] sm:$0xff] }
 0x3d9   :  { %v3341_v54 = vmax.f32 %v3226_v10, 1e-24  ;;  %v3228_v15 = vpop.xlane.xlu1 %3227  ;;  %v3784_v23 = vmul.f32 %v7699_v59, %v2132_v19  ;;  %v8901_v10 = vld [vmem:[#allocation90_spill] sm:$0xff]  ;;  %v1982_v12 = vmax.f32 %v8903_v20, 1e-24 }
 0x3da   :  { %v5462_v40 = vpop.eup %5461  ;;  %v3342_v4 = vmax.f32 %v3228_v15, 1e-24  ;;  %3821 = vadd.xlane.f32.xlu0 %v3772_v28  ;;  %3611 = vadd.xlane.f32.xlu1 %v3553_v60  ;;  %v3471_v28 = vmul.f32 %v5458_v17, %v8901_v10  ;;  %v8902_v60 = vld [vmem:[#allocation106_spill] sm:$0xff] }
 0x3db   :  { %v5464_v44 = vpop.eup %5463  ;;  %5479 = vrsqrt.f32 %v3341_v54  ;;  %v3492_v42 = vmul.f32 %v5462_v40, %v8900_v56  ;;  %v7713_v15 = vmul.f32 %v5460_v37, %v8902_v60  ;;  %v8906_v54 = vld [vmem:[#allocation112_spill] sm:$0xff]  ;;  %v8909_v37 = vld [vmem:[#allocation67_spill] sm:$0xff] }
 0x3dc   :  { %5481 = vrsqrt.f32 %v3342_v4  ;;  %v7708_v61 = vpop.xlane.xlu0 %3237  ;;  %v5466_v13 = vpop.eup %5465  ;;  %v1949_v40 = vmax.f32 %v8906_v54, 1e-24  ;;  %v8907_v4 = vld [vmem:[#allocation27_spill] sm:$0xff]  ;;  %v2130_v41 = vmul.f32 %v5464_v44, %v8909_v37 }
 0x3dd   :  { %5483 = vrsqrt.f32 %v1984_v0  ;;  %v7716_v7 = vpop.xlane.xlu1 %3239  ;;  %v7719_v11 = vmul.f32 %v3492_v42, %v7693_v53  ;;  %v7721_v8 = vmul.f32 %v3492_v42, %v2144_v52  ;;  %v7726_v17 = vmul.f32 %v7474_v3, %v8907_v4  ;;  %v5468_v19 = vpop.eup %5467  ;;  %v8910_v56 = vld [vmem:[#allocation115_spill] sm:$0xff]  ;;  %v8912_v3 = vld [vmem:[#allocation145_spill] sm:$0xff] }
 0x3de   :  { %3817 = vadd.xlane.f32.xlu0 %v3770_v31  ;;  %3845 = vadd.xlane.f32.xlu1 %v3784_v23  ;;  %v1947_v0 = vmax.f32 %v8910_v56, 1e-24  ;;  %5485 = vrsqrt.f32 %v3330_v39  ;;  %v5470_v10 = vpop.eup %5469  ;;  %v3782_v42 = vmul.f32 %v7713_v15, %v2130_v41  ;;  %v8911_v31 = vld [vmem:[#allocation109_spill] sm:$0xff]  ;;  %v1970_v54 = vmax.f32 %v8912_v3, 1e-24  ;;  %v8914_v37 = vld [vmem:[#allocation39_spill] sm:$0xff] }
 0x3df   :  { %8904 = vst [vmem:[#allocation130_spill] sm:$0xff] %v7719_v11  ;;  %8905 = vst [vmem:[#allocation28_spill] sm:$0xff] %v7721_v8  ;;  %5487 = vrsqrt.f32 %v1972_v25  ;;  %v3547_v52 = vmul.f32 %v3471_v28, %v7726_v17  ;;  %v7735_v23 = vmul.f32 %v5466_v13, %v8911_v31  ;;  %v5472_v20 = vpop.eup %5471  ;;  %v8913_v25 = vld [vmem:[#allocation64_spill] sm:$0xff]  ;;  %v7743_v56 = vmul.f32 %v7561_v29, %v8914_v37  ;;  %v8916_v53 = vld [vmem:[#allocation95_spill] sm:$0xff] }
 0x3e0   :  { %8908 = vst [vmem:[#allocation53_spill] sm:$0xff] %v7726_v17  ;;  %v7730_v60 = vpop.xlane.xlu0 %3233  ;;  %5489 = vrsqrt.f32 %v1982_v12  ;;  %v5474_v4 = vpop.eup %5473  ;;  %v2123_v39 = vmul.f32 %v5468_v19, %v8913_v25  ;;  %v1935_v13 = vmax.f32 %v8916_v53, 1e-24  ;;  %v3333_v31 = vmax.f32 %v7622_v6, 1e-24  ;;  %v8918_v19 = vld [vmem:[#allocation110_spill] sm:$0xff] }
 0x3e1   :  { %v7738_v44 = vpop.xlane.xlu1 %3235  ;;  %5491 = vrsqrt.f32 %v1949_v40  ;;  %8915 = vst [vmem:[#allocation138_spill] sm:$0xff] %v7743_v56  ;;  %v5476_v41 = vpop.eup %5475  ;;  %v3559_v40 = vmul.f32 %v7735_v23, %v7743_v56  ;;  %v7753_v25 = vmul.f32 %v5472_v20, %v8918_v19  ;;  %v8919_v37 = vld [vmem:[#allocation163_spill] sm:$0xff]  ;;  %v8921_v17 = vld [vmem:[#allocation41_spill] sm:$0xff]  ;;  %v8923_v20 = vld [vmem:[#allocation132_spill] sm:$0xff] }
 0x3e2   :  { %3599 = vadd.xlane.f32.xlu0 %v3547_v52  ;;  %3841 = vadd.xlane.f32.xlu1 %v3782_v42  ;;  %5493 = vrsqrt.f32 %v1947_v0  ;;  %v5478_v3 = vpop.eup %5477  ;;  %v3775_v8 = vmul.f32 %v3471_v28, %v2123_v39  ;;  %v8917_v52 = vld [vmem:[#allocation92_spill] sm:$0xff]  ;;  %v1975_v11 = vmax.f32 %v8919_v37, 1e-24  ;;  %v8920_v0 = vld [vmem:[#allocation29_spill] sm:$0xff]  ;;  %v7764_v28 = vmul.f32 %v7592_v49, %v8921_v17  ;;  %v8925_v37 = vld [vmem:[#allocation82_spill] sm:$0xff] }
 0x3e3   :  { %v3469_v42 = vmul.f32 %v5470_v10, %v8917_v52  ;;  %5495 = vrsqrt.f32 %v1970_v54  ;;  %v7760_v6 = vmul.f32 %v7486_v32, %v8920_v0  ;;  %v3321_v10 = vmax.f32 %v7497_v45, 1e-24  ;;  %v8924_v54 = vld [vmem:[#allocation52_spill] sm:$0xff]  ;;  %v8926_v49 = vld [vmem:[#allocation134_spill] sm:$0xff] }
 0x3e4   :  { %v7747_v12 = vpop.xlane.xlu0 %3245  ;;  %8922 = vst [vmem:[#allocation94_spill] sm:$0xff] %v7764_v28  ;;  %v7772_v19 = vmul.f32 %v7619_v36, %v8924_v54  ;;  %v2145_v56 = vmul.f32 %v5474_v4, %v8925_v37  ;;  %5497 = vrsqrt.f32 %v3333_v31  ;;  %v3334_v0 = vmax.f32 %v7628_v5, 1e-24  ;;  %v8930_v5 = vld [vmem:[#allocation177_spill] sm:$0xff] }
 0x3e5   :  { %v5480_v29 = vpop.eup %5479  ;;  %v7756_v53 = vpop.xlane.xlu1 %3247  ;;  %v2146_v55 = vmul.f32 %v5476_v41, %v8927_v33  ;;  %5499 = vrsqrt.f32 %v1975_v11  ;;  %v3344_v11 = vmax.f32 %v7682_v1, 1e-24 }
 0x3e6   :  { %v5482_v39 = vpop.eup %5481  ;;  %3827 = vadd.xlane.f32.xlu0 %v3775_v8  ;;  %3623 = vadd.xlane.f32.xlu1 %v3559_v40  ;;  %v7768_v52 = vmul.f32 %v5480_v29, %v8923_v20  ;;  %v3545_v8 = vmul.f32 %v3469_v42, %v7760_v6  ;;  %v3557_v40 = vmul.f32 %v7753_v25, %v7764_v28  ;;  %v8928_v29 = vld [vmem:[#allocation111_spill] sm:$0xff]  ;;  %v1986_v20 = vmax.f32 %v8930_v5, 1e-24 }
 0x3e7   :  { %v5484_v32 = vpop.eup %5483  ;;  %v3494_v17 = vmul.f32 %v5482_v39, %v8926_v49  ;;  %v7784_v36 = vmul.f32 %v5478_v3, %v8928_v29  ;;  %5501 = vrsqrt.f32 %v3321_v10  ;;  %v8933_v3 = vld [vmem:[#allocation58_spill] sm:$0xff] }
 0x3e8   :  { %v7778_v45 = vpop.xlane.xlu0 %3241  ;;  %v7787_v4 = vmul.f32 %v7768_v52, %v2145_v56  ;;  %v5486_v31 = vpop.eup %5485  ;;  %v2121_v37 = vmul.f32 %v7669_v43, %v8933_v3  ;;  %v8934_v56 = vld [vmem:[#allocation77_spill] sm:$0xff]  ;;  %5503 = vrsqrt.f32 %v3334_v0  ;;  %v8938_v0 = vld [vmem:[#allocation71_spill] sm:$0xff] }
 0x3e9   :  { %v7790_v39 = vpop.xlane.xlu1 %3243  ;;  %v7793_v33 = vmul.f32 %v3494_v17, %v7772_v19  ;;  %v7795_v41 = vmul.f32 %v3494_v17, %v2146_v55  ;;  %v5488_v54 = vpop.eup %5487  ;;  %v2136_v49 = vmul.f32 %v5484_v32, %v8934_v56  ;;  %5505 = vrsqrt.f32 %v1935_v13  ;;  %v8935_v17 = vld [vmem:[#allocation114_spill] sm:$0xff]  ;;  %v8937_v32 = vld [vmem:[#allocation65_spill] sm:$0xff] }
 0x3ea   :  { %8929 = vst [vmem:[#allocation153_spill] sm:$0xff] %v7787_v4  ;;  %3595 = vadd.xlane.f32.xlu0 %v3545_v8  ;;  %3619 = vadd.xlane.f32.xlu1 %v3557_v40  ;;  %v5490_v29 = vpop.eup %5489  ;;  %v7805_v10 = vmul.f32 %v5486_v31, %v8935_v17  ;;  %v8936_v40 = vld [vmem:[#allocation152_spill] sm:$0xff]  ;;  %5507 = vrsqrt.f32 %v1986_v20  ;;  %v2124_v1 = vmul.f32 %v5488_v54, %v8937_v32  ;;  %v8939_v20 = vld [vmem:[#allocation93_spill] sm:$0xff] }
 0x3eb   :  { %8931 = vst [vmem:[#allocation139_spill] sm:$0xff] %v7793_v33  ;;  %8932 = vst [vmem:[#allocation30_spill] sm:$0xff] %v7795_v41  ;;  %v5492_v5 = vpop.eup %5491  ;;  %v3773_v33 = vmul.f32 %v3469_v42, %v2121_v37  ;;  %v3788_v55 = vmul.f32 %v7784_v36, %v2136_v49  ;;  %v1973_v41 = vmax.f32 %v8936_v40, 1e-24  ;;  %v2134_v13 = vmul.f32 %v5490_v29, %v8938_v0  ;;  %v8941_v29 = vld [vmem:[#allocation59_spill] sm:$0xff] }
 0x3ec   :  { %v7801_v4 = vpop.xlane.xlu0 %3253  ;;  %v5494_v8 = vpop.eup %5493  ;;  %5509 = vrsqrt.f32 %v3344_v11  ;;  %v3347_v42 = vmax.f32 %v7708_v61, 1e-24  ;;  %v3776_v31 = vmul.f32 %v7547_v62, %v2124_v1  ;;  %v1938_v17 = vmax.f32 %v8939_v20, 1e-24  ;;  %v8942_v40 = vld [vmem:[#allocation43_spill] sm:$0xff]  ;;  %v8944_v20 = vld [vmem:[#allocation118_spill] sm:$0xff] }
 0x3ed   :  { %v7808_v43 = vpop.xlane.xlu1 %3255  ;;  %v5496_v3 = vpop.eup %5495  ;;  %v3786_v56 = vmul.f32 %v7805_v10, %v2134_v13  ;;  %5511 = vrsqrt.f32 %v1973_v41  ;;  %v7823_v61 = vmul.f32 %v5492_v5, %v8942_v40  ;;  %v3337_v62 = vmax.f32 %v7648_v48, 1e-24  ;;  %v8947_v48 = vld [vmem:[#allocation68_spill] sm:$0xff]  ;;  %v8948_v40 = vld [vmem:[#allocation45_spill] sm:$0xff] }
 0x3ee   :  { %3823 = vadd.xlane.f32.xlu0 %v3773_v33  ;;  %3853 = vadd.xlane.f32.xlu1 %v3788_v55  ;;  %v5498_v49 = vpop.eup %5497  ;;  %v8940_v55 = vld [vmem:[#allocation123_spill] sm:$0xff]  ;;  %v2122_v11 = vmul.f32 %v5496_v3, %v8941_v29  ;;  %5513 = vrsqrt.f32 %v3347_v42 }
 0x3ef   :  { %v1951_v54 = vmax.f32 %v8940_v55, 1e-24  ;;  %8943 = vst [vmem:[#allocation57_spill] sm:$0xff] %v7823_v61  ;;  %v5500_v32 = vpop.eup %5499  ;;  %v3563_v13 = vmul.f32 %v7664_v46, %v7823_v61  ;;  %5515 = vrsqrt.f32 %v1938_v17  ;;  %v8945_v3 = vld [vmem:[#allocation171_spill] sm:$0xff]  ;;  %v8950_v46 = vld [vmem:[#allocation160_spill] sm:$0xff] }
 0x3f0   :  { %v7813_v37 = vpop.xlane.xlu0 %3249  ;;  %v3774_v41 = vmul.f32 %v7569_v16, %v2122_v11  ;;  %v1979_v5 = vmax.f32 %v8945_v3, 1e-24  ;;  %v2127_v42 = vmul.f32 %v5500_v32, %v8947_v48  ;;  %v7839_v16 = vmul.f32 %v5494_v8, %v8948_v40  ;;  %v8952_v3 = vld [vmem:[#allocation122_spill] sm:$0xff]  ;;  %v8953_v48 = vld [vmem:[#allocation188_spill] sm:$0xff] }
 0x3f1   :  { %v7818_v33 = vpop.xlane.xlu1 %3251  ;;  %v5502_v1 = vpop.eup %5501  ;;  %5517 = vrsqrt.f32 %v1951_v54  ;;  %v1977_v61 = vmax.f32 %v8950_v46, 1e-24  ;;  %v1988_v40 = vmax.f32 %v8953_v48, 1e-24 }
 0x3f2   :  { %3829 = vadd.xlane.f32.xlu0 %v3776_v31  ;;  %3849 = vadd.xlane.f32.xlu1 %v3786_v56  ;;  %v7832_v31 = vmul.f32 %v5498_v49, %v8944_v20  ;;  %v5504_v56 = vpop.eup %5503  ;;  %8949 = vst [vmem:[#allocation187_spill] sm:$0xff] %v7839_v16  ;;  %v3336_v49 = vmax.f32 %v7610_v50, 1e-24  ;;  %5519 = vrsqrt.f32 %v3337_v62  ;;  %v3779_v20 = vmul.f32 %v7587_v24, %v2127_v42  ;;  %v8954_v50 = vld [vmem:[#allocation33_spill] sm:$0xff]  ;;  %v8956_v24 = vld [vmem:[#allocation75_spill] sm:$0xff] }
 0x3f3   :  { %v5506_v29 = vpop.eup %5505  ;;  %v7850_v32 = vmul.f32 %v5504_v56, %v8952_v3  ;;  %5521 = vrsqrt.f32 %v1979_v5 }
 0x3f4   :  { %v7826_v0 = vpop.xlane.xlu0 %3261  ;;  %v5508_v11 = vpop.eup %5507  ;;  %v3561_v54 = vmul.f32 %v7832_v31, %v7839_v16  ;;  %v7856_v62 = vmul.f32 %v5506_v29, %v8954_v50  ;;  %v8957_v16 = vld [vmem:[#allocation99_spill] sm:$0xff]  ;;  %5523 = vrsqrt.f32 %v3336_v49  ;;  %v8959_v29 = vld [vmem:[#allocation120_spill] sm:$0xff]  ;;  %v8961_v50 = vld [vmem:[#allocation101_spill] sm:$0xff] }
 0x3f5   :  { %v7835_v55 = vpop.xlane.xlu1 %3263  ;;  %v2138_v42 = vmul.f32 %v5508_v11, %v8956_v24  ;;  %5525 = vrsqrt.f32 %v1977_v61  ;;  %v1953_v48 = vmax.f32 %v8959_v29, 1e-24  ;;  %v3338_v24 = vmax.f32 %v7655_v9, 1e-24 }
 0x3f6   :  { %8946 = vst [vmem:[#allocation96_spill] sm:$0xff] %v7835_v55  ;;  %3825 = vadd.xlane.f32.xlu0 %v3774_v41  ;;  %3631 = vadd.xlane.f32.xlu1 %v3563_v13  ;;  %v8951_v41 = vld [vmem:[#allocation97_spill] sm:$0xff]  ;;  %v5510_v8 = vpop.eup %5509  ;;  %8955 = vst [vmem:[#allocation54_spill] sm:$0xff] %v7856_v62  ;;  %v1942_v55 = vmax.f32 %v8957_v16, 1e-24  ;;  %5527 = vrsqrt.f32 %v1988_v40  ;;  %v8963_v40 = vld [vmem:[#allocation135_spill] sm:$0xff] }
 0x3f7   :  { %v3473_v13 = vmul.f32 %v5502_v1, %v8951_v41  ;;  %v5512_v28 = vpop.eup %5511  ;;  %v3339_v1 = vmax.f32 %v7637_v35, 1e-24  ;;  %v3790_v41 = vmul.f32 %v7850_v32, %v2138_v42  ;;  %v1940_v16 = vmax.f32 %v8961_v50, 1e-24  ;;  %v8962_v35 = vld [vmem:[#allocation62_spill] sm:$0xff]  ;;  %v8964_v50 = vld [vmem:[#allocation185_spill] sm:$0xff] }
 0x3f8   :  { %v7843_v17 = vpop.xlane.xlu0 %3257  ;;  %v5514_v3 = vpop.eup %5513  ;;  %v2125_v61 = vmul.f32 %v5512_v28, %v8962_v35  ;;  %v8965_v28 = vld [vmem:[#allocation32_spill] sm:$0xff] }
 0x3f9   :  { %v7853_v46 = vpop.xlane.xlu1 %3259  ;;  %v3549_v5 = vmul.f32 %v3473_v13, %v7856_v62  ;;  %v5516_v49 = vpop.eup %5515  ;;  %5529 = vrsqrt.f32 %v3339_v1  ;;  %v3499_v29 = vmul.f32 %v5514_v3, %v8963_v40  ;;  %v8967_v1 = vld [vmem:[#allocation129_spill] sm:$0xff]  ;;  %v8968_v3 = vld [vmem:[#allocation126_spill] sm:$0xff] }
 0x3fa   :  { %3835 = vadd.xlane.f32.xlu0 %v3779_v20  ;;  %3627 = vadd.xlane.f32.xlu1 %v3561_v54  ;;  %v8958_v20 = vld [vmem:[#allocation133_spill] sm:$0xff]  ;;  %5531 = vrsqrt.f32 %v1942_v55  ;;  %v7880_v9 = vmul.f32 %v5516_v49, %v8965_v28 }
 0x3fb   :  { %v3496_v54 = vmul.f32 %v5510_v8, %v8958_v20  ;;  %v5518_v62 = vpop.eup %5517  ;;  %v3777_v8 = vmul.f32 %v3473_v13, %v2125_v61  ;;  %5533 = vrsqrt.f32 %v1953_v48  ;;  %v1955_v13 = vmax.f32 %v8967_v1, 1e-24  ;;  %v8969_v61 = vld [vmem:[#allocation179_spill] sm:$0xff] }
 0x3fc   :  { %v7861_v56 = vpop.xlane.xlu0 %3269  ;;  %5535 = vrsqrt.f32 %v1940_v16  ;;  %8966 = vst [vmem:[#allocation87_spill] sm:$0xff] %v7880_v9  ;;  %v8973_v1 = vld [vmem:[#allocation119_spill] sm:$0xff] }
 0x3fd   :  { %v7867_v11 = vpop.xlane.xlu1 %3271  ;;  %v3648_v20 = vmul.f32 %v3496_v54, %v7458_v47  ;;  %5537 = vrsqrt.f32 %v3338_v24  ;;  %v3552_v47 = vmul.f32 %v7607_v21, %v7880_v9  ;;  %v3651_v54 = vmul.f32 %v3499_v29, %v7537_v38  ;;  %v8970_v24 = vld [vmem:[#allocation72_spill] sm:$0xff] }
 0x3fe   :  { %8960 = vst [vmem:[#allocation31_spill] sm:$0xff] %v7867_v11  ;;  %3603 = vadd.xlane.f32.xlu0 %v3549_v5  ;;  %3857 = vadd.xlane.f32.xlu1 %v3790_v41  ;;  %v5520_v11 = vpop.eup %5519  ;;  %v1990_v5 = vmax.f32 %v8964_v50, 1e-24  ;;  %v8971_v50 = vld [vmem:[#allocation49_spill] sm:$0xff]  ;;  %v3348_v38 = vmax.f32 %v7716_v7, 1e-24 }
 0x3ff   :  { %v5522_v55 = vpop.eup %5521  ;;  %v7889_v48 = vmul.f32 %v5520_v11, %v8968_v3  ;;  %v7896_v28 = vmul.f32 %v5518_v62, %v8971_v50  ;;  %v8976_v7 = vld [vmem:[#allocation66_spill] sm:$0xff] }
 0x400   :  { %v7872_v42 = vpop.xlane.xlu0 %3265  ;;  %v5524_v16 = vpop.eup %5523  ;;  %5539 = vrsqrt.f32 %v1990_v5  ;;  %v2131_v40 = vmul.f32 %v5522_v55, %v8970_v24  ;;  %v8977_v24 = vld [vmem:[#allocation81_spill] sm:$0xff] }
 0x401   :  { %v7877_v41 = vpop.xlane.xlu1 %3267  ;;  %8972 = vst [vmem:[#allocation98_spill] sm:$0xff] %v7896_v28  ;;  %5541 = vrsqrt.f32 %v1955_v13  ;;  %v3565_v5 = vmul.f32 %v7889_v48, %v7896_v28  ;;  %v7905_v3 = vmul.f32 %v5524_v16, %v8973_v1 }
 0x402   :  { %3831 = vadd.xlane.f32.xlu0 %v3777_v8  ;;  %3687 = vadd.xlane.f32.xlu1 %v3648_v20  ;;  %v1983_v8 = vmax.f32 %v8969_v61, 1e-24  ;;  %v5526_v20 = vpop.eup %5525  ;;  %v3783_v29 = vmul.f32 %v7652_v18, %v2131_v40  ;;  %v3346_v40 = vmax.f32 %v7738_v44, 1e-24 }
 0x403   :  { %v5528_v21 = vpop.eup %5527  ;;  %v2129_v13 = vmul.f32 %v5526_v20, %v8976_v7 }
 0x404   :  { %v7883_v35 = vpop.xlane.xlu0 %3277  ;;  %5543 = vrsqrt.f32 %v1983_v8  ;;  %v2140_v50 = vmul.f32 %v5528_v21, %v8977_v24  ;;  %v8980_v21 = vld [vmem:[#allocation36_spill] sm:$0xff] }
 0x405   :  { %v7892_v49 = vpop.xlane.xlu1 %3279  ;;  %5545 = vrsqrt.f32 %v3348_v38  ;;  %v3781_v1 = vmul.f32 %v7676_v14, %v2129_v13  ;;  %v8982_v38 = vld [vmem:[#allocation47_spill] sm:$0xff]  ;;  %v3351_v13 = vmax.f32 %v7747_v12, 1e-24  ;;  %v8986_v12 = vld [vmem:[#allocation38_spill] sm:$0xff] }
 0x406   :  { %3609 = vadd.xlane.f32.xlu0 %v3552_v47  ;;  %3693 = vadd.xlane.f32.xlu1 %v3651_v54  ;;  %v5530_v47 = vpop.eup %5529  ;;  %v8974_v54 = vld [vmem:[#allocation168_spill] sm:$0xff]  ;;  %v3792_v8 = vmul.f32 %v7905_v3, %v2140_v50 }
 0x407   :  { %v1981_v55 = vmax.f32 %v8974_v54, 1e-24  ;;  %v5532_v61 = vpop.eup %5531  ;;  %v8978_v54 = vld [vmem:[#allocation125_spill] sm:$0xff]  ;;  %v8984_v50 = vld [vmem:[#allocation128_spill] sm:$0xff] }
 0x408   :  { %v7899_v11 = vpop.xlane.xlu0 %3273  ;;  %v5534_v18 = vpop.eup %5533  ;;  %v7918_v9 = vmul.f32 %v5530_v47, %v8978_v54  ;;  %v7924_v44 = vmul.f32 %v5532_v61, %v8980_v21  ;;  %v8985_v61 = vld [vmem:[#allocation108_spill] sm:$0xff] }
 0x409   :  { %v7908_v62 = vpop.xlane.xlu1 %3275  ;;  %v5536_v28 = vpop.eup %5535  ;;  %5547 = vrsqrt.f32 %v1981_v55  ;;  %v7927_v7 = vmul.f32 %v5534_v18, %v8982_v38  ;;  %v3349_v38 = vmax.f32 %v7778_v45, 1e-24 }
 0x40a   :  { %8975 = vst [vmem:[#allocation148_spill] sm:$0xff] %v7908_v62  ;;  %3843 = vadd.xlane.f32.xlu0 %v3783_v29  ;;  %3635 = vadd.xlane.f32.xlu1 %v3565_v5  ;;  %v5538_v29 = vpop.eup %5537  ;;  %v8979_v5 = vld [vmem:[#allocation105_spill] sm:$0xff]  ;;  %8981 = vst [vmem:[#allocation144_spill] sm:$0xff] %v7924_v44  ;;  %5549 = vrsqrt.f32 %v3346_v40  ;;  %v3556_v24 = vmul.f32 %v7699_v59, %v7924_v44  ;;  %v7943_v40 = vmul.f32 %v5536_v28, %v8986_v12  ;;  %v8990_v28 = vld [vmem:[#allocation51_spill] sm:$0xff] }
 0x40b   :  { %v1946_v62 = vmax.f32 %v8979_v5, 1e-24  ;;  %8983 = vst [vmem:[#allocation24_spill] sm:$0xff] %v7927_v7  ;;  %v5540_v14 = vpop.eup %5539  ;;  %v3567_v55 = vmul.f32 %v7918_v9, %v7927_v7  ;;  %v8987_v5 = vld [vmem:[#allocation79_spill] sm:$0xff] }
 0x40c   :  { %v7913_v16 = vpop.xlane.xlu0 %3285  ;;  %v5542_v54 = vpop.eup %5541  ;;  %v2142_v21 = vmul.f32 %v5540_v14, %v8987_v5 }
 0x40d   :  { %v7921_v20 = vpop.xlane.xlu1 %3287  ;;  %5551 = vrsqrt.f32 %v1946_v62  ;;  %v7956_v14 = vmul.f32 %v5542_v54, %v8990_v28  ;;  %v3343_v54 = vmax.f32 %v7671_v30, 1e-24  ;;  %v3345_v30 = vmax.f32 %v7730_v60, 1e-24 }
 0x40e   :  { %3839 = vadd.xlane.f32.xlu0 %v3781_v1  ;;  %3861 = vadd.xlane.f32.xlu1 %v3792_v8  ;;  %v7937_v1 = vmul.f32 %v5538_v29, %v8984_v50  ;;  %v1944_v8 = vmax.f32 %v8985_v61, 1e-24  ;;  %v5544_v59 = vpop.eup %5543  ;;  %5553 = vrsqrt.f32 %v3351_v13  ;;  %v3554_v29 = vmul.f32 %v7713_v15, %v7943_v40  ;;  %v8988_v61 = vld [vmem:[#allocation176_spill] sm:$0xff] }
 0x40f   :  { %v5546_v50 = vpop.eup %5545  ;;  %v1985_v7 = vmax.f32 %v8988_v61, 1e-24  ;;  %v8991_v13 = vld [vmem:[#allocation76_spill] sm:$0xff]  ;;  %v3352_v15 = vmax.f32 %v7756_v53, 1e-24 }
 0x410   :  { %v7930_v47 = vpop.xlane.xlu0 %3281  ;;  %v3794_v62 = vmul.f32 %v7937_v1, %v2142_v21  ;;  %5555 = vrsqrt.f32 %v1944_v8  ;;  %v2135_v45 = vmul.f32 %v5544_v59, %v8991_v13  ;;  %v3569_v8 = vmul.f32 %v7768_v52, %v7956_v14  ;;  %v8992_v21 = vld [vmem:[#allocation137_spill] sm:$0xff]  ;;  %v8994_v59 = vld [vmem:[#allocation70_spill] sm:$0xff] }
 0x411   :  { %v7940_v18 = vpop.xlane.xlu1 %3283  ;;  %5557 = vrsqrt.f32 %v3349_v38  ;;  %v3500_v61 = vmul.f32 %v5546_v50, %v8992_v21  ;;  %v3350_v52 = vmax.f32 %v7790_v39, 1e-24 }
 0x412   :  { %3617 = vadd.xlane.f32.xlu0 %v3556_v24  ;;  %3639 = vadd.xlane.f32.xlu1 %v3567_v55  ;;  %v3787_v5 = vmul.f32 %v7735_v23, %v2135_v45  ;;  %5559 = vrsqrt.f32 %v1985_v7 }
 0x413   :  { %v5548_v12 = vpop.eup %5547  ;;  %5561 = vrsqrt.f32 %v3352_v15  ;;  %v3652_v23 = vmul.f32 %v3500_v61, %v7491_v51  ;;  %v3355_v51 = vmax.f32 %v7801_v4, 1e-24  ;;  %v3353_v4 = vmax.f32 %v7813_v37, 1e-24 }
 0x414   :  { %v7951_v24 = vpop.xlane.xlu0 %3293  ;;  %v5550_v44 = vpop.eup %5549  ;;  %v2133_v53 = vmul.f32 %v5548_v12, %v8994_v59  ;;  %v8996_v12 = vld [vmem:[#allocation40_spill] sm:$0xff] }
 0x415   :  { %v7953_v55 = vpop.xlane.xlu1 %3295 }
 0x416   :  { %8989 = vst [vmem:[#allocation69_spill] sm:$0xff] %v7953_v55  ;;  %3613 = vadd.xlane.f32.xlu0 %v3554_v29  ;;  %3865 = vadd.xlane.f32.xlu1 %v3794_v62  ;;  %v8993_v55 = vld [vmem:[#allocation116_spill] sm:$0xff]  ;;  %v3785_v50 = vmul.f32 %v7753_v25, %v2133_v53  ;;  %v8999_v53 = vld [vmem:[#allocation142_spill] sm:$0xff] }
 0x417   :  { %v1948_v29 = vmax.f32 %v8993_v55, 1e-24  ;;  %v5552_v38 = vpop.eup %5551  ;;  %v8995_v55 = vld [vmem:[#allocation140_spill] sm:$0xff] }
 0x418   :  { %v7970_v28 = vpop.xlane.xlu0 %3289  ;;  %v3498_v7 = vmul.f32 %v5550_v44, %v8995_v55  ;;  %v5554_v13 = vpop.eup %5553  ;;  %v7977_v15 = vmul.f32 %v5552_v38, %v8996_v12  ;;  %v9001_v55 = vld [vmem:[#allocation74_spill] sm:$0xff] }
 0x419   :  { %v7965_v62 = vpop.xlane.xlu1 %3291  ;;  %5563 = vrsqrt.f32 %v1948_v29  ;;  %v8998_v29 = vld [vmem:[#allocation42_spill] sm:$0xff] }
 0x41a   :  { %3643 = vadd.xlane.f32.xlu1 %v3569_v8  ;;  %3851 = vadd.xlane.f32.xlu0 %v3787_v5  ;;  %5565 = vrsqrt.f32 %v3343_v54  ;;  %v5556_v39 = vpop.eup %5555  ;;  %v3650_v25 = vmul.f32 %v3498_v7, %v7438_v63  ;;  %v3560_v44 = vmul.f32 %v7784_v36, %v7977_v15  ;;  %v8997_v5 = vld [vmem:[#allocation141_spill] sm:$0xff] }
 0x41b   :  { %5567 = vrsqrt.f32 %v3350_v52  ;;  %v3503_v21 = vmul.f32 %v5554_v13, %v8997_v5  ;;  %v5558_v61 = vpop.eup %5557  ;;  %v7987_v54 = vmul.f32 %v5556_v39, %v8998_v29 }
 0x41c   :  { %v7984_v60 = vpop.xlane.xlu0 %3301  ;;  %v5560_v59 = vpop.eup %5559  ;;  %v3501_v38 = vmul.f32 %v5558_v61, %v8999_v53 }
 0x41d   :  { %v3304_v45 = vpop.xlane.xlu1 %3303  ;;  %v3655_v63 = vmul.f32 %v3503_v21, %v7644_v2  ;;  %v3558_v36 = vmul.f32 %v7805_v10, %v7987_v54  ;;  %v5562_v52 = vpop.eup %5561  ;;  %v2137_v7 = vmul.f32 %v5560_v59, %v9001_v55  ;;  %v9005_v59 = vld [vmem:[#allocation146_spill] sm:$0xff]  ;;  %v9008_v55 = vld [vmem:[#allocation149_spill] sm:$0xff] }
 0x41e   :  { %v3380_v8 = vmax.f32 %v3304_v45, 1e-24  ;;  %3695 = vadd.xlane.f32.xlu1 %v3652_v23  ;;  %3847 = vadd.xlane.f32.xlu0 %v3785_v50  ;;  %v9000_v23 = vld [vmem:[#allocation113_spill] sm:$0xff]  ;;  %v3356_v45 = vmax.f32 %v7808_v43, 1e-24  ;;  %v3653_v2 = vmul.f32 %v3501_v38, %v7495_v58  ;;  %v9007_v38 = vld [vmem:[#allocation124_spill] sm:$0xff] }
 0x41f   :  { %v1950_v50 = vmax.f32 %v9000_v23, 1e-24  ;;  %v3789_v10 = vmul.f32 %v7832_v31, %v2137_v7  ;;  %v3354_v43 = vmax.f32 %v7818_v33, 1e-24 }
 0x420   :  { %5569 = vrsqrt.f32 %v3380_v8  ;;  %v9002_v8 = vld [vmem:[#allocation143_spill] sm:$0xff] }
 0x421   :  { %5571 = vrsqrt.f32 %v3345_v30  ;;  %v7997_v30 = vpop.xlane.xlu0 %3297  ;;  %v3504_v12 = vmul.f32 %v5562_v52, %v9002_v8  ;;  %v8006_v5 = vpop.xlane.xlu1 %3299  ;;  %v1952_v52 = vmax.f32 %v9007_v38, 1e-24 }
 0x422   :  { %3691 = vadd.xlane.f32.xlu1 %v3650_v25  ;;  %3625 = vadd.xlane.f32.xlu0 %v3560_v44  ;;  %5573 = vrsqrt.f32 %v3355_v51  ;;  %v9003_v25 = vld [vmem:[#allocation46_spill] sm:$0xff] }
 0x423   :  { %v5564_v13 = vpop.eup %5563  ;;  %5575 = vrsqrt.f32 %v3353_v4  ;;  %v3656_v61 = vmul.f32 %v3504_v12, %v7533_v34 }
 0x424   :  { %v5566_v37 = vpop.eup %5565  ;;  %5577 = vrsqrt.f32 %v1950_v50  ;;  %v8003_v44 = vmul.f32 %v5564_v13, %v9003_v25  ;;  %v9009_v13 = vld [vmem:[#allocation136_spill] sm:$0xff] }
 0x425   :  { %v5568_v39 = vpop.eup %5567  ;;  %5579 = vrsqrt.f32 %v3356_v45 }
 0x426   :  { %3701 = vadd.xlane.f32.xlu1 %v3655_v63  ;;  %3621 = vadd.xlane.f32.xlu0 %v3558_v36  ;;  %v3562_v29 = vmul.f32 %v7850_v32, %v8003_v44  ;;  %v3502_v4 = vmul.f32 %v5568_v39, %v9005_v59  ;;  %v9006_v63 = vld [vmem:[#allocation131_spill] sm:$0xff]  ;;  %5581 = vrsqrt.f32 %v3354_v43  ;;  %v9011_v39 = vld [vmem:[#allocation150_spill] sm:$0xff]  ;;  %v9012_v43 = vld [vmem:[#allocation44_spill] sm:$0xff] }
 0x427   :  { %v3495_v36 = vmul.f32 %v5566_v37, %v9006_v63  ;;  %5583 = vrsqrt.f32 %v1952_v52  ;;  %v9014_v59 = vld [vmem:[#allocation164_spill] sm:$0xff]  ;;  %v3358_v52 = vmax.f32 %v7853_v46, 1e-24  ;;  %v9020_v46 = vld [vmem:[#allocation23_spill] sm:$0xff] }
 0x428   :  { %v3654_v32 = vmul.f32 %v3502_v4, %v7471_v26  ;;  %v9015_v4 = vld [vmem:[#allocation151_spill] sm:$0xff] }
 0x429   :  { %v3647_v50 = vmul.f32 %v3495_v36, %v7442_v57 }
 0x42a   :  { %v5570_v51 = vpop.eup %5569  ;;  %3697 = vadd.xlane.f32.xlu1 %v3653_v2  ;;  %3855 = vadd.xlane.f32.xlu0 %v3789_v10 }
 0x42b   :  { %v8008_v21 = vpop.xlane.xlu0 %3575  ;;  %v3532_v58 = vmul.f32 %v5570_v51, %v7381_v22  ;;  %v5572_v31 = vpop.eup %5571  ;;  %v3359_v22 = vmax.f32 %v7826_v0, 1e-24  ;;  %v3357_v0 = vmax.f32 %v7843_v17, 1e-24 }
 0x42c   :  { %9004 = vst [vmem:[#allocation172_spill] sm:$0xff] %v8008_v21  ;;  %v5574_v53 = vpop.eup %5573  ;;  %v3497_v45 = vmul.f32 %v5572_v31, %v9009_v13  ;;  %v9013_v31 = vld [vmem:[#allocation96_spill] sm:$0xff] }
 0x42d   :  { %v8018_v33 = vmul.f32 %v3532_v58, %v7772_v19  ;;  %v3507_v7 = vmul.f32 %v5574_v53, %v9008_v55  ;;  %v5576_v37 = vpop.eup %5575  ;;  %v9010_v19 = vld [vmem:[#allocation184_spill] sm:$0xff]  ;;  %5585 = vrsqrt.f32 %v3359_v22  ;;  %v9016_v53 = vld [vmem:[#allocation195_spill] sm:$0xff] }
 0x42e   :  { %3703 = vadd.xlane.f32.xlu1 %v3656_v61  ;;  %3629 = vadd.xlane.f32.xlu0 %v3562_v29  ;;  %v1989_v2 = vmax.f32 %v9010_v19, 1e-24  ;;  %v5578_v10 = vpop.eup %5577  ;;  %v3649_v26 = vmul.f32 %v3497_v45, %v7412_v27  ;;  %v3505_v51 = vmul.f32 %v5576_v37, %v9011_v39  ;;  %v3360_v61 = vmax.f32 %v9013_v31, 1e-24  ;;  %v9019_v19 = vld [vmem:[#allocation31_spill] sm:$0xff]  ;;  %v9023_v31 = vld [vmem:[#allocation157_spill] sm:$0xff] }
 0x42f   :  { %v8021_v23 = vpop.xlane.xlu1 %3799  ;;  %v8023_v34 = vpop.xlane.xlu0 %3803  ;;  %v3659_v57 = vmul.f32 %v3507_v7, %v7760_v6  ;;  %v8039_v58 = vmul.f32 %v5578_v10, %v9012_v43  ;;  %v1991_v38 = vmax.f32 %v9016_v53, 1e-24  ;;  %v9017_v7 = vld [vmem:[#allocation89_spill] sm:$0xff]  ;;  %v9021_v10 = vld [vmem:[#allocation50_spill] sm:$0xff] }
 0x430   :  { %v5580_v25 = vpop.eup %5579  ;;  %5587 = vrsqrt.f32 %v1989_v2  ;;  %v3657_v6 = vmul.f32 %v3505_v51, %v9014_v59  ;;  %v3364_v2 = vmax.f32 %v9019_v19, 1e-24  ;;  %v9022_v51 = vld [vmem:[#allocation199_spill] sm:$0xff]  ;;  %v9025_v53 = vld [vmem:[#allocation54_spill] sm:$0xff] }
 0x431   :  { %5589 = vrsqrt.f32 %v3357_v0  ;;  %v3564_v27 = vmul.f32 %v7905_v3, %v8039_v58  ;;  %v3508_v63 = vmul.f32 %v5580_v25, %v9015_v4  ;;  %v5582_v36 = vpop.eup %5581  ;;  %v9018_v3 = vld [vmem:[#allocation154_spill] sm:$0xff] }
 0x432   :  { %3699 = vadd.xlane.f32.xlu1 %v3654_v32  ;;  %3685 = vadd.xlane.f32.xlu0 %v3647_v50  ;;  %v5584_v22 = vpop.eup %5583  ;;  %5591 = vrsqrt.f32 %v3360_v61  ;;  %v3363_v32 = vmax.f32 %v7861_v56, 1e-24  ;;  %v3506_v45 = vmul.f32 %v5582_v36, %v9018_v3 }
 0x433   :  { %v8031_v8 = vpop.xlane.xlu1 %3577  ;;  %v8033_v12 = vpop.xlane.xlu0 %3571  ;;  %v3660_v13 = vmul.f32 %v3508_v63, %v9017_v7  ;;  %5593 = vrsqrt.f32 %v1991_v38  ;;  %v8062_v0 = vmul.f32 %v5584_v22, %v9021_v10  ;;  %v9029_v10 = vld [vmem:[#allocation148_spill] sm:$0xff] }
 0x434   :  { %5595 = vrsqrt.f32 %v3358_v52  ;;  %v3658_v25 = vmul.f32 %v3506_v45, %v9022_v51  ;;  %v9026_v52 = vld [vmem:[#allocation158_spill] sm:$0xff] }
 0x435   :  { %5597 = vrsqrt.f32 %v3363_v32  ;;  %v3566_v43 = vmul.f32 %v7937_v1, %v8062_v0 }
 0x436   :  { %3709 = vadd.xlane.f32.xlu1 %v3659_v57  ;;  %3689 = vadd.xlane.f32.xlu0 %v3649_v26  ;;  %v3361_v57 = vmax.f32 %v7872_v42, 1e-24  ;;  %5599 = vrsqrt.f32 %v3364_v2  ;;  %v3367_v42 = vmax.f32 %v7883_v35, 1e-24  ;;  %v3365_v35 = vmax.f32 %v7899_v11, 1e-24 }
 0x437   :  { %v8042_v17 = vpop.xlane.xlu1 %3573  ;;  %v8044_v29 = vpop.xlane.xlu0 %3805  ;;  %v3371_v11 = vmax.f32 %v7913_v16, 1e-24  ;;  %v3369_v16 = vmax.f32 %v7930_v47, 1e-24  ;;  %v3375_v47 = vmax.f32 %v7951_v24, 1e-24 }
 0x438   :  { %v5586_v37 = vpop.eup %5585  ;;  %5601 = vrsqrt.f32 %v3361_v57  ;;  %v9031_v57 = vld [vmem:[#allocation84_spill] sm:$0xff]  ;;  %v3373_v24 = vmax.f32 %v7970_v28, 1e-24  ;;  %v3379_v28 = vmax.f32 %v7984_v60, 1e-24 }
 0x439   :  { %v3511_v61 = vmul.f32 %v5586_v37, %v9023_v31  ;;  %v9027_v37 = vld [vmem:[#allocation53_spill] sm:$0xff] }
 0x43a   :  { %3705 = vadd.xlane.f32.xlu1 %v3657_v6  ;;  %3633 = vadd.xlane.f32.xlu0 %v3564_v27  ;;  %v5588_v56 = vpop.eup %5587  ;;  %v3362_v6 = vmax.f32 %v7877_v41, 1e-24  ;;  %v9024_v27 = vld [vmem:[#allocation78_spill] sm:$0xff]  ;;  %v3368_v41 = vmax.f32 %v7892_v49, 1e-24 }
 0x43b   :  { %v8053_v50 = vpop.xlane.xlu1 %3585  ;;  %v8055_v55 = vpop.xlane.xlu0 %3801  ;;  %v2141_v4 = vmul.f32 %v5588_v56, %v9024_v27  ;;  %v3663_v38 = vmul.f32 %v3511_v61, %v9025_v53  ;;  %v3366_v56 = vmax.f32 %v9029_v10, 1e-24  ;;  %v9030_v49 = vld [vmem:[#allocation130_spill] sm:$0xff]  ;;  %v9032_v61 = vld [vmem:[#allocation121_spill] sm:$0xff] }
 0x43c   :  { %v5590_v59 = vpop.eup %5589  ;;  %5603 = vrsqrt.f32 %v3362_v6  ;;  %v9033_v27 = vld [vmem:[#allocation162_spill] sm:$0xff] }
 0x43d   :  { %v3793_v1 = vmul.f32 %v7889_v48, %v2141_v4  ;;  %v3509_v22 = vmul.f32 %v5590_v59, %v9026_v52  ;;  %v5592_v32 = vpop.eup %5591  ;;  %5605 = vrsqrt.f32 %v3367_v42  ;;  %v9028_v48 = vld [vmem:[#allocation159_spill] sm:$0xff]  ;;  %v9034_v42 = vld [vmem:[#allocation165_spill] sm:$0xff] }
 0x43e   :  { %3711 = vadd.xlane.f32.xlu1 %v3660_v13  ;;  %3859 = vadd.xlane.f32.xlu0 %v9020_v46  ;;  %v5594_v7 = vpop.eup %5593  ;;  %v3512_v2 = vmul.f32 %v5592_v32, %v9028_v48  ;;  %5607 = vrsqrt.f32 %v3368_v41  ;;  %v9035_v41 = vld [vmem:[#allocation107_spill] sm:$0xff] }
 0x43f   :  { %v8065_v26 = vpop.xlane.xlu1 %3581  ;;  %v8067_v39 = vpop.xlane.xlu0 %3583  ;;  %v3661_v19 = vmul.f32 %v3509_v22, %v9027_v37  ;;  %v2143_v51 = vmul.f32 %v5594_v7, %v9031_v57  ;;  %5609 = vrsqrt.f32 %v3365_v35  ;;  %v9036_v7 = vld [vmem:[#allocation91_spill] sm:$0xff]  ;;  %v9039_v57 = vld [vmem:[#allocation86_spill] sm:$0xff] }
 0x440   :  { %v5596_v45 = vpop.eup %5595  ;;  %v3664_v59 = vmul.f32 %v3512_v2, %v9032_v61  ;;  %5611 = vrsqrt.f32 %v3366_v56  ;;  %v9041_v61 = vld [vmem:[#allocation173_spill] sm:$0xff] }
 0x441   :  { %v5598_v46 = vpop.eup %5597  ;;  %v3795_v6 = vmul.f32 %v7918_v9, %v2143_v51  ;;  %v3510_v4 = vmul.f32 %v5596_v45, %v9033_v27  ;;  %5613 = vrsqrt.f32 %v3371_v11  ;;  %v9037_v45 = vld [vmem:[#allocation167_spill] sm:$0xff]  ;;  %v9040_v11 = vld [vmem:[#allocation170_spill] sm:$0xff] }
 0x442   :  { %3707 = vadd.xlane.f32.xlu1 %v3658_v25  ;;  %3637 = vadd.xlane.f32.xlu0 %v3566_v43  ;;  %v5600_v31 = vpop.eup %5599  ;;  %v3515_v53 = vmul.f32 %v5598_v46, %v9034_v42 }
 0x443   :  { %v8076_v63 = vpop.xlane.xlu1 %3593  ;;  %v8078_v36 = vpop.xlane.xlu0 %3811  ;;  %v3662_v9 = vmul.f32 %v3510_v4, %v9035_v41  ;;  %v3516_v37 = vmul.f32 %v5600_v31, %v9037_v45  ;;  %v3374_v45 = vmax.f32 %v7965_v62, 1e-24  ;;  %v3377_v62 = vmax.f32 %v7997_v30, 1e-24 }
 0x444   :  { %v3667_v35 = vmul.f32 %v3515_v53, %v9036_v7  ;;  %v9043_v53 = vld [vmem:[#allocation87_spill] sm:$0xff] }
 0x446   :  { %3717 = vadd.xlane.f32.xlu1 %v3663_v38  ;;  %3863 = vadd.xlane.f32.xlu0 %v3793_v1  ;;  %v5602_v38 = vpop.eup %5601  ;;  %v3372_v1 = vmax.f32 %v7921_v20, 1e-24  ;;  %v3370_v20 = vmax.f32 %v7940_v18, 1e-24  ;;  %v9042_v18 = vld [vmem:[#allocation69_spill] sm:$0xff] }
 0x447   :  { %v8085_v13 = vpop.xlane.xlu1 %3589  ;;  %v8087_v3 = vpop.xlane.xlu0 %3579  ;;  %v3376_v27 = vmax.f32 %v9042_v18, 1e-24 }
 0x448   :  { %v5604_v32 = vpop.eup %5603  ;;  %5615 = vrsqrt.f32 %v3372_v1  ;;  %v9044_v1 = vld [vmem:[#allocation94_spill] sm:$0xff] }
 0x449   :  { %v5606_v2 = vpop.eup %5605  ;;  %5617 = vrsqrt.f32 %v3369_v16  ;;  %v3514_v31 = vmul.f32 %v5604_v32, %v9040_v11  ;;  %v9045_v32 = vld [vmem:[#allocation175_spill] sm:$0xff] }
 0x44a   :  { %3713 = vadd.xlane.f32.xlu1 %v3661_v19  ;;  %3641 = vadd.xlane.f32.xlu0 %v9030_v49  ;;  %v9038_v19 = vld [vmem:[#allocation166_spill] sm:$0xff]  ;;  %v5608_v56 = vpop.eup %5607  ;;  %v3668_v49 = vmul.f32 %v3516_v37, %v7943_v40  ;;  %5619 = vrsqrt.f32 %v3370_v20 }
 0x44b   :  { %v8095_v25 = vpop.xlane.xlu1 %3601  ;;  %v8097_v43 = vpop.xlane.xlu0 %3807  ;;  %v3513_v48 = vmul.f32 %v5602_v38, %v9038_v19  ;;  %5621 = vrsqrt.f32 %v3375_v47  ;;  %v3666_v38 = vmul.f32 %v3514_v31, %v9043_v53  ;;  %v3520_v41 = vmul.f32 %v5608_v56, %v9045_v32  ;;  %v9047_v20 = vld [vmem:[#allocation26_spill] sm:$0xff] }
 0x44c   :  { %5623 = vrsqrt.f32 %v3376_v27  ;;  %v9048_v56 = vld [vmem:[#allocation178_spill] sm:$0xff]  ;;  %v9052_v27 = vld [vmem:[#allocation183_spill] sm:$0xff] }
 0x44d   :  { %v3665_v51 = vmul.f32 %v3513_v48, %v9039_v57  ;;  %5625 = vrsqrt.f32 %v3373_v24  ;;  %v9049_v57 = vld [vmem:[#allocation181_spill] sm:$0xff] }
 0x44e   :  { %3719 = vadd.xlane.f32.xlu1 %v3664_v59  ;;  %3867 = vadd.xlane.f32.xlu0 %v3795_v6  ;;  %v3519_v59 = vmul.f32 %v5606_v2, %v9041_v61  ;;  %v5610_v6 = vpop.eup %5609  ;;  %v3672_v2 = vmul.f32 %v3520_v41, %v7987_v54  ;;  %5627 = vrsqrt.f32 %v3374_v45 }
 0x44f   :  { %v8105_v52 = vpop.xlane.xlu1 %3597  ;;  %v8107_v22 = vpop.xlane.xlu0 %3813  ;;  %5629 = vrsqrt.f32 %v3379_v28  ;;  %v9056_v28 = vld [vmem:[#allocation189_spill] sm:$0xff] }
 0x450   :  { %v5612_v40 = vpop.eup %5611  ;;  %v3671_v16 = vmul.f32 %v3519_v59, %v9044_v1  ;;  %v9050_v59 = vld [vmem:[#allocation144_spill] sm:$0xff]  ;;  %5631 = vrsqrt.f32 %v3377_v62  ;;  %v3378_v1 = vmax.f32 %v8006_v5, 1e-24 }
 0x452   :  { %3715 = vadd.xlane.f32.xlu1 %v3662_v9  ;;  %3725 = vadd.xlane.f32.xlu0 %v3667_v35  ;;  %v9046_v9 = vld [vmem:[#allocation174_spill] sm:$0xff]  ;;  %v5614_v35 = vpop.eup %5613  ;;  %5633 = vrsqrt.f32 %v3378_v1 }
 0x453   :  { %v8115_v46 = vpop.xlane.xlu1 %3607  ;;  %v8117_v10 = vpop.xlane.xlu0 %3809  ;;  %v3517_v7 = vmul.f32 %v5610_v6, %v9046_v9  ;;  %v9051_v6 = vld [vmem:[#allocation187_spill] sm:$0xff]  ;;  %v9054_v9 = vld [vmem:[#allocation138_spill] sm:$0xff] }
 0x454   :  { %v5616_v48 = vpop.eup %5615 }
 0x455   :  { %v3669_v47 = vmul.f32 %v3517_v7, %v9047_v20  ;;  %v5618_v11 = vpop.eup %5617  ;;  %v3524_v24 = vmul.f32 %v5616_v48, %v9052_v27 }
 0x456   :  { %3727 = vadd.xlane.f32.xlu1 %v3668_v49  ;;  %3721 = vadd.xlane.f32.xlu0 %v3665_v51  ;;  %v3518_v49 = vmul.f32 %v5612_v40, %v9048_v56  ;;  %v3523_v51 = vmul.f32 %v5614_v35, %v9049_v57  ;;  %v5620_v61 = vpop.eup %5619  ;;  %v9053_v40 = vld [vmem:[#allocation182_spill] sm:$0xff] }
 0x457   :  { %v8125_v4 = vpop.xlane.xlu1 %3837  ;;  %v8127_v42 = vpop.xlane.xlu0 %3591  ;;  %v3521_v53 = vmul.f32 %v5618_v11, %v9053_v40  ;;  %v3676_v41 = vmul.f32 %v3524_v24, %v8003_v44  ;;  %v9055_v35 = vld [vmem:[#allocation186_spill] sm:$0xff]  ;;  %v9058_v44 = vld [vmem:[#allocation191_spill] sm:$0xff] }
 0x458   :  { %v3670_v54 = vmul.f32 %v3518_v49, %v9050_v59  ;;  %v3675_v18 = vmul.f32 %v3523_v51, %v9051_v6  ;;  %v3522_v45 = vmul.f32 %v5620_v61, %v9055_v35  ;;  %v9057_v49 = vld [vmem:[#allocation98_spill] sm:$0xff] }
 0x459   :  { %v3673_v7 = vmul.f32 %v3521_v53, %v9054_v9  ;;  %v9059_v11 = vld [vmem:[#allocation190_spill] sm:$0xff] }
 0x45a   :  { %3723 = vadd.xlane.f32.xlu1 %v3666_v38  ;;  %3733 = vadd.xlane.f32.xlu0 %v3671_v16  ;;  %v5622_v38 = vpop.eup %5621  ;;  %v3674_v56 = vmul.f32 %v3522_v45, %v7977_v15  ;;  %v9061_v24 = vld [vmem:[#allocation194_spill] sm:$0xff]  ;;  %v9062_v15 = vld [vmem:[#allocation196_spill] sm:$0xff] }
 0x45b   :  { %v8135_v37 = vpop.xlane.xlu1 %3605  ;;  %v8137_v19 = vpop.xlane.xlu0 %3819  ;;  %v3527_v48 = vmul.f32 %v5622_v38, %v9056_v28 }
 0x45c   :  { %v5624_v32 = vpop.eup %5623 }
 0x45d   :  { %v3679_v57 = vmul.f32 %v3527_v48, %v9057_v49  ;;  %v3528_v51 = vmul.f32 %v5624_v32, %v9058_v44  ;;  %v9064_v48 = vld [vmem:[#allocation24_spill] sm:$0xff] }
 0x45e   :  { %3735 = vadd.xlane.f32.xlu1 %v3672_v2  ;;  %3729 = vadd.xlane.f32.xlu0 %v3669_v47  ;;  %v5626_v2 = vpop.eup %5625  ;;  %v9066_v49 = vld [vmem:[#allocation28_spill] sm:$0xff] }
 0x45f   :  { %v8144_v60 = vpop.xlane.xlu1 %3833  ;;  %v8146_v31 = vpop.xlane.xlu0 %3587  ;;  %v3525_v62 = vmul.f32 %v5626_v2, %v9059_v11  ;;  %v3680_v6 = vmul.f32 %v3528_v51, %v8062_v0  ;;  %v9068_v51 = vld [vmem:[#allocation139_spill] sm:$0xff] }
 0x460   :  { %v5628_v47 = vpop.eup %5627 }
 0x461   :  { %v5630_v61 = vpop.eup %5629  ;;  %v3526_v40 = vmul.f32 %v5628_v47, %v9061_v24  ;;  %v9065_v47 = vld [vmem:[#allocation198_spill] sm:$0xff] }
 0x462   :  { %3731 = vadd.xlane.f32.xlu1 %v3670_v54  ;;  %3741 = vadd.xlane.f32.xlu0 %v3675_v18  ;;  %v9060_v18 = vld [vmem:[#allocation57_spill] sm:$0xff]  ;;  %v3531_v53 = vmul.f32 %v5630_v61, %v9062_v15  ;;  %v5632_v38 = vpop.eup %5631 }
 0x463   :  { %v8153_v30 = vpop.xlane.xlu1 %3615  ;;  %v8155_v16 = vpop.xlane.xlu0 %3815  ;;  %v3677_v27 = vmul.f32 %v3525_v62, %v9060_v18  ;;  %v9069_v61 = vld [vmem:[#allocation153_spill] sm:$0xff] }
 0x464   :  { %v3683_v9 = vmul.f32 %v3531_v53, %v7956_v14  ;;  %v5634_v0 = vpop.eup %5633  ;;  %v9067_v14 = vld [vmem:[#allocation147_spill] sm:$0xff] }
 0x466   :  { %3743 = vadd.xlane.f32.xlu1 %v3676_v41  ;;  %3737 = vadd.xlane.f32.xlu0 %v3673_v7  ;;  %v3678_v41 = vmul.f32 %v3526_v40, %v8039_v58  ;;  %v9063_v7 = vld [vmem:[#allocation197_spill] sm:$0xff] }
 0x467   :  { %v8161_v20 = vpop.xlane.xlu1 %3611  ;;  %v8163_v5 = vpop.xlane.xlu0 %3821  ;;  %v3529_v35 = vmul.f32 %v5632_v38, %v9063_v7 }
 0x469   :  { %v3681_v2 = vmul.f32 %v3529_v35, %v9064_v48  ;;  %v4065_v48 = vsub.f32 %v8021_v23, %v8033_v12 }
 0x46a   :  { %3739 = vadd.xlane.f32.xlu1 %v3674_v56  ;;  %3749 = vadd.xlane.f32.xlu0 %v3679_v57  ;;  %v3530_v56 = vmul.f32 %v5634_v0, %v9065_v47  ;;  %v4067_v0 = vsub.f32 %v8023_v34, %v8008_v21  ;;  %v4071_v34 = vsub.f32 %v8078_v36, %v8067_v39 }
 0x46b   :  { %v8169_v59 = vpop.xlane.xlu1 %3845  ;;  %v8171_v54 = vpop.xlane.xlu0 %3817  ;;  %v4070_v36 = vsub.f32 %v8117_v10, %v8065_v26 }
 0x46c   :  { %v3682_v44 = vmul.f32 %v3530_v56, %v9067_v14  ;;  %v4068_v56 = vsub.f32 %v8044_v29, %v8031_v8  ;;  %v4105_v14 = vmul.f32 1.4285715, %v4067_v0  ;;  %v4072_v29 = vsub.f32 %v8107_v22, %v8053_v50 }
 0x46e   :  { %3751 = vadd.xlane.f32.xlu1 %v3680_v6  ;;  %3745 = vadd.xlane.f32.xlu0 %v3677_v27  ;;  %v9070_v27 = vld [vmem:[#allocation30_spill] sm:$0xff]  ;;  %v4110_v22 = vmul.f32 1.4285715, %v4072_v29 }
 0x46f   :  { %v8177_v1 = vpop.xlane.xlu1 %3841  ;;  %v8179_v32 = vpop.xlane.xlu0 %3599 }
 0x472   :  { %3747 = vadd.xlane.f32.xlu1 %v3678_v41  ;;  %3757 = vadd.xlane.f32.xlu0 %v3683_v9 }
 0x473   :  { %v8184_v45 = vpop.xlane.xlu1 %3623  ;;  %v8186_v28 = vpop.xlane.xlu0 %3827 }
 0x476   :  { %3869 = vadd.xlane.f32.xlu1 %v9066_v49  ;;  %3753 = vadd.xlane.f32.xlu0 %v3681_v2  ;;  %v4066_v49 = vsub.f32 %v8055_v55, %v8042_v17  ;;  %v4145_v55 = vmul.f32 1.442695, %v4105_v14  ;;  %v4082_v14 = vsub.f32 %v8144_v60, %v8135_v37  ;;  %v4074_v60 = vsub.f32 %v8171_v54, %v8085_v13 }
 0x477   :  { %v8191_v57 = vpop.xlane.xlu1 %3619  ;;  %v8193_v58 = vpop.xlane.xlu0 %3595 }
 0x478   :  { %5635 = vpow2.f32 %v4145_v55  ;;  %v4120_v29 = vmul.f32 1.4285715, %v4082_v14  ;;  %v4079_v55 = vsub.f32 %v8186_v28, %v8179_v32 }
 0x47a   :  { %3755 = vadd.xlane.f32.xlu1 %v3682_v44  ;;  %3645 = vadd.xlane.f32.xlu0 %v9068_v51  ;;  %v4103_v51 = vmul.f32 1.4285715, %v4065_v48  ;;  %v4109_v48 = vmul.f32 1.4285715, %v4071_v34 }
 0x47b   :  { %v8197_v11 = vpop.xlane.xlu1 %3853  ;;  %v8199_v62 = vpop.xlane.xlu0 %3823 }
 0x47e   :  { %3759 = vadd.xlane.f32.xlu1 %v8018_v33  ;;  %3871 = vadd.xlane.f32.xlu0 %v9069_v61 }
 0x47f   :  { %v8203_v6 = vpop.xlane.xlu1 %3849  ;;  %v8205_v18 = vpop.xlane.xlu0 %3829 }
 0x482   :  { %3873 = vadd.xlane.f32.xlu1 %v9070_v27  ;;  %v4106_v27 = vmul.f32 1.4285715, %v4068_v56 }
 0x483   :  { %v8208_v24 = vpop.xlane.xlu1 %3631  ;;  %v8210_v40 = vpop.xlane.xlu0 %3825 }
 0x484   :  { %9071 = vst [vmem:[#allocation100_spill] sm:$0xff] %v8208_v24  ;;  %v4104_v24 = vmul.f32 1.4285715, %v4066_v49  ;;  %v4147_v56 = vmul.f32 1.442695, %v4106_v27  ;;  %v4078_v28 = vsub.f32 %v8210_v40, %v8105_v52 }
 0x486   :  { %v4143_v49 = vmul.f32 1.442695, %v4104_v24 }
 0x487   :  { %v8212_v15 = vpop.xlane.xlu1 %3627  ;;  %v8214_v53 = vpop.xlane.xlu0 %3835 }
 0x488   :  { %9072 = vst [vmem:[#allocation60_spill] sm:$0xff] %v8212_v15 }
 0x48b   :  { %v8216_v38 = vpop.xlane.xlu1 %3857  ;;  %v8218_v41 = vpop.xlane.xlu0 %3603 }
 0x48f   :  { %v3688_v33 = vpop.xlane.xlu1 %3687  ;;  %v8220_v9 = vpop.xlane.xlu0 %3831 }
 0x490   :  { %v3876_v44 = vsub.f32 %v3688_v33, %v8042_v17  ;;  %v4141_v33 = vmul.f32 1.442695, %v4103_v51  ;;  %v4108_v51 = vmul.f32 1.4285715, %v4070_v36 }
 0x492   :  { %v3914_v0 = vmul.f32 1.4285715, %v3876_v44  ;;  %5637 = vpow2.f32 %v4141_v33  ;;  %v4153_v44 = vmul.f32 1.442695, %v4109_v48  ;;  %v4151_v33 = vmul.f32 1.442695, %v4108_v51 }
 0x493   :  { %v3694_v7 = vpop.xlane.xlu1 %3693  ;;  %v8222_v35 = vpop.xlane.xlu0 %3609  ;;  %5639 = vpow2.f32 %v4147_v56 }
 0x494   :  { %v3879_v17 = vsub.f32 %v3694_v7, %v8087_v3  ;;  %v3953_v7 = vmul.f32 1.442695, %v3914_v0  ;;  %5641 = vpow2.f32 %v4143_v49  ;;  %v4117_v49 = vmul.f32 1.4285715, %v4079_v55 }
 0x496   :  { %v3917_v10 = vmul.f32 1.4285715, %v3879_v17  ;;  %5643 = vpow2.f32 %v3953_v7 }
 0x497   :  { %v8228_v2 = vpop.xlane.xlu1 %3635  ;;  %v8230_v47 = vpop.xlane.xlu0 %3843  ;;  %5645 = vpow2.f32 %v4153_v44  ;;  %v4084_v44 = vsub.f32 %v8125_v4, %v8222_v35 }
 0x498   :  { %9073 = vst [vmem:[#allocation34_spill] sm:$0xff] %v8228_v2  ;;  %v4069_v2 = vsub.f32 %v8097_v43, %v8087_v3  ;;  %v4075_v43 = vsub.f32 %v8137_v19, %v8127_v42  ;;  %v4073_v3 = vsub.f32 %v8155_v16, %v8146_v31  ;;  %v4155_v16 = vmul.f32 1.442695, %v4110_v22 }
 0x499   :  { %v3959_v17 = vmul.f32 1.442695, %v3917_v10  ;;  %v4083_v22 = vsub.f32 %v8214_v53, %v8115_v46  ;;  %v4116_v53 = vmul.f32 1.4285715, %v4078_v28 }
 0x49a   :  { %v4107_v15 = vmul.f32 1.4285715, %v4069_v2  ;;  %v4076_v2 = vsub.f32 %v8163_v5, %v8076_v63  ;;  %v4113_v27 = vmul.f32 1.4285715, %v4075_v43  ;;  %v4111_v0 = vmul.f32 1.4285715, %v4073_v3 }
 0x49b   :  { %v8239_v61 = vpop.xlane.xlu1 %3861  ;;  %v8241_v23 = vpop.xlane.xlu0 %3839  ;;  %v4077_v5 = vsub.f32 %v8199_v62, %v8193_v58  ;;  %v4112_v43 = vmul.f32 1.4285715, %v4074_v60  ;;  %v4175_v62 = vmul.f32 1.442695, %v4120_v29  ;;  %v4087_v29 = vsub.f32 %v8230_v47, %v8153_v30 }
 0x49c   :  { %9074 = vst [vmem:[#allocation88_spill] sm:$0xff] %v8239_v61  ;;  %v4149_v24 = vmul.f32 1.442695, %v4107_v15  ;;  %v4114_v48 = vmul.f32 1.4285715, %v4076_v2  ;;  %v4080_v15 = vsub.f32 %v8205_v18, %v8095_v25  ;;  %v4081_v18 = vsub.f32 %v8220_v9, %v8218_v41  ;;  %v8288_v2 = vpop.eup %5635 }
 0x49d   :  { %v4161_v56 = vmul.f32 1.442695, %v4113_v27  ;;  %v4157_v14 = vmul.f32 1.442695, %v4111_v0  ;;  %v4115_v3 = vmul.f32 1.4285715, %v4077_v5  ;;  %v8291_v60 = vpop.eup %5637  ;;  %v4085_v5 = vsub.f32 %v8241_v23, %v8161_v20 }
 0x49e   :  { %5647 = vpow2.f32 %v4149_v24  ;;  %v4163_v7 = vmul.f32 1.442695, %v4114_v48  ;;  %v4118_v10 = vmul.f32 1.4285715, %v4080_v15  ;;  %v4159_v24 = vmul.f32 1.442695, %v4112_v43  ;;  %v8295_v55 = vpop.eup %5639 }
 0x49f   :  { %v8250_v61 = vpop.xlane.xlu1 %3639  ;;  %v8252_v21 = vpop.xlane.xlu0 %3617  ;;  %5649 = vpow2.f32 %v4155_v16  ;;  %v4169_v9 = vmul.f32 1.442695, %v4117_v49  ;;  %v4121_v16 = vmul.f32 1.4285715, %v4083_v22  ;;  %v4165_v4 = vmul.f32 1.442695, %v4115_v3 }
 0x4a0   :  { %5651 = vpow2.f32 %v3959_v17  ;;  %v4119_v0 = vmul.f32 1.4285715, %v4081_v18  ;;  %v5642_v17 = vpop.eup %5641  ;;  %v4167_v43 = vmul.f32 1.442695, %v4116_v53  ;;  %v4125_v49 = vmul.f32 1.4285715, %v4087_v29 }
 0x4a1   :  { %5653 = vpow2.f32 %v4151_v33  ;;  %v4171_v33 = vmul.f32 1.442695, %v4118_v10  ;;  %v4088_v22 = vsub.f32 %v8169_v59, %v8252_v21  ;;  %v4123_v3 = vmul.f32 1.4285715, %v4085_v5 }
 0x4a2   :  { %5655 = vpow2.f32 %v4161_v56  ;;  %v5644_v56 = vpop.eup %5643 }
 0x4a3   :  { %v8262_v34 = vpop.xlane.xlu1 %3865  ;;  %v8264_v19 = vpop.xlane.xlu0 %3613  ;;  %5657 = vpow2.f32 %v4175_v62  ;;  %v4177_v62 = vmul.f32 1.442695, %v4121_v16  ;;  %v4028_v10 = vadd.f32 2.0, %v5644_v56  ;;  %v4126_v29 = vmul.f32 1.4285715, %v4088_v22 }
 0x4a4   :  { %5659 = vpow2.f32 %v4157_v14  ;;  %v8301_v47 = vpop.eup %5645  ;;  %v4173_v14 = vmul.f32 1.442695, %v4119_v0  ;;  %v4181_v5 = vmul.f32 1.442695, %v4123_v3 }
 0x4a5   :  { %5661 = vpow2.f32 %v4163_v7  ;;  %v4187_v22 = vmul.f32 1.442695, %v4126_v29 }
 0x4a6   :  { %5663 = vpow2.f32 %v4159_v24 }
 0x4a7   :  { %v8274_v36 = vpop.xlane.xlu1 %3643  ;;  %v8276_v54 = vpop.xlane.xlu0 %3851  ;;  %5665 = vpow2.f32 %v4169_v9 }
 0x4a8   :  { %9075 = vst [vmem:[#allocation161_spill] sm:$0xff] %v8274_v36  ;;  %v5648_v23 = vpop.eup %5647  ;;  %5667 = vpow2.f32 %v4165_v4  ;;  %v4086_v4 = vsub.f32 %v8177_v1, %v8264_v19 }
 0x4a9   :  { %v8306_v7 = vpop.eup %5649  ;;  %5669 = vpow2.f32 %v4171_v33  ;;  %v4091_v33 = vsub.f32 %v8276_v54, %v8184_v45 }
 0x4aa   :  { %v5652_v53 = vpop.eup %5651  ;;  %5671 = vpow2.f32 %v4167_v43  ;;  %v4124_v54 = vmul.f32 1.4285715, %v4086_v4 }
 0x4ab   :  { %v3696_v51 = vpop.xlane.xlu1 %3695  ;;  %v8286_v40 = vpop.xlane.xlu0 %3847  ;;  %5673 = vpow2.f32 %v4177_v62 }
 0x4ac   :  { %v3880_v27 = vsub.f32 %v3696_v51, %v8065_v26  ;;  %v4122_v26 = vmul.f32 1.4285715, %v4084_v44  ;;  %v8313_v16 = vpop.eup %5653  ;;  %5675 = vpow2.f32 %v4173_v14  ;;  %v4089_v3 = vsub.f32 %v8286_v40, %v8191_v57 }
 0x4ad   :  { %v8317_v0 = vpop.eup %5655 }
 0x4ae   :  { %v3918_v28 = vmul.f32 1.4285715, %v3880_v27  ;;  %v4179_v44 = vmul.f32 1.442695, %v4122_v26 }
 0x4af   :  { %v3692_v48 = vpop.xlane.xlu1 %3691  ;;  %v8299_v15 = vpop.xlane.xlu0 %3625 }
 0x4b0   :  { %9076 = vst [vmem:[#allocation25_spill] sm:$0xff] %v8299_v15  ;;  %v3878_v18 = vsub.f32 %v3692_v48, %v8031_v8  ;;  %v3961_v27 = vmul.f32 1.442695, %v3918_v28  ;;  %v4185_v8 = vmul.f32 1.442695, %v4125_v49  ;;  %v4218_v48 = vadd.f32 %v5642_v17, %v4028_v10 }
 0x4b1   :  { %5677 = vpow2.f32 %v4179_v44  ;;  %v4129_v17 = vmul.f32 1.4285715, %v4091_v33 }
 0x4b2   :  { %v3916_v26 = vmul.f32 1.4285715, %v3878_v18  ;;  %5679 = vpow2.f32 %v3961_v27 }
 0x4b3   :  { %v3702_v51 = vpop.xlane.xlu1 %3701  ;;  %v8308_v24 = vpop.xlane.xlu0 %3621  ;;  %5681 = vpow2.f32 %v4185_v8  ;;  %v4193_v33 = vmul.f32 1.442695, %v4129_v17 }
 0x4b4   :  { %v3883_v9 = vsub.f32 %v3702_v51, %v8146_v31  ;;  %v4090_v59 = vsub.f32 %v8203_v6, %v8308_v24  ;;  %v8321_v31 = vpop.eup %5657  ;;  %v4031_v6 = vadd.f32 2.0, %v5652_v53  ;;  %5683 = vpow2.f32 %v4181_v5 }
 0x4b5   :  { %v8325_v28 = vpop.eup %5659  ;;  %v3957_v18 = vmul.f32 1.442695, %v3916_v26  ;;  %5685 = vlog2.f32 %v4218_v48  ;;  %v4183_v5 = vmul.f32 1.442695, %v4124_v54  ;;  %v4127_v26 = vmul.f32 1.4285715, %v4089_v3 }
 0x4b6   :  { %v3921_v1 = vmul.f32 1.4285715, %v3883_v9  ;;  %v8328_v49 = vpop.eup %5661  ;;  %v4221_v44 = vadd.f32 %v5648_v23, %v4031_v6  ;;  %v4092_v9 = vsub.f32 %v8197_v11, %v8299_v15  ;;  %5687 = vpow2.f32 %v4187_v22  ;;  %v9078_v3 = vld [vmem:[#allocation60_spill] sm:$0xff] }
 0x4b7   :  { %v3698_v56 = vpop.xlane.xlu1 %3697  ;;  %v8323_v43 = vpop.xlane.xlu0 %3855  ;;  %5689 = vpow2.f32 %v3957_v18  ;;  %v4128_v17 = vmul.f32 1.4285715, %v4090_v59 }
 0x4b8   :  { %v3881_v62 = vsub.f32 %v3698_v56, %v8067_v39  ;;  %v8330_v14 = vpop.eup %5663  ;;  %v3967_v8 = vmul.f32 1.442695, %v3921_v1  ;;  %5691 = vlog2.f32 %v4221_v44  ;;  %v4093_v18 = vsub.f32 %v8323_v43, %v9078_v3 }
 0x4b9   :  { %v8334_v10 = vpop.eup %5665 }
 0x4ba   :  { %v3919_v51 = vmul.f32 1.4285715, %v3881_v62  ;;  %v8338_v27 = vpop.eup %5667  ;;  %v4130_v62 = vmul.f32 1.4285715, %v4092_v9  ;;  %5693 = vpow2.f32 %v3967_v8 }
 0x4bb   :  { %v3704_v53 = vpop.xlane.xlu1 %3703  ;;  %v8336_v39 = vpop.xlane.xlu0 %3629  ;;  %5695 = vpow2.f32 %v4183_v5  ;;  %v9080_v5 = vld [vmem:[#allocation172_spill] sm:$0xff] }
 0x4bc   :  { %v3884_v29 = vsub.f32 %v3704_v53, %v8085_v13  ;;  %v4094_v40 = vsub.f32 %v8216_v38, %v8336_v39  ;;  %v8345_v4 = vpop.eup %5669  ;;  %v3963_v11 = vmul.f32 1.442695, %v3919_v51  ;;  %5697 = vpow2.f32 %v4193_v33 }
 0x4bd   :  { %v8347_v23 = vpop.eup %5671  ;;  %v4189_v51 = vmul.f32 1.442695, %v4127_v26  ;;  %v4191_v33 = vmul.f32 1.442695, %v4128_v17  ;;  %v4131_v26 = vmul.f32 1.4285715, %v4093_v18 }
 0x4be   :  { %v3922_v48 = vmul.f32 1.4285715, %v3884_v29  ;;  %v8349_v6 = vpop.eup %5673  ;;  %5699 = vpow2.f32 %v3963_v11  ;;  %v4132_v18 = vmul.f32 1.4285715, %v4094_v40 }
 0x4bf   :  { %v3700_v56 = vpop.xlane.xlu1 %3699  ;;  %v3686_v1 = vpop.xlane.xlu0 %3685  ;;  %v4197_v17 = vmul.f32 1.442695, %v4131_v26 }
 0x4c0   :  { %v8351_v13 = vpop.eup %5675  ;;  %v3882_v38 = vsub.f32 %v3700_v56, %v8053_v50  ;;  %v3875_v22 = vsub.f32 %v3686_v1, %v8033_v12  ;;  %v3969_v53 = vmul.f32 1.442695, %v3922_v48  ;;  %v4195_v12 = vmul.f32 1.442695, %v4130_v62 }
 0x4c1   :  { %v8355_v54 = vpop.eup %5677  ;;  %v4199_v40 = vmul.f32 1.442695, %v4132_v18 }
 0x4c2   :  { %9077 = vst [vmem:[#allocation63_spill] sm:$0xff] %v8355_v54  ;;  %v5680_v44 = vpop.eup %5679  ;;  %v3920_v29 = vmul.f32 1.4285715, %v3882_v38  ;;  %v3913_v36 = vmul.f32 1.4285715, %v3875_v22  ;;  %5701 = vpow2.f32 %v3969_v53 }
 0x4c3   :  { %v8359_v15 = vpop.eup %5681  ;;  %v3710_v9 = vpop.xlane.xlu1 %3709  ;;  %v4032_v48 = vadd.f32 2.0, %v5680_v44  ;;  %5703 = vpow2.f32 %v4189_v51 }
 0x4c4   :  { %9079 = vst [vmem:[#allocation102_spill] sm:$0xff] %v8359_v15  ;;  %v3690_v50 = vpop.xlane.xlu0 %3689  ;;  %v8361_v8 = vpop.eup %5683  ;;  %v3951_v56 = vmul.f32 1.442695, %v3913_v36  ;;  %v3887_v59 = vsub.f32 %v3710_v9, %v8193_v58  ;;  %v3965_v38 = vmul.f32 1.442695, %v3920_v29 }
 0x4c5   :  { %v3877_v1 = vsub.f32 %v3690_v50, %v9080_v5  ;;  %v8365_v43 = vpop.eup %5685  ;;  %v4222_v51 = vadd.f32 %v8313_v16, %v4032_v48  ;;  %v9082_v16 = vld [vmem:[#allocation88_spill] sm:$0xff] }
 0x4c6   :  { %v3925_v22 = vmul.f32 1.4285715, %v3887_v59  ;;  %v8367_v15 = vpop.eup %5687  ;;  %5705 = vpow2.f32 %v3951_v56 }
 0x4c7   :  { %v3915_v11 = vmul.f32 1.4285715, %v3877_v1  ;;  %v3706_v54 = vpop.xlane.xlu1 %3705  ;;  %v5690_v36 = vpop.eup %5689  ;;  %5707 = vpow2.f32 %v4195_v12 }
 0x4c8   :  { %v8369_v62 = vpop.xlane.xlu0 %3633  ;;  %v3975_v58 = vmul.f32 1.442695, %v3925_v22  ;;  %v3885_v50 = vsub.f32 %v3706_v54, %v8127_v42  ;;  %v8372_v44 = vpop.eup %5691  ;;  %5709 = vpow2.f32 %v4191_v33  ;;  %v4030_v59 = vadd.f32 2.0, %v5690_v36 }
 0x4c9   :  { %v3955_v9 = vmul.f32 1.442695, %v3915_v11  ;;  %v5694_v53 = vpop.eup %5693  ;;  %5711 = vpow2.f32 %v3965_v38  ;;  %v4096_v48 = vsub.f32 %v9082_v16, %v8369_v62 }
 0x4ca   :  { %v3923_v29 = vmul.f32 1.4285715, %v3885_v50  ;;  %v8375_v56 = vpop.eup %5695  ;;  %v4035_v26 = vadd.f32 2.0, %v5694_v53  ;;  %v4220_v11 = vadd.f32 %v8295_v55, %v4030_v59 }
 0x4cb   :  { %5713 = vpow2.f32 %v3955_v9  ;;  %v3712_v5 = vpop.xlane.xlu1 %3711  ;;  %v8377_v1 = vpop.eup %5697 }
 0x4cc   :  { %v3860_v12 = vpop.xlane.xlu0 %3859  ;;  %9081 = vst [vmem:[#allocation155_spill] sm:$0xff] %v8377_v1  ;;  %5715 = vpow2.f32 %v3975_v58  ;;  %v3971_v42 = vmul.f32 1.442695, %v3923_v29  ;;  %v3888_v54 = vsub.f32 %v3712_v5, %v8105_v52  ;;  %v5700_v33 = vpop.eup %5699  ;;  %v9083_v29 = vld [vmem:[#allocation100_spill] sm:$0xff]  ;;  %v4225_v5 = vadd.f32 %v8325_v28, %v4035_v26 }
 0x4cd   :  { %5717 = vpow2.f32 %v4197_v17  ;;  %v5702_v22 = vpop.eup %5701  ;;  %v4033_v50 = vadd.f32 2.0, %v5700_v33  ;;  %v4095_v53 = vsub.f32 %v3860_v12, %v9083_v29 }
 0x4ce   :  { %5719 = vlog2.f32 %v4222_v51  ;;  %v3926_v38 = vmul.f32 1.4285715, %v3888_v54  ;;  %v8385_v58 = vpop.eup %5703  ;;  %v4134_v51 = vmul.f32 1.4285715, %v4096_v48  ;;  %v4036_v55 = vadd.f32 2.0, %v5702_v22 }
 0x4cf   :  { %5721 = vpow2.f32 %v3971_v42  ;;  %v3708_v36 = vpop.xlane.xlu1 %3707  ;;  %v4223_v12 = vadd.f32 %v8301_v47, %v4033_v50 }
 0x4d0   :  { %v8383_v9 = vpop.xlane.xlu0 %3637  ;;  %v3977_v52 = vmul.f32 1.442695, %v3926_v38  ;;  %v3886_v17 = vsub.f32 %v3708_v36, %v8076_v63  ;;  %v5706_v18 = vpop.eup %5705  ;;  %5723 = vpow2.f32 %v4199_v40  ;;  %v4133_v36 = vmul.f32 1.4285715, %v4095_v53 }
 0x4d1   :  { %v8390_v54 = vpop.eup %5707  ;;  %v4027_v59 = vadd.f32 2.0, %v5706_v18  ;;  %v4203_v40 = vmul.f32 1.442695, %v4134_v51  ;;  %v4098_v47 = vsub.f32 %v8262_v34, %v8383_v9 }
 0x4d2   :  { %5725 = vpow2.f32 %v3977_v52  ;;  %v3924_v42 = vmul.f32 1.4285715, %v3886_v17  ;;  %v8392_v16 = vpop.eup %5709  ;;  %v4226_v52 = vadd.f32 %v8330_v14, %v4036_v55  ;;  %v4201_v51 = vmul.f32 1.442695, %v4133_v36 }
 0x4d3   :  { %5727 = vlog2.f32 %v4220_v11  ;;  %v3718_v33 = vpop.xlane.xlu1 %3717  ;;  %v5712_v1 = vpop.eup %5711  ;;  %v4217_v63 = vadd.f32 %v8291_v60, %v4027_v59 }
 0x4d4   :  { %v3864_v38 = vpop.xlane.xlu0 %3863  ;;  %v3973_v28 = vmul.f32 1.442695, %v3924_v42  ;;  %5729 = vlog2.f32 %v4225_v5  ;;  %v3891_v48 = vsub.f32 %v3718_v33, %v8218_v41  ;;  %v4034_v18 = vadd.f32 2.0, %v5712_v1  ;;  %v9084_v1 = vld [vmem:[#allocation34_spill] sm:$0xff] }
 0x4d5   :  { %v5714_v26 = vpop.eup %5713  ;;  %5731 = vlog2.f32 %v4217_v63  ;;  %v4097_v33 = vsub.f32 %v3864_v38, %v9084_v1 }
 0x4d6   :  { %v5716_v22 = vpop.eup %5715  ;;  %v4029_v17 = vadd.f32 2.0, %v5714_v26  ;;  %5733 = vpow2.f32 %v3973_v28  ;;  %v3929_v60 = vmul.f32 1.4285715, %v3891_v48  ;;  %v4224_v28 = vadd.f32 %v8306_v7, %v4034_v18 }
 0x4d7   :  { %v8398_v11 = vpop.eup %5717  ;;  %v3714_v50 = vpop.xlane.xlu1 %3713  ;;  %5735 = vlog2.f32 %v4223_v12  ;;  %v4039_v59 = vadd.f32 2.0, %v5716_v22  ;;  %v4136_v26 = vmul.f32 1.4285715, %v4098_v47  ;;  %v4258_v7 = vmul.f32 0.6931472, %v8365_v43 }
 0x4d8   :  { %v8402_v53 = vpop.xlane.xlu0 %3641  ;;  %v5720_v5 = vpop.eup %5719  ;;  %v4219_v41 = vadd.f32 %v8288_v2, %v4029_v17  ;;  %v3889_v14 = vsub.f32 %v3714_v50, %v8179_v32  ;;  %5737 = vpow2.f32 %v4203_v40  ;;  %v3983_v42 = vmul.f32 1.442695, %v3929_v60 }
 0x4d9   :  { %v5722_v55 = vpop.eup %5721  ;;  %v4229_v38 = vadd.f32 %v8338_v27, %v4039_v59  ;;  %v4135_v60 = vmul.f32 1.4285715, %v4097_v33  ;;  %v4207_v18 = vmul.f32 1.442695, %v4136_v26 }
 0x4da   :  { %5739 = vlog2.f32 %v4219_v41  ;;  %v3927_v63 = vmul.f32 1.4285715, %v3889_v14  ;;  %v8407_v34 = vpop.eup %5723  ;;  %v4037_v36 = vadd.f32 2.0, %v5722_v55 }
 0x4db   :  { %5741 = vlog2.f32 %v4226_v52  ;;  %v3720_v12 = vpop.xlane.xlu1 %3719 }
 0x4dc   :  { %v8410_v48 = vpop.xlane.xlu0 %3867  ;;  %v5726_v2 = vpop.eup %5725  ;;  %5743 = vpow2.f32 %v4201_v51  ;;  %v3979_v32 = vmul.f32 1.442695, %v3927_v63  ;;  %v3892_v40 = vsub.f32 %v3720_v12, %v8135_v37  ;;  %v4227_v51 = vadd.f32 %v8317_v0, %v4037_v36 }
 0x4dd   :  { %v5728_v22 = vpop.eup %5727  ;;  %v4040_v17 = vadd.f32 2.0, %v5726_v2  ;;  %5745 = vpow2.f32 %v3983_v42  ;;  %v4205_v63 = vmul.f32 1.442695, %v4135_v60  ;;  %v4264_v0 = vmul.f32 0.6931472, %v8372_v44 }
 0x4de   :  { %5747 = vpow2.f32 %v3979_v32  ;;  %v3930_v52 = vmul.f32 1.4285715, %v3892_v40  ;;  %v5730_v50 = vpop.eup %5729  ;;  %v4266_v36 = vmul.f32 0.6931472, %v5720_v5  ;;  %v4262_v5 = vmul.f32 0.6931472, %v5728_v22 }
 0x4df   :  { %5749 = vlog2.f32 %v4224_v28  ;;  %v3716_v47 = vpop.xlane.xlu1 %3715  ;;  %v5732_v14 = vpop.eup %5731  ;;  %v4230_v33 = vadd.f32 %v8347_v23, %v4040_v17  ;;  %v4099_v23 = vsub.f32 %v8410_v48, %v8250_v61 }
 0x4e0   :  { %v3726_v41 = vpop.xlane.xlu0 %3725  ;;  %v3985_v55 = vmul.f32 1.442695, %v3930_v52  ;;  %v3890_v37 = vsub.f32 %v3716_v47, %v8095_v25  ;;  %v5734_v59 = vpop.eup %5733  ;;  %v4256_v42 = vmul.f32 0.6931472, %v5732_v14  ;;  %5751 = vlog2.f32 %v4229_v38 }
 0x4e1   :  { %v3895_v27 = vsub.f32 %v3726_v41, %v8161_v20  ;;  %v5736_v12 = vpop.eup %5735  ;;  %v4038_v43 = vadd.f32 2.0, %v5734_v59 }
 0x4e2   :  { %5753 = vpow2.f32 %v3985_v55  ;;  %v3928_v28 = vmul.f32 1.4285715, %v3890_v37  ;;  %v8419_v2 = vpop.eup %5737  ;;  %v4485_v32 = vadd.f32 %v4258_v7, %v4256_v42  ;;  %v8428_v7 = vmul.f32 0.6931472, %v5730_v50 }
 0x4e3   :  { %v3933_v26 = vmul.f32 1.4285715, %v3895_v27  ;;  %5755 = vpow2.f32 %v4207_v18  ;;  %v3728_v25 = vpop.xlane.xlu1 %3727  ;;  %v4228_v18 = vadd.f32 %v8328_v49, %v4038_v43  ;;  %v4268_v42 = vmul.f32 0.6931472, %v5736_v12 }
 0x4e4   :  { %v3722_v20 = vpop.xlane.xlu0 %3721  ;;  %v5740_v40 = vpop.eup %5739  ;;  %5757 = vlog2.f32 %v4227_v51  ;;  %v3981_v38 = vmul.f32 1.442695, %v3928_v28  ;;  %v3896_v47 = vsub.f32 %v3728_v25, %v8264_v19  ;;  %v4137_v19 = vmul.f32 1.4285715, %v4099_v23 }
 0x4e5   :  { %v3991_v17 = vmul.f32 1.442695, %v3933_v26  ;;  %v5742_v60 = vpop.eup %5741  ;;  %v4260_v52 = vmul.f32 0.6931472, %v5740_v40  ;;  %5759 = vpow2.f32 %v4205_v63  ;;  %v3893_v41 = vsub.f32 %v3722_v20, %v8115_v46 }
 0x4e6   :  { %v8426_v44 = vpop.eup %5743  ;;  %5761 = vlog2.f32 %v4230_v33  ;;  %v3934_v48 = vmul.f32 1.4285715, %v3896_v47  ;;  %v4274_v25 = vmul.f32 0.6931472, %v5742_v60 }
 0x4e7   :  { %v5746_v14 = vpop.eup %5745  ;;  %v4486_v51 = vadd.f32 %v4485_v32, %v4260_v52  ;;  %5763 = vpow2.f32 %v3981_v38  ;;  %v3931_v55 = vmul.f32 1.4285715, %v3893_v41  ;;  %v3724_v37 = vpop.xlane.xlu1 %3723 }
 0x4e8   :  { %v3734_v27 = vpop.xlane.xlu0 %3733  ;;  %v5748_v59 = vpop.eup %5747  ;;  %5765 = vpow2.f32 %v3991_v17  ;;  %v3894_v46 = vsub.f32 %v3724_v37, %v8222_v35  ;;  %v3993_v28 = vmul.f32 1.442695, %v3934_v48  ;;  %v4043_v49 = vadd.f32 2.0, %v5746_v14 }
 0x4e9   :  { %v5750_v63 = vpop.eup %5749  ;;  %v4487_v22 = vadd.f32 %v4486_v51, %v4262_v5  ;;  %v4041_v50 = vadd.f32 2.0, %v5748_v59  ;;  %v3987_v33 = vmul.f32 1.442695, %v3931_v55  ;;  %5767 = vlog2.f32 %v4228_v18 }
 0x4ea   :  { %v3932_v43 = vmul.f32 1.4285715, %v3894_v46  ;;  %v3899_v26 = vsub.f32 %v3734_v27, %v8191_v57  ;;  %v5752_v32 = vpop.eup %5751  ;;  %5769 = vpow2.f32 %v3993_v28  ;;  %v4270_v35 = vmul.f32 0.6931472, %v5750_v63 }
 0x4eb   :  { %v4488_v20 = vadd.f32 %v4487_v22, %v4264_v0  ;;  %v4231_v40 = vadd.f32 %v8334_v10, %v4041_v50  ;;  %v3736_v12 = vpop.xlane.xlu1 %3735  ;;  %5771 = vpow2.f32 %v3987_v33  ;;  %v8436_v18 = vmul.f32 1.442695, %v4137_v19 }
 0x4ec   :  { %v3730_v23 = vpop.xlane.xlu0 %3729  ;;  %v5754_v38 = vpop.eup %5753  ;;  %v3989_v17 = vmul.f32 1.442695, %v3932_v43  ;;  %v3937_v52 = vmul.f32 1.4285715, %v3899_v26  ;;  %v3900_v57 = vsub.f32 %v3736_v12, %v8308_v24  ;;  %v4233_v0 = vadd.f32 %v8351_v13, %v4043_v49 }
 0x4ed   :  { %v8434_v47 = vpop.eup %5755  ;;  %v4489_v41 = vadd.f32 %v4488_v20, %v4266_v36  ;;  %v4044_v5 = vadd.f32 2.0, %v5754_v38  ;;  %v3897_v14 = vsub.f32 %v3730_v23, %v8153_v30  ;;  %v8443_v48 = vmul.f32 0.6931472, %v5752_v32 }
 0x4ee   :  { %v5758_v60 = vpop.eup %5757  ;;  %5773 = vpow2.f32 %v3989_v17  ;;  %v3999_v10 = vmul.f32 1.442695, %v3937_v52  ;;  %v3938_v37 = vmul.f32 1.4285715, %v3900_v57 }
 0x4ef   :  { %v8441_v51 = vpop.eup %5759  ;;  %v4490_v55 = vadd.f32 %v4489_v41, %v4268_v42  ;;  %5775 = vlog2.f32 %v4231_v40  ;;  %v3732_v36 = vpop.xlane.xlu1 %3731  ;;  %v3935_v19 = vmul.f32 1.4285715, %v3897_v14  ;;  %v4276_v63 = vmul.f32 0.6931472, %v5758_v60 }
 0x4f0   :  { %v3742_v27 = vpop.xlane.xlu0 %3741  ;;  %v5762_v59 = vpop.eup %5761  ;;  %5777 = vpow2.f32 %v3999_v10  ;;  %v3898_v24 = vsub.f32 %v3732_v36, %v8252_v21  ;;  %v4234_v30 = vadd.f32 %v8321_v31, %v4044_v5  ;;  %v4001_v50 = vmul.f32 1.442695, %v3938_v37 }
 0x4f1   :  { %v3903_v13 = vsub.f32 %v3742_v27, %v9078_v3  ;;  %v5764_v46 = vpop.eup %5763  ;;  %v4491_v22 = vadd.f32 %v4490_v55, %v4270_v35  ;;  %5779 = vlog2.f32 %v4233_v0  ;;  %v3995_v33 = vmul.f32 1.442695, %v3935_v19 }
 0x4f2   :  { %v5766_v28 = vpop.eup %5765  ;;  %v4042_v42 = vadd.f32 2.0, %v5764_v46  ;;  %v3936_v49 = vmul.f32 1.4285715, %v3898_v24  ;;  %5781 = vpow2.f32 %v4001_v50  ;;  %v9085_v24 = vld [vmem:[#allocation25_spill] sm:$0xff] }
 0x4f3   :  { %v4492_v43 = vadd.f32 %v4491_v22, %v8428_v7  ;;  %v4047_v26 = vadd.f32 2.0, %v5766_v28  ;;  %v3941_v32 = vmul.f32 1.4285715, %v3903_v13  ;;  %v3744_v20 = vpop.xlane.xlu1 %3743  ;;  %v5768_v40 = vpop.eup %5767  ;;  %5783 = vpow2.f32 %v3995_v33 }
 0x4f4   :  { %v3738_v21 = vpop.xlane.xlu0 %3737  ;;  %v4232_v3 = vadd.f32 %v8345_v4, %v4042_v42  ;;  %v3997_v12 = vmul.f32 1.442695, %v3936_v49  ;;  %v3904_v31 = vsub.f32 %v3744_v20, %v8336_v39  ;;  %v5770_v23 = vpop.eup %5769  ;;  %5785 = vlog2.f32 %v4234_v30 }
 0x4f5   :  { %v4493_v38 = vadd.f32 %v4492_v43, %v4274_v25  ;;  %v4237_v35 = vadd.f32 %v8361_v8, %v4047_v26  ;;  %v4007_v17 = vmul.f32 1.442695, %v3941_v32  ;;  %v5772_v52 = vpop.eup %5771  ;;  %v4048_v7 = vadd.f32 2.0, %v5770_v23 }
 0x4f6   :  { %5787 = vlog2.f32 %v4232_v3  ;;  %v3942_v41 = vmul.f32 1.4285715, %v3904_v31  ;;  %v3901_v5 = vsub.f32 %v3738_v21, %v8184_v45  ;;  %v4278_v60 = vmul.f32 0.6931472, %v5768_v40 }
 0x4f7   :  { %v4494_v57 = vadd.f32 %v4493_v38, %v4276_v63  ;;  %5789 = vlog2.f32 %v4237_v35  ;;  %v4045_v4 = vadd.f32 2.0, %v5772_v52  ;;  %v3740_v0 = vpop.xlane.xlu1 %3739  ;;  %v4282_v39 = vmul.f32 0.6931472, %v5762_v59  ;;  %v9086_v59 = vld [vmem:[#allocation63_spill] sm:$0xff] }
 0x4f8   :  { %v3750_v10 = vpop.xlane.xlu0 %3749  ;;  %v5774_v14 = vpop.eup %5773  ;;  %v4238_v25 = vadd.f32 %v8375_v56, %v4048_v7  ;;  %5791 = vpow2.f32 %v3997_v12  ;;  %v4009_v55 = vmul.f32 1.442695, %v3942_v41  ;;  %v3939_v45 = vmul.f32 1.4285715, %v3901_v5 }
 0x4f9   :  { %v5776_v8 = vpop.eup %5775  ;;  %v4495_v37 = vadd.f32 %v4494_v57, %v4278_v60  ;;  %v4235_v36 = vadd.f32 %v8349_v6, %v4045_v4  ;;  %v4046_v27 = vadd.f32 2.0, %v5774_v14  ;;  %5793 = vpow2.f32 %v4007_v17  ;;  %v9087_v57 = vld [vmem:[#allocation102_spill] sm:$0xff] }
 0x4fa   :  { %v5778_v19 = vpop.eup %5777  ;;  %5795 = vlog2.f32 %v4238_v25  ;;  %v3902_v13 = vsub.f32 %v3740_v0, %v9085_v24  ;;  %v3907_v46 = vsub.f32 %v3750_v10, %v9084_v1  ;;  %v4284_v42 = vmul.f32 0.6931472, %v5776_v8 }
 0x4fb   :  { %v4496_v63 = vadd.f32 %v4495_v37, %v8443_v48  ;;  %5797 = vlog2.f32 %v4235_v36  ;;  %v4236_v56 = vadd.f32 %v9086_v59, %v4046_v27  ;;  %v4051_v22 = vadd.f32 2.0, %v5778_v19  ;;  %v3752_v30 = vpop.xlane.xlu1 %3751  ;;  %v5780_v28 = vpop.eup %5779  ;;  %v9088_v19 = vld [vmem:[#allocation161_spill] sm:$0xff] }
 0x4fc   :  { %v3746_v50 = vpop.xlane.xlu0 %3745  ;;  %5799 = vpow2.f32 %v4009_v55  ;;  %v4003_v6 = vmul.f32 1.442695, %v3939_v45  ;;  %v3940_v33 = vmul.f32 1.4285715, %v3902_v13  ;;  %v5782_v49 = vpop.eup %5781  ;;  %v3945_v32 = vmul.f32 1.4285715, %v3907_v46 }
 0x4fd   :  { %v4497_v43 = vadd.f32 %v4496_v63, %v4282_v39  ;;  %5801 = vlog2.f32 %v4236_v56  ;;  %v4241_v26 = vadd.f32 %v8385_v58, %v4051_v22  ;;  %v5784_v1 = vpop.eup %5783  ;;  %v4052_v20 = vadd.f32 2.0, %v5782_v49 }
 0x4fe   :  { %5803 = vpow2.f32 %v4003_v6  ;;  %v4005_v48 = vmul.f32 1.442695, %v3940_v33  ;;  %v3908_v21 = vsub.f32 %v3752_v30, %v8383_v9  ;;  %v5786_v40 = vpop.eup %5785  ;;  %v4288_v3 = vmul.f32 0.6931472, %v5780_v28 }
 0x4ff   :  { %v4498_v12 = vadd.f32 %v4497_v43, %v4284_v42  ;;  %v4049_v31 = vadd.f32 2.0, %v5784_v1  ;;  %v4015_v23 = vmul.f32 1.442695, %v3945_v32  ;;  %v3748_v38 = vpop.xlane.xlu1 %3747  ;;  %v4242_v52 = vadd.f32 %v8392_v16, %v4052_v20 }
 0x500   :  { %v3758_v35 = vpop.xlane.xlu0 %3757  ;;  %v5788_v17 = vpop.eup %5787  ;;  %5805 = vpow2.f32 %v4005_v48  ;;  %v3946_v7 = vmul.f32 1.4285715, %v3908_v21  ;;  %v3905_v58 = vsub.f32 %v3746_v50, %v9083_v29  ;;  %v3906_v9 = vsub.f32 %v3748_v38, %v8369_v62 }
 0x501   :  { %v5790_v41 = vpop.eup %5789  ;;  %v4286_v5 = vmul.f32 0.6931472, %v5788_v17  ;;  %v4239_v60 = vadd.f32 %v9087_v57, %v4049_v31  ;;  %5807 = vpow2.f32 %v4015_v23  ;;  %v4290_v0 = vmul.f32 0.6931472, %v5786_v40  ;;  %v9089_v23 = vld [vmem:[#allocation155_spill] sm:$0xff] }
 0x502   :  { %v5792_v4 = vpop.eup %5791  ;;  %5809 = vlog2.f32 %v4241_v26  ;;  %v4017_v10 = vmul.f32 1.442695, %v3946_v7  ;;  %v3943_v14 = vmul.f32 1.4285715, %v3905_v58  ;;  %v3944_v55 = vmul.f32 1.4285715, %v3906_v9 }
 0x503   :  { %v5794_v39 = vpop.eup %5793  ;;  %v4499_v25 = vadd.f32 %v4498_v12, %v4286_v5  ;;  %5811 = vlog2.f32 %v4239_v60  ;;  %v4050_v16 = vadd.f32 2.0, %v5792_v4  ;;  %v3870_v8 = vpop.xlane.xlu1 %3869  ;;  %v3911_v45 = vsub.f32 %v3758_v35, %v9088_v19 }
 0x504   :  { %v3754_v37 = vpop.xlane.xlu0 %3753  ;;  %v5796_v29 = vpop.eup %5795  ;;  %v4055_v36 = vadd.f32 2.0, %v5794_v39  ;;  %5813 = vpow2.f32 %v4017_v10  ;;  %v4011_v27 = vmul.f32 1.442695, %v3943_v14  ;;  %v4296_v13 = vmul.f32 0.6931472, %v5790_v41 }
 0x505   :  { %v5798_v24 = vpop.eup %5797  ;;  %v4500_v62 = vadd.f32 %v4499_v25, %v4288_v3  ;;  %v4240_v46 = vadd.f32 %v8367_v15, %v4050_v16  ;;  %v4013_v63 = vmul.f32 1.442695, %v3944_v55  ;;  %v3949_v30 = vmul.f32 1.4285715, %v3911_v45 }
 0x506   :  { %v5800_v59 = vpop.eup %5799  ;;  %v4292_v56 = vmul.f32 0.6931472, %v5798_v24  ;;  %v4245_v22 = vadd.f32 %v8398_v11, %v4055_v36  ;;  %5815 = vpow2.f32 %v4011_v27  ;;  %v4100_v6 = vsub.f32 %v3870_v8, %v8402_v53 }
 0x507   :  { %v5802_v50 = vpop.eup %5801  ;;  %v4501_v28 = vadd.f32 %v4500_v62, %v4290_v0  ;;  %5817 = vlog2.f32 %v4240_v46  ;;  %v4056_v42 = vadd.f32 2.0, %v5800_v59  ;;  %v3756_v33 = vpop.xlane.xlu1 %3755  ;;  %v4023_v32 = vmul.f32 1.442695, %v3949_v30 }
 0x508   :  { %v3646_v49 = vpop.xlane.xlu0 %3645  ;;  %v5804_v43 = vpop.eup %5803  ;;  %v4294_v26 = vmul.f32 0.6931472, %v5802_v50  ;;  %5819 = vlog2.f32 %v4242_v52  ;;  %v3909_v15 = vsub.f32 %v3754_v37, %v8250_v61  ;;  %v4298_v21 = vmul.f32 0.6931472, %v5796_v29 }
 0x509   :  { %v4502_v1 = vadd.f32 %v4501_v28, %v4292_v56  ;;  %v4246_v20 = vadd.f32 %v8407_v34, %v4056_v42  ;;  %v4053_v11 = vadd.f32 2.0, %v5804_v43  ;;  %5821 = vpow2.f32 %v4013_v63 }
 0x50a   :  { %v5806_v48 = vpop.eup %5805  ;;  %5823 = vpow2.f32 %v8436_v18  ;;  %v4138_v40 = vmul.f32 1.4285715, %v4100_v6  ;;  %v3947_v3 = vmul.f32 1.4285715, %v3909_v15  ;;  %v3910_v34 = vsub.f32 %v3756_v33, %v8402_v53 }
 0x50b   :  { %v5808_v12 = vpop.eup %5807  ;;  %v4503_v31 = vadd.f32 %v4502_v1, %v4294_v26  ;;  %5825 = vlog2.f32 %v4245_v22  ;;  %v4243_v38 = vadd.f32 %v9089_v23, %v4053_v11  ;;  %v4054_v35 = vadd.f32 2.0, %v5806_v48  ;;  %v3760_v17 = vpop.xlane.xlu1 %3759 }
 0x50c   :  { %v5810_v52 = vpop.eup %5809  ;;  %v4059_v61 = vadd.f32 2.0, %v5808_v12  ;;  %5827 = vpow2.f32 %v4023_v32  ;;  %v4211_v7 = vmul.f32 1.442695, %v4138_v40  ;;  %v4019_v5 = vmul.f32 1.442695, %v3947_v3  ;;  %v3872_v57 = vpop.xlane.xlu0 %3871 }
 0x50d   :  { %v5812_v58 = vpop.eup %5811  ;;  %v4504_v41 = vadd.f32 %v4503_v31, %v4296_v13  ;;  %5829 = vlog2.f32 %v4243_v38  ;;  %v4244_v18 = vadd.f32 %v8390_v54, %v4054_v35  ;;  %v3948_v4 = vmul.f32 1.4285715, %v3910_v34 }
 0x50e   :  { %v5814_v60 = vpop.eup %5813  ;;  %v4300_v9 = vmul.f32 0.6931472, %v5812_v58  ;;  %5831 = vlog2.f32 %v4246_v20  ;;  %v4249_v10 = vadd.f32 %v8441_v51, %v4059_v61  ;;  %v3912_v14 = vsub.f32 %v3760_v17, %v3646_v49 }
 0x50f   :  { %v4505_v0 = vadd.f32 %v4504_v41, %v4298_v21  ;;  %5833 = vlog2.f32 %v4244_v18  ;;  %v3874_v39 = vpop.xlane.xlu1 %3873  ;;  %v4021_v53 = vmul.f32 1.442695, %v3948_v4  ;;  %v4101_v16 = vsub.f32 %v3872_v57, %v9088_v19 }
 0x510   :  { %v5816_v25 = vpop.eup %5815  ;;  %5835 = vpow2.f32 %v4211_v7  ;;  %v4102_v55 = vsub.f32 %v3874_v39, %v3646_v49  ;;  %v4060_v37 = vadd.f32 2.0, %v5814_v60  ;;  %v3950_v45 = vmul.f32 1.4285715, %v3912_v14 }
 0x511   :  { %v5818_v8 = vpop.eup %5817  ;;  %v4506_v54 = vadd.f32 %v4505_v0, %v4300_v9  ;;  %v4057_v29 = vadd.f32 2.0, %v5816_v25  ;;  %5837 = vpow2.f32 %v4019_v5  ;;  %v4139_v24 = vmul.f32 1.4285715, %v4101_v16 }
 0x512   :  { %v5820_v36 = vpop.eup %5819  ;;  %v4302_v27 = vmul.f32 0.6931472, %v5818_v8  ;;  %5839 = vpow2.f32 %v4021_v53  ;;  %v4304_v51 = vmul.f32 0.6931472, %v5810_v52  ;;  %v4140_v46 = vmul.f32 1.4285715, %v4102_v55 }
 0x513   :  { %v5822_v62 = vpop.eup %5821  ;;  %5841 = vlog2.f32 %v4249_v10  ;;  %v4247_v13 = vadd.f32 %v8426_v44, %v4057_v29  ;;  %v4025_v56 = vmul.f32 1.442695, %v3950_v45  ;;  %v4213_v22 = vmul.f32 1.442695, %v4139_v24 }
 0x514   :  { %v5824_v63 = vpop.eup %5823  ;;  %v4507_v59 = vadd.f32 %v4506_v54, %v4302_v27  ;;  %v4058_v19 = vadd.f32 2.0, %v5822_v62  ;;  %v4306_v50 = vmul.f32 0.6931472, %v5820_v36  ;;  %v4215_v28 = vmul.f32 1.442695, %v4140_v46 }
 0x515   :  { %v5826_v30 = vpop.eup %5825  ;;  %5843 = vlog2.f32 %v4247_v13  ;;  %v4250_v33 = vadd.f32 %v8434_v47, %v4060_v37  ;;  %v4331_v10 = vlaneseq }
 0x516   :  { %v5828_v42 = vpop.eup %5827  ;;  %v4508_v6 = vadd.f32 %v4507_v59, %v4304_v51  ;;  %v4248_v49 = vadd.f32 %v8419_v2, %v4058_v19  ;;  %5845 = vpow2.f32 %v4025_v56  ;;  %v4312_v40 = vmul.f32 0.6931472, %v5826_v30 }
 0x517   :  { %v5830_v43 = vpop.eup %5829  ;;  %5847 = vpow2.f32 %v4213_v22  ;;  %v4063_v34 = vadd.f32 2.0, %v5828_v42  ;;  %v4332_v16 = vshrl.u32 %v4331_v10, 7 }
 0x518   :  { %v5832_v44 = vpop.eup %5831  ;;  %v4509_v26 = vadd.f32 %v4508_v6, %v4306_v50  ;;  %v4308_v32 = vmul.f32 0.6931472, %v5830_v43  ;;  %5849 = vlog2.f32 %v4248_v49 }
 0x519   :  { %v5834_v15 = vpop.eup %5833  ;;  %5851 = vpow2.f32 %v4215_v28  ;;  %v4314_v31 = vmul.f32 0.6931472, %v5832_v44  ;;  %v4369_v36 = vadd.s32 296, %v4332_v16 }
 0x51a   :  { %v5836_v1 = vpop.eup %5835  ;;  %v4510_v20 = vadd.f32 %v4509_v26, %v4308_v32  ;;  %v4310_v11 = vmul.f32 0.6931472, %v5834_v15  ;;  %5853 = vlog2.f32 %v4250_v33 }
 0x51b   :  { %v5838_v48 = vpop.eup %5837  ;;  %vm4446_vm0 = vcmp.lt.s32.totalorder %v4369_v36, 300 }
 0x51c   :  { %v5840_v21 = vpop.eup %5839  ;;  %v4511_v3 = vadd.f32 %v4510_v20, %v4310_v11  ;;  %v4061_v47 = vadd.f32 2.0, %v5838_v48 }
 0x51d   :  { %v5842_v12 = vpop.eup %5841  ;;  %v4062_v2 = vadd.f32 2.0, %v5840_v21 }
 0x51e   :  { %v4512_v23 = vadd.f32 %v4511_v3, %v4312_v40  ;;  %v4251_v38 = vadd.f32 %v5824_v63, %v4061_v47  ;;  %v4320_v14 = vmul.f32 0.6931472, %v5842_v12 }
 0x51f   :  { %v5844_v35 = vpop.eup %5843  ;;  %v4252_v17 = vadd.f32 %v5836_v1, %v4062_v2 }
 0x520   :  { %v5846_v52 = vpop.eup %5845  ;;  %v4513_v61 = vadd.f32 %v4512_v23, %v4314_v31  ;;  %v4316_v7 = vmul.f32 0.6931472, %v5844_v35  ;;  %5855 = vlog2.f32 %v4251_v38 }
 0x521   :  { %v5848_v58 = vpop.eup %5847  ;;  %5857 = vlog2.f32 %v4252_v17  ;;  %v4064_v5 = vadd.f32 2.0, %v5846_v52 }
 0x522   :  { %v5850_v41 = vpop.eup %5849  ;;  %v4514_v18 = vadd.f32 %v4513_v61, %v4316_v7  ;;  %v4253_v57 = vadd.f32 %v5848_v58, %v4063_v34 }
 0x523   :  { %v5852_v60 = vpop.eup %5851  ;;  %v4318_v9 = vmul.f32 0.6931472, %v5850_v41 }
 0x524   :  { %v5854_v4 = vpop.eup %5853  ;;  %5859 = vlog2.f32 %v4253_v57  ;;  %v4254_v0 = vadd.f32 %v5852_v60, %v4064_v5 }
 0x525   :  { %v4515_v39 = vadd.f32 %v4514_v18, %v4318_v9  ;;  %v4322_v25 = vmul.f32 0.6931472, %v5854_v4 }
 0x526   :  { %5861 = vlog2.f32 %v4254_v0 }
 0x527   :  { %v4516_v53 = vadd.f32 %v4515_v39, %v4320_v14 }
 0x529   :  { %v4517_v55 = vadd.f32 %v4516_v53, %v4322_v25 }
 0x52a   :  { %v5856_v8 = vpop.eup %5855 }
 0x52b   :  { %v5858_v54 = vpop.eup %5857  ;;  %v4324_v37 = vmul.f32 0.6931472, %v5856_v8 }
 0x52c   :  { %v4326_v29 = vmul.f32 0.6931472, %v5858_v54 }
 0x52d   :  { %v4518_v27 = vadd.f32 %v4517_v55, %v4324_v37 }
 0x52e   :  { %v5860_v45 = vpop.eup %5859 }
 0x52f   :  { %v4519_v24 = vadd.f32 %v4518_v27, %v4326_v29  ;;  %v4328_v62 = vmul.f32 0.6931472, %v5860_v45 }
 0x530   :  { %v5862_v51 = vpop.eup %5861 }
 0x531   :  { %v4330_v13 = vmul.f32 0.6931472, %v5862_v51  ;;  %v4520_v46 = vadd.f32 %v4519_v24, %v4328_v62 }
 0x533   :  { %v4484_v63 = vsel %vm4446_vm0, %v4330_v13, 0.0 }
 0x534   :  { %v4521_v59 = vadd.f32 %v4520_v46, %v4484_v63 }
 0x536   :  { %v4522_v19 = vrot.slane %v4521_v59, 4 }
 0x538   :  { %v4523_v56 = vadd.f32 %v4522_v19, %v4521_v59 }
 0x53a   :  { %v4524_v22 = vrot.slane %v4523_v56, 2 }
 0x53c   :  { %v4525_v30 = vadd.f32 %v4524_v22, %v4523_v56 }
 0x53e   :  { %v4526_v50 = vrot.slane %v4525_v30, 1 }
 0x540   :  { %v4527_v28 = vadd.f32 %v4526_v50, %v4525_v30 }
 0x542   :  { %4528 = vst [vmem:[#allocation16] sm:$0x1] %v4527_v28 }
 0x543   :  { %6050 = shalt.err (!%p6047_p12)
}
 0x544   :  { %s6051_s14 = scalar_lea.hbm %s8504_s12, 16 }
 0x545   :  { %p6052_p13 = scmp.ne.s32.totalorder %s8504_s12, %s6051_s14  ;;  %p6055_p0 = scmp.lt.u32.totalorder %s6051_s14, %s8504_s12 }
 0x547   :  { %p6057_p1 = pnand %p6055_p0, %p6052_p13 }
 0x549   :  { %6060 = shalt.err (!%p6057_p1)
}
 0x54a   :  { %4538 = dma.vmem_to_hbm [thread:$0]  %s4536_s26, 16, %s8504_s12, [#allocation4]  }
 0x54b   :  { %6071 = dma.done.wait [#allocation4], 16  }
 0x54c   :  { %6072 = vsyncadd [#allocation4], 4294967280 }
 0x54d   :  { %4542 = vsyncpa [#allocation3], 1 }
 0x54e   :  { %4543 = vsyncpa [#allocation6], 1 }
 0x54f   :  { %4544 = vsyncpa [#allocation9], 1 }
 0x550   :  { %4545 = vsyncpa [#allocation12], 1 }
 0x551   :  { %4546 = vsyncpa [#allocation15], 1 }
 0x552   :  { %4547 = vsyncpa [#allocation4], 1 }

</bundles_post_ra>
